<compile_context>
chip_gen: v7x
topology: tpu7x:2x2x1
jax: 0.10.0
libtpu: 0.0.40
codegen_flags: <defaults>
</compile_context>

<pallas_src>
import jax
import jax.numpy as jnp
from jax import lax
from jax.experimental import pallas as pl
from jax.experimental.pallas import tpu as pltpu


_VMEM_LIMIT = 32 * 1024 * 1024   # far above actual usage (<~2 MiB), safe on every generation


def _elu(x):
    # ELU with safe exp (both jnp.where branches are evaluated).
    return jnp.where(x > 0.0, x, jnp.exp(jnp.minimum(x, 0.0)) - 1.0)


def _fold_affine(p):
    # ConditionalLayer1d after each hidden Linear folds into the weights (num_classes=1):
    #   g*(W x + b) + be  ==  (W*g) x + (b*g + be)
    w1 = p["w1"] * p["g1"]
    b1 = p["b1"] * p["g1"] + p["be1"]
    w2 = p["w2"] * p["g2"]
    b2 = p["b2"] * p["g2"] + p["be2"]
    return w1, b1, w2, b2, p["w3"], p["b3"]


# --------------------------------------------------------------------------------------
# One-time parameter preparation: fold, transpose to feature-major, split, pack into one slab
# --------------------------------------------------------------------------------------

class _WeightPacker:
    """Packs all (transposed) weights/biases into one 2-D f32 slab.

    Row offsets are 8-aligned so every in-kernel static slice is sublane-tile aligned.
    """

    def __init__(self):
        self._blocks, self._rows, self._maxw = [], 0, 1

    def add(self, arr):
        arr = jnp.asarray(arr, jnp.float32)
        r, c = arr.shape
        off = self._rows
        self._blocks.append((off, arr))
        self._rows += ((r + 7) // 8) * 8
        self._maxw = max(self._maxw, c)
        return (off, r, c)                      # static metadata for in-kernel slicing

    def finalize(self):
        slab = jnp.zeros((self._rows, self._maxw), jnp.float32)
        for off, arr in self._blocks:
            r, c = arr.shape
            slab = slab.at[off:off + r, :c].set(arr)
        return slab


def prep_params(params):
    """Called ONCE at init (outside the jitted forward): fold conditional affines,
    transpose everything to the kernel's feature-major layout, split W1s, pack one slab."""
    pk = _WeightPacker()
    layers_meta = []
    for lp in params["layers"]:
        gnn, mlp = lp["gnn"], lp["mlp"]
        f_o = gnn["w_out"].shape[1]
        c_in = mlp["w1"].shape[0] - 2 * f_o
        m = {"c_in": c_in, "f_o": f_o}
        # GNN: first message-passing Linear split into [x | degree] parts (avoids an
        # in-kernel feature concat); all weights stored transposed (out, in).
        w0, b0 = gnn["mp"][0]
        f_x = w0.shape[0] - c_in
        m["gnn_mp0_wx"] = pk.add(w0[:f_x].T)
        m["gnn_mp0_wd"] = pk.add(w0[f_x:].T)
        m["gnn_mp0_b"] = pk.add(b0.T)
        m["gnn_mp_rest"] = [(pk.add(w.T), pk.add(b.T)) for (w, b) in gnn["mp"][1:]]
        m["gnn_out_w"] = pk.add(gnn["w_out"].T)
        m["gnn_out_b"] = pk.add(gnn["b_out"].T)
        # translate MLP (conditional affine folded); W1 split as [adjacency | x_i | x_j]
        w1, b1, w2, b2, w3, b3 = _fold_affine(mlp)
        m["w1a"] = pk.add(w1[:c_in].T)
        m["w1i"] = pk.add(w1[c_in:c_in + f_o].T)
        m["w1j"] = pk.add(w1[c_in + f_o:].T)
        m["b1"] = pk.add(b1.T)
        m["w2"] = pk.add(w2.T)
        m["b2"] = pk.add(b2.T)
        m["w3"] = pk.add(w3.T)
        m["b3"] = pk.add(b3.T)
        m["c_out"] = w3.shape[1]
        layers_meta.append(m)
    # final_read_score MLP: W1 split per channel group (no (sum_C, R) concat needed)
    w1, b1, w2, b2, w3, b3 = _fold_affine(params["final"])
    group_sizes = [2] + [m["c_out"] for m in layers_meta]
    assert sum(group_sizes) == w1.shape[0]
    fin = {"w1_groups": [], "group_sizes": group_sizes}
    off = 0
    for g in group_sizes:
        fin["w1_groups"].append(pk.add(w1[off:off + g].T))
        off += g
    fin["b1"] = pk.add(b1.T)
    fin["w2"] = pk.add(w2.T)
    fin["b2"] = pk.add(b2.T)
    fin["w3"] = pk.add(w3.T)
    fin["b3"] = pk.add(b3.T)
    slab = pk.finalize()
    meta = {"layers": layers_meta, "final": fin, "slab_shape": tuple(slab.shape)}
    return slab, meta


# --------------------------------------------------------------------------------------
# The single fused Pallas kernel (whole EDP-GNN forward, one graph per grid step)
# --------------------------------------------------------------------------------------

def build_forward(meta):
    layers, fin = meta["layers"], meta["final"]
    slab_rows, slab_cols = meta["slab_shape"]

    def forward(wslab, x, adjs, node_flags):
        B, N, _ = adjs.shape
        F0 = x.shape[-1]
        R = N * N
        f32 = jnp.float32

        def kernel(adj_ref, x_ref, fl_ref, w_ref, o_ref):
            def wb(e):                      # static slab slice -> (out, in) weight block
                off, r, c = e
                return w_ref[off:off + r, 0:c]

            # ---- index operators built in VMEM from 2-D iotas (no O(N^3) HBM constants,
            #      no vector int div/mod, no in-kernel transpose/reshape/concat) ----------
            n_nr = lax.broadcasted_iota(jnp.int32, (N, R), 0)
            r_nr = lax.broadcasted_iota(jnp.int32, (N, R), 1)
            sel_i = jnp.logical_and(r_nr >= n_nr * N, r_nr < (n_nr + 1) * N).astype(f32)
            r_rn = lax.broadcasted_iota(jnp.int32, (R, N), 0)
            n_rn = lax.broadcasted_iota(jnp.int32, (R, N), 1)
            sel_it = jnp.logical_and(r_rn >= n_rn * N, r_rn < (n_rn + 1) * N).astype(f32)
            iota_row = lax.broadcasted_iota(jnp.int32, (1, N), 1).astype(f32)
            iota_col = lax.broadcasted_iota(jnp.int32, (N, 1), 0).astype(f32)
            i_row = jnp.dot(iota_row, sel_i, preferred_element_type=f32)      # i = r // N
            j_row = lax.broadcasted_iota(jnp.int32, (1, R), 1).astype(f32) - float(N) * i_row
            i_col = jnp.dot(sel_it, iota_col, preferred_element_type=f32)
            j_col = lax.broadcasted_iota(jnp.int32, (R, 1), 0).astype(f32) - float(N) * i_col
            sel_j = (j_row == iota_col).astype(f32)        # (N,R): [r % N == n]
            sel_jt = (j_col == iota_row).astype(f32)       # (R,N)
            # lane permutation: (rows @ perm)[c, i*N+j] == rows[c, j*N+i]
            perm = (jnp.dot(sel_it, sel_j, preferred_element_type=f32)
                    * jnp.dot(sel_jt, sel_i, preferred_element_type=f32))     # (R,R)
            offdiag = 1.0 - (i_row == j_row).astype(f32)                      # (1,R)

            flags = fl_ref[...]                                               # (1,N)
            pm = (jnp.dot(flags, sel_i, preferred_element_type=f32)
                  * jnp.dot(flags, sel_j, preferred_element_type=f32))        # (1,R) pair mask

            # initial channel stack [A, 1-A] * pair_mask, edges on lanes
            a_rows = adj_ref[...]                                             # (1,R)
            ch0 = lax.broadcasted_iota(jnp.int32, (2, R), 0)
            rows = jnp.where(ch0 == 0, a_rows, 1.0 - a_rows) * pm             # (2,R)

            x_fm = x_ref[...] * flags                                         # (F0,N)
            groups = [rows]
            for lm in layers:
                # ------- multi-channel GNN (features on sublanes, nodes on lanes) --------
                mean_rows = jnp.sum(rows, axis=0, keepdims=True) * (1.0 / lm["c_in"])
                # amat = a_mean^T so that h_fm @ amat == (a_mean @ h)^T (no symmetry assumed)
                amat = jnp.dot(sel_j * mean_rows, sel_it, preferred_element_type=f32)  # (N,N)
                deg = jnp.dot(rows, sel_it, preferred_element_type=f32) * flags        # (C,N)
                msg_x = jnp.dot(x_fm, amat, preferred_element_type=f32)
                msg_d = jnp.dot(deg, amat, preferred_element_type=f32)
                h = _elu(jnp.dot(wb(lm["gnn_mp0_wx"]), msg_x + x_fm,
                                 preferred_element_type=f32)
                         + jnp.dot(wb(lm["gnn_mp0_wd"]), msg_d + deg,
                                   preferred_element_type=f32)
                         + wb(lm["gnn_mp0_b"])) * flags
                for (we, be) in lm["gnn_mp_rest"]:
                    msg = jnp.dot(h, amat, preferred_element_type=f32)
                    h = _elu(jnp.dot(wb(we), msg + h, preferred_element_type=f32)
                             + wb(be)) * flags
                x_fm = (jnp.dot(wb(lm["gnn_out_w"]), h, preferred_element_type=f32)
                        + wb(lm["gnn_out_b"])) * flags                         # (F_o,N)

                # ------- translate MLP over all N^2 edges (edges on lanes) ---------------
                p_i = jnp.dot(wb(lm["w1i"]), x_fm, preferred_element_type=f32)  # (H,N)
                p_j = jnp.dot(wb(lm["w1j"]), x_fm, preferred_element_type=f32)
                h1 = _elu(jnp.dot(wb(lm["w1a"]), rows, preferred_element_type=f32)
                          + jnp.dot(p_i, sel_i, preferred_element_type=f32)     # x_i bcast
                          + jnp.dot(p_j, sel_j, preferred_element_type=f32)     # x_j bcast
                          + wb(lm["b1"]))
                h2 = _elu(jnp.dot(wb(lm["w2"]), h1, preferred_element_type=f32)
                          + wb(lm["b2"]))
                raw = (jnp.dot(wb(lm["w3"]), h2, preferred_element_type=f32)
                       + wb(lm["b3"])) * pm                                     # pair mask
                rows = raw + jnp.dot(raw, perm, preferred_element_type=f32)     # + transpose
                groups.append(rows)

            # ------- final_read_score: per-group K-split of W1 (no (sum_C,R) concat) -----
            acc = jnp.dot(wb(fin["w1_groups"][0]), groups[0], preferred_element_type=f32)
            for wg, gr in zip(fin["w1_groups"][1:], groups[1:]):
                acc = acc + jnp.dot(wb(wg), gr, preferred_element_type=f32)
            z = _elu(acc + wb(fin["b1"]))
            z = _elu(jnp.dot(wb(fin["w2"]), z, preferred_element_type=f32) + wb(fin["b2"]))
            score = jnp.dot(wb(fin["w3"]), z, preferred_element_type=f32) + wb(fin["b3"])
            o_ref[...] = (score * offdiag).astype(o_ref.dtype)                 # lane-dense (1,R)

        adj_rows = adjs.reshape(B, 1, R)            # edges on lanes
        x_t = jnp.swapaxes(x, 1, 2)                 # (B, F0, N) feature-major
        fl_row = node_flags.reshape(B, 1, N)

        score_rows = pl.pallas_call(
            kernel,
            out_shape=jax.ShapeDtypeStruct((B, 1, R), jnp.float32),
            grid=(B,),
            in_specs=[
                pl.BlockSpec((None, 1, R), lambda b: (b, 0, 0)),
                pl.BlockSpec((None, F0, N), lambda b: (b, 0, 0)),
                pl.BlockSpec((None, 1, N), lambda b: (b, 0, 0)),
                pl.BlockSpec((slab_rows, slab_cols), lambda b: (0, 0)),   # constant slab
            ],
            out_specs=pl.BlockSpec((None, 1, R), lambda b: (b, 0, 0)),
            compiler_params=pltpu.CompilerParams(
                dimension_semantics=("parallel",), vmem_limit_bytes=_VMEM_LIMIT),
        )(adj_rows, x_t, fl_row, wslab)
        return score_rows.reshape(B, N, N)

    return forward


# --------------------------------------------------------------------------------------
# Plain-JAX reference (same reconstruction, node-major) for a correctness cross-check
# --------------------------------------------------------------------------------------

def _reference_forward(params, x, adjs, node_flags):
    B, N, _ = adjs.shape
    fl = node_flags[:, :, None]
    pair = node_flags[:, :, None] * node_flags[:, None, :]
    a0 = adjs[..., None]
    ch = jnp.concatenate([a0, 1.0 - a0], axis=-1) * pair[..., None]      # (B,N,N,C)
    stacks = [ch]
    h = x
    for lp in params["layers"]:
        a_mean = jnp.mean(ch, axis=-1)
        deg = jnp.sum(ch, axis=2)
        hh = jnp.concatenate([h, deg], axis=-1) * fl
        for (w, b) in lp["gnn"]["mp"]:
            msg = jnp.matmul(a_mean, hh)
            hh = _elu(jnp.matmul(msg + hh, w) + b) * fl
        x_o = (jnp.matmul(hh, lp["gnn"]["w_out"]) + lp["gnn"]["b_out"]) * fl
        w1, b1, w2, b2, w3, b3 = _fold_affine(lp["mlp"])
        f_o = x_o.shape[-1]
        xi = jnp.broadcast_to(x_o[:, :, None, :], (B, N, N, f_o))
        xj = jnp.broadcast_to(x_o[:, None, :, :], (B, N, N, f_o))
        feat = jnp.concatenate([ch, xi, xj], axis=-1)
        z = _elu(jnp.matmul(feat, w1) + b1)
        z = _elu(jnp.matmul(z, w2) + b2)
        raw = (jnp.matmul(z, w3) + b3) * pair[..., None]
        ch = raw + jnp.swapaxes(raw, 1, 2)
        stacks.append(ch)
        h = x_o
    allc = jnp.concatenate(stacks, axis=-1)
    w1, b1, w2, b2, w3, b3 = _fold_affine(params["final"])
    z = _elu(jnp.matmul(allc, w1) + b1)
    z = _elu(jnp.matmul(z, w2) + b2)
    score = (jnp.matmul(z, w3) + b3)[..., 0]
    return score * (1.0 - jnp.eye(N, dtype=score.dtype))[None]


# --------------------------------------------------------------------------------------
# Deterministic parameter construction (synthetic init; no checkpoint loading)
# --------------------------------------------------------------------------------------

def init_mlp3(key, d_in, hidden, d_out, use_bn):
    k1, k2, k3, k4, k5 = jax.random.split(key, 5)
    p = {
        "w1": jax.random.normal(k1, (d_in, hidden), jnp.float32) * (float(d_in) ** -0.5),
        "b1": jnp.zeros((1, hidden), jnp.float32),
        "w2": jax.random.normal(k2, (hidden, hidden), jnp.float32) * (float(hidden) ** -0.5),
        "b2": jnp.zeros((1, hidden), jnp.float32),
        "w3": jax.random.normal(k3, (hidden, d_out), jnp.float32) * (float(hidden) ** -0.5),
        "b3": jnp.zeros((1, d_out), jnp.float32),
    }
    if use_bn:
        p["g1"] = 1.0 + 0.05 * jax.random.normal(k4, (1, hidden), jnp.float32)
        p["be1"] = jnp.zeros((1, hidden), jnp.float32)
        p["g2"] = 1.0 + 0.05 * jax.random.normal(k5, (1, hidden), jnp.float32)
        p["be2"] = jnp.zeros((1, hidden), jnp.float32)
    else:
        p["g1"] = jnp.ones((1, hidden), jnp.float32)
        p["be1"] = jnp.zeros((1, hidden), jnp.float32)
        p["g2"] = jnp.ones((1, hidden), jnp.float32)
        p["be2"] = jnp.zeros((1, hidden), jnp.float32)
    return p


def init_gnn(key, feature_nums, out_dim):
    keys = jax.random.split(key, len(feature_nums))
    mp = []
    for i in range(len(feature_nums) - 1):
        w = jax.random.normal(keys[i], (feature_nums[i], feature_nums[i + 1]),
                              jnp.float32) * (float(feature_nums[i]) ** -0.5)
        b = jnp.zeros((1, feature_nums[i + 1]), jnp.float32)
        mp.append((w, b))
    w_out = jax.random.normal(keys[-1], (feature_nums[-1], out_dim),
                              jnp.float32) * (float(feature_nums[-1]) ** -0.5)
    b_out = jnp.zeros((1, out_dim), jnp.float32)
    return {"mp": mp, "w_out": w_out, "b_out": b_out}


def init_model(key, feature_num_list, channel_num_list, gnn_hidden_num_list=(8, 8)):
    channel_num_list = [2] + list(channel_num_list)
    assert len(channel_num_list) == len(feature_num_list)
    gnn_layer_num = len(feature_num_list) - 1
    keys = jax.random.split(key, gnn_layer_num + 1)
    layers = []
    for i in range(gnn_layer_num):
        kg, km = jax.random.split(keys[i])
        c_in, c_out = channel_num_list[i], channel_num_list[i + 1]
        out_dim = feature_num_list[i + 1]
        gnn_feature_list = [feature_num_list[i] + c_in] + list(gnn_hidden_num_list)
        gnn_p = init_gnn(kg, gnn_feature_list, out_dim)
        mlp_p = init_mlp3(km, c_in + 2 * out_dim, max(c_in, c_out) * 2, c_out, use_bn=True)
        layers.append({"gnn": gnn_p, "mlp": mlp_p})
    sum_c = sum(channel_num_list)
    final_p = init_mlp3(keys[-1], sum_c, sum_c * 2, 1, use_bn=False)
    return {"layers": layers, "final": final_p}


# --------------------------------------------------------------------------------------

if __name__ == "__main__":
    key = jax.random.PRNGKey(0)
    B, N, F0 = 2, 16, 4                       # num_classes=1, batch=2, max_node_number=16
    feature_num_list = [4, 6, 6]              # -> 2 EdgeDensePredictionGNNLayers
    channel_num_list = [4, 4]                 # full channel list becomes [2, 4, 4]

    kx, ka, kp = jax.random.split(key, 3)
    x = jax.random.normal(kx, (B, N, F0), jnp.float32)
    adjs = (jax.random.uniform(ka, (B, N, N)) > 0.5).astype(jnp.float32)
    adjs = jnp.triu(adjs, 1)
    adjs = adjs + jnp.swapaxes(adjs, -1, -2)                    # symmetric, zero diagonal
    node_flags = jnp.ones((B, N), jnp.float32).at[1, -3:].set(0.0)
    adjs = adjs * node_flags[:, :, None] * node_flags[:, None, :]
    x = x * node_flags[:, :, None]

    params = init_model(kp, feature_num_list, channel_num_list, gnn_hidden_num_list=(8, 8))
    wslab, meta = prep_params(params)          # affine fold + packing done once, outside jit

    fwd = jax.jit(build_forward(meta))
    score = jax.block_until_ready(fwd(wslab, x, adjs, node_flags))
    assert score.shape == (B, N, N)
    assert bool(jnp.all(jnp.isfinite(score)))

    # Cross-check against a plain-JAX reference of the same reconstruction (loose tolerance
    # to stay immune to TPU matmul-precision differences; structural bugs are O(0.1-1)).
    ref = jax.block_until_ready(jax.jit(_reference_forward)(params, x, adjs, node_flags))
    err = float(jnp.max(jnp.abs(score - ref)))
    tol = 5e-2 * (1.0 + float(jnp.max(jnp.abs(ref))))
    assert err <= tol, (err, tol)

    print("KERNEL_OK")
</pallas_src>

<mosaic_0001>
module attributes {stable_mosaic.version = 11 : i64} {
  func.func @kernel(%arg0: i32, %arg1: memref<1x1x256xf32, #tpu.memory_space<vmem>>, %arg2: memref<1x4x16xf32, #tpu.memory_space<vmem>>, %arg3: memref<1x1x16xf32, #tpu.memory_space<vmem>>, %arg4: memref<400x20xf32, #tpu.memory_space<vmem>>, %arg5: memref<1x1x256xf32, #tpu.memory_space<vmem>>) attributes {dimension_semantics = [#tpu.dimension_semantics<parallel>], iteration_bounds = array<i64: 2>, scalar_prefetch = 0 : i64, scratch_operands = 0 : i64, tpu.core_type = #tpu.core_type<tc>, window_params = [{transform_indices = @transform_0, window_bounds = array<i64: 1, 1, 256>}, {transform_indices = @transform_1, window_bounds = array<i64: 1, 4, 16>}, {transform_indices = @transform_2, window_bounds = array<i64: 1, 1, 16>}, {pipeline_mode = #tpu.pipeline_mode<synchronous>, transform_indices = @transform_3, window_bounds = array<i64: 400, 20>}, {transform_indices = @transform_4, window_bounds = array<i64: 1, 1, 256>}]} {
    %0 = tpu.iota {dimensions = array<i32: 0>} : vector<16x256xi32>
    %1 = tpu.iota {dimensions = array<i32: 1>} : vector<16x256xi32>
    %c16_i32 = arith.constant 16 : i32
    %2 = vector.broadcast %c16_i32 : i32 to vector<16x256xi32>
    %3 = arith.muli %0, %2 : vector<16x256xi32>
    %4 = arith.cmpi sge, %1, %3 : vector<16x256xi32>
    %c1_i32 = arith.constant 1 : i32
    %5 = vector.broadcast %c1_i32 : i32 to vector<16x256xi32>
    %6 = arith.addi %0, %5 : vector<16x256xi32>
    %c16_i32_0 = arith.constant 16 : i32
    %7 = vector.broadcast %c16_i32_0 : i32 to vector<16x256xi32>
    %8 = arith.muli %6, %7 : vector<16x256xi32>
    %9 = arith.cmpi slt, %1, %8 : vector<16x256xi32>
    %10 = arith.andi %4, %9 : vector<16x256xi1>
    %11 = arith.extui %10 : vector<16x256xi1> to vector<16x256xi32>
    %12 = arith.sitofp %11 : vector<16x256xi32> to vector<16x256xf32>
    %13 = tpu.iota {dimensions = array<i32: 0>} : vector<256x16xi32>
    %14 = tpu.iota {dimensions = array<i32: 1>} : vector<256x16xi32>
    %c16_i32_1 = arith.constant 16 : i32
    %15 = vector.broadcast %c16_i32_1 : i32 to vector<256x16xi32>
    %16 = arith.muli %14, %15 : vector<256x16xi32>
    %17 = arith.cmpi sge, %13, %16 : vector<256x16xi32>
    %c1_i32_2 = arith.constant 1 : i32
    %18 = vector.broadcast %c1_i32_2 : i32 to vector<256x16xi32>
    %19 = arith.addi %14, %18 : vector<256x16xi32>
    %c16_i32_3 = arith.constant 16 : i32
    %20 = vector.broadcast %c16_i32_3 : i32 to vector<256x16xi32>
    %21 = arith.muli %19, %20 : vector<256x16xi32>
    %22 = arith.cmpi slt, %13, %21 : vector<256x16xi32>
    %23 = arith.andi %17, %22 : vector<256x16xi1>
    %24 = arith.extui %23 : vector<256x16xi1> to vector<256x16xi32>
    %25 = arith.sitofp %24 : vector<256x16xi32> to vector<256x16xf32>
    %26 = tpu.iota {dimensions = array<i32: 1>} : vector<1x16xi32>
    %27 = arith.sitofp %26 : vector<1x16xi32> to vector<1x16xf32>
    %28 = tpu.iota {dimensions = array<i32: 0>} : vector<16x1xi32>
    %29 = arith.sitofp %28 : vector<16x1xi32> to vector<16x1xf32>
    %cst = arith.constant dense<0.000000e+00> : vector<1x256xf32>
    %30 = tpu.matmul %27, %12, %cst {dimension_numbers = #tpu.dot_dimension_numbers<[1], [0], [0], [1], [0, 0, 1, 1], [], []>} : vector<1x16xf32>, vector<16x256xf32>, vector<1x256xf32> -> vector<1x256xf32>
    %31 = tpu.iota {dimensions = array<i32: 1>} : vector<1x256xi32>
    %32 = arith.sitofp %31 : vector<1x256xi32> to vector<1x256xf32>
    %cst_4 = arith.constant 1.600000e+01 : f32
    %33 = vector.broadcast %cst_4 : f32 to vector<1x256xf32>
    %34 = arith.mulf %33, %30 : vector<1x256xf32>
    %35 = arith.subf %32, %34 : vector<1x256xf32>
    %cst_5 = arith.constant dense<0.000000e+00> : vector<256x1xf32>
    %36 = tpu.matmul %25, %29, %cst_5 {dimension_numbers = #tpu.dot_dimension_numbers<[1], [0], [0], [1], [0, 0, 1, 1], [], []>} : vector<256x16xf32>, vector<16x1xf32>, vector<256x1xf32> -> vector<256x1xf32>
    %37 = tpu.iota {dimensions = array<i32: 0>} : vector<256x1xi32>
    %38 = arith.sitofp %37 : vector<256x1xi32> to vector<256x1xf32>
    %cst_6 = arith.constant 1.600000e+01 : f32
    %39 = vector.broadcast %cst_6 : f32 to vector<256x1xf32>
    %40 = arith.mulf %39, %36 : vector<256x1xf32>
    %41 = arith.subf %38, %40 : vector<256x1xf32>
    %42 = vector.broadcast %35 : vector<1x256xf32> to vector<16x256xf32>
    %43 = vector.broadcast %29 : vector<16x1xf32> to vector<16x256xf32>
    %44 = arith.cmpf oeq, %42, %43 : vector<16x256xf32>
    %45 = arith.extui %44 : vector<16x256xi1> to vector<16x256xi32>
    %46 = arith.sitofp %45 : vector<16x256xi32> to vector<16x256xf32>
    %47 = vector.broadcast %41 : vector<256x1xf32> to vector<256x16xf32>
    %48 = vector.broadcast %27 : vector<1x16xf32> to vector<256x16xf32>
    %49 = arith.cmpf oeq, %47, %48 : vector<256x16xf32>
    %50 = arith.extui %49 : vector<256x16xi1> to vector<256x16xi32>
    %51 = arith.sitofp %50 : vector<256x16xi32> to vector<256x16xf32>
    %cst_7 = arith.constant dense<0.000000e+00> : vector<256x256xf32>
    %52 = tpu.matmul %25, %46, %cst_7 {dimension_numbers = #tpu.dot_dimension_numbers<[1], [0], [0], [1], [0, 0, 1, 1], [], []>} : vector<256x16xf32>, vector<16x256xf32>, vector<256x256xf32> -> vector<256x256xf32>
    %cst_8 = arith.constant dense<0.000000e+00> : vector<256x256xf32>
    %53 = tpu.matmul %51, %12, %cst_8 {dimension_numbers = #tpu.dot_dimension_numbers<[1], [0], [0], [1], [0, 0, 1, 1], [], []>} : vector<256x16xf32>, vector<16x256xf32>, vector<256x256xf32> -> vector<256x256xf32>
    %54 = arith.mulf %52, %53 : vector<256x256xf32>
    %55 = arith.cmpf oeq, %30, %35 : vector<1x256xf32>
    %56 = arith.extui %55 : vector<1x256xi1> to vector<1x256xi32>
    %57 = arith.sitofp %56 : vector<1x256xi32> to vector<1x256xf32>
    %cst_9 = arith.constant 1.000000e+00 : f32
    %58 = vector.broadcast %cst_9 : f32 to vector<1x256xf32>
    %59 = arith.subf %58, %57 : vector<1x256xf32>
    %c0 = arith.constant 0 : index
    %c0_10 = arith.constant 0 : index
    %c0_11 = arith.constant 0 : index
    %60 = vector.load %arg3[%c0, %c0_10, %c0_11] : memref<1x1x16xf32, #tpu.memory_space<vmem>>, vector<1x1x16xf32>
    %61 = vector.shape_cast %60 : vector<1x1x16xf32> to vector<1x16xf32>
    %cst_12 = arith.constant dense<0.000000e+00> : vector<1x256xf32>
    %62 = tpu.matmul %61, %12, %cst_12 {dimension_numbers = #tpu.dot_dimension_numbers<[1], [0], [0], [1], [0, 0, 1, 1], [], []>} : vector<1x16xf32>, vector<16x256xf32>, vector<1x256xf32> -> vector<1x256xf32>
    %cst_13 = arith.constant dense<0.000000e+00> : vector<1x256xf32>
    %63 = tpu.matmul %61, %46, %cst_13 {dimension_numbers = #tpu.dot_dimension_numbers<[1], [0], [0], [1], [0, 0, 1, 1], [], []>} : vector<1x16xf32>, vector<16x256xf32>, vector<1x256xf32> -> vector<1x256xf32>
    %64 = arith.mulf %62, %63 : vector<1x256xf32>
    %c0_14 = arith.constant 0 : index
    %c0_15 = arith.constant 0 : index
    %c0_16 = arith.constant 0 : index
    %65 = vector.load %arg1[%c0_14, %c0_15, %c0_16] : memref<1x1x256xf32, #tpu.memory_space<vmem>>, vector<1x1x256xf32>
    %66 = vector.shape_cast %65 : vector<1x1x256xf32> to vector<1x256xf32>
    %67 = tpu.iota {dimensions = array<i32: 0>} : vector<2x256xi32>
    %c0_i32 = arith.constant 0 : i32
    %68 = vector.broadcast %c0_i32 : i32 to vector<2x256xi32>
    %69 = arith.cmpi eq, %67, %68 : vector<2x256xi32>
    %cst_17 = arith.constant 1.000000e+00 : f32
    %70 = vector.broadcast %cst_17 : f32 to vector<1x256xf32>
    %71 = arith.subf %70, %66 : vector<1x256xf32>
    %72 = vector.shape_cast %66 : vector<1x256xf32> to vector<1x256xf32>
    %73 = vector.broadcast %72 : vector<1x256xf32> to vector<2x256xf32>
    %74 = vector.shape_cast %71 : vector<1x256xf32> to vector<1x256xf32>
    %75 = vector.broadcast %74 : vector<1x256xf32> to vector<2x256xf32>
    %76 = arith.select %69, %73, %75 : vector<2x256xi1>, vector<2x256xf32>
    %77 = vector.broadcast %64 : vector<1x256xf32> to vector<2x256xf32>
    %78 = arith.mulf %76, %77 : vector<2x256xf32>
    %c0_18 = arith.constant 0 : index
    %c0_19 = arith.constant 0 : index
    %c0_20 = arith.constant 0 : index
    %79 = vector.load %arg2[%c0_18, %c0_19, %c0_20] : memref<1x4x16xf32, #tpu.memory_space<vmem>>, vector<1x4x16xf32>
    %80 = vector.shape_cast %79 : vector<1x4x16xf32> to vector<4x16xf32>
    %81 = vector.broadcast %61 : vector<1x16xf32> to vector<4x16xf32>
    %82 = arith.mulf %80, %81 : vector<4x16xf32>
    %cst_21 = arith.constant dense<0.000000e+00> : vector<256xf32>
    %83 = vector.multi_reduction <add>, %78, %cst_21 [0] : vector<2x256xf32> to vector<256xf32>
    %84 = vector.shape_cast %83 : vector<256xf32> to vector<1x256xf32>
    %cst_22 = arith.constant 5.000000e-01 : f32
    %85 = vector.broadcast %cst_22 : f32 to vector<1x256xf32>
    %86 = arith.mulf %84, %85 : vector<1x256xf32>
    %87 = vector.broadcast %86 : vector<1x256xf32> to vector<16x256xf32>
    %88 = arith.mulf %46, %87 : vector<16x256xf32>
    %cst_23 = arith.constant dense<0.000000e+00> : vector<16x16xf32>
    %89 = tpu.matmul %88, %25, %cst_23 {dimension_numbers = #tpu.dot_dimension_numbers<[1], [0], [0], [1], [0, 0, 1, 1], [], []>} : vector<16x256xf32>, vector<256x16xf32>, vector<16x16xf32> -> vector<16x16xf32>
    %cst_24 = arith.constant dense<0.000000e+00> : vector<2x16xf32>
    %90 = tpu.matmul %78, %25, %cst_24 {dimension_numbers = #tpu.dot_dimension_numbers<[1], [0], [0], [1], [0, 0, 1, 1], [], []>} : vector<2x256xf32>, vector<256x16xf32>, vector<2x16xf32> -> vector<2x16xf32>
    %91 = vector.broadcast %61 : vector<1x16xf32> to vector<2x16xf32>
    %92 = arith.mulf %90, %91 : vector<2x16xf32>
    %cst_25 = arith.constant dense<0.000000e+00> : vector<4x16xf32>
    %93 = tpu.matmul %82, %89, %cst_25 {dimension_numbers = #tpu.dot_dimension_numbers<[1], [0], [0], [1], [0, 0, 1, 1], [], []>} : vector<4x16xf32>, vector<16x16xf32>, vector<4x16xf32> -> vector<4x16xf32>
    %cst_26 = arith.constant dense<0.000000e+00> : vector<2x16xf32>
    %94 = tpu.matmul %92, %89, %cst_26 {dimension_numbers = #tpu.dot_dimension_numbers<[1], [0], [0], [1], [0, 0, 1, 1], [], []>} : vector<2x16xf32>, vector<16x16xf32>, vector<2x16xf32> -> vector<2x16xf32>
    %c0_27 = arith.constant 0 : index
    %c0_28 = arith.constant 0 : index
    %95 = vector.load %arg4[%c0_27, %c0_28] : memref<400x20xf32, #tpu.memory_space<vmem>>, vector<8x4xf32>
    %96 = arith.addf %93, %82 : vector<4x16xf32>
    %cst_29 = arith.constant dense<0.000000e+00> : vector<8x16xf32>
    %97 = tpu.matmul %95, %96, %cst_29 {dimension_numbers = #tpu.dot_dimension_numbers<[1], [0], [0], [1], [0, 0, 1, 1], [], []>} : vector<8x4xf32>, vector<4x16xf32>, vector<8x16xf32> -> vector<8x16xf32>
    %c8 = arith.constant 8 : index
    %c0_30 = arith.constant 0 : index
    %98 = vector.load %arg4[%c8, %c0_30] : memref<400x20xf32, #tpu.memory_space<vmem>>, vector<8x2xf32>
    %99 = arith.addf %94, %92 : vector<2x16xf32>
    %cst_31 = arith.constant dense<0.000000e+00> : vector<8x16xf32>
    %100 = tpu.matmul %98, %99, %cst_31 {dimension_numbers = #tpu.dot_dimension_numbers<[1], [0], [0], [1], [0, 0, 1, 1], [], []>} : vector<8x2xf32>, vector<2x16xf32>, vector<8x16xf32> -> vector<8x16xf32>
    %101 = arith.addf %97, %100 : vector<8x16xf32>
    %c16 = arith.constant 16 : index
    %c0_32 = arith.constant 0 : index
    %102 = vector.load %arg4[%c16, %c0_32] : memref<400x20xf32, #tpu.memory_space<vmem>>, vector<8x1xf32>
    %103 = vector.broadcast %102 : vector<8x1xf32> to vector<8x16xf32>
    %104 = arith.addf %101, %103 : vector<8x16xf32>
    %cst_33 = arith.constant 0.000000e+00 : f32
    %105 = vector.broadcast %cst_33 : f32 to vector<8x16xf32>
    %106 = arith.cmpf ogt, %104, %105 : vector<8x16xf32>
    %cst_34 = arith.constant 0.000000e+00 : f32
    %107 = vector.broadcast %cst_34 : f32 to vector<8x16xf32>
    %108 = arith.minimumf %104, %107 : vector<8x16xf32>
    %109 = math.exp %108 : vector<8x16xf32>
    %cst_35 = arith.constant 1.000000e+00 : f32
    %110 = vector.broadcast %cst_35 : f32 to vector<8x16xf32>
    %111 = arith.subf %109, %110 : vector<8x16xf32>
    %112 = arith.select %106, %104, %111 : vector<8x16xi1>, vector<8x16xf32>
    %113 = vector.broadcast %61 : vector<1x16xf32> to vector<8x16xf32>
    %114 = arith.mulf %112, %113 : vector<8x16xf32>
    %cst_36 = arith.constant dense<0.000000e+00> : vector<8x16xf32>
    %115 = tpu.matmul %114, %89, %cst_36 {dimension_numbers = #tpu.dot_dimension_numbers<[1], [0], [0], [1], [0, 0, 1, 1], [], []>} : vector<8x16xf32>, vector<16x16xf32>, vector<8x16xf32> -> vector<8x16xf32>
    %c24 = arith.constant 24 : index
    %c0_37 = arith.constant 0 : index
    %116 = vector.load %arg4[%c24, %c0_37] : memref<400x20xf32, #tpu.memory_space<vmem>>, vector<8x8xf32>
    %117 = arith.addf %115, %114 : vector<8x16xf32>
    %cst_38 = arith.constant dense<0.000000e+00> : vector<8x16xf32>
    %118 = tpu.matmul %116, %117, %cst_38 {dimension_numbers = #tpu.dot_dimension_numbers<[1], [0], [0], [1], [0, 0, 1, 1], [], []>} : vector<8x8xf32>, vector<8x16xf32>, vector<8x16xf32> -> vector<8x16xf32>
    %c32 = arith.constant 32 : index
    %c0_39 = arith.constant 0 : index
    %119 = vector.load %arg4[%c32, %c0_39] : memref<400x20xf32, #tpu.memory_space<vmem>>, vector<8x1xf32>
    %120 = vector.broadcast %119 : vector<8x1xf32> to vector<8x16xf32>
    %121 = arith.addf %118, %120 : vector<8x16xf32>
    %cst_40 = arith.constant 0.000000e+00 : f32
    %122 = vector.broadcast %cst_40 : f32 to vector<8x16xf32>
    %123 = arith.cmpf ogt, %121, %122 : vector<8x16xf32>
    %cst_41 = arith.constant 0.000000e+00 : f32
    %124 = vector.broadcast %cst_41 : f32 to vector<8x16xf32>
    %125 = arith.minimumf %121, %124 : vector<8x16xf32>
    %126 = math.exp %125 : vector<8x16xf32>
    %cst_42 = arith.constant 1.000000e+00 : f32
    %127 = vector.broadcast %cst_42 : f32 to vector<8x16xf32>
    %128 = arith.subf %126, %127 : vector<8x16xf32>
    %129 = arith.select %123, %121, %128 : vector<8x16xi1>, vector<8x16xf32>
    %130 = vector.broadcast %61 : vector<1x16xf32> to vector<8x16xf32>
    %131 = arith.mulf %129, %130 : vector<8x16xf32>
    %c40 = arith.constant 40 : index
    %c0_43 = arith.constant 0 : index
    %132 = vector.load %arg4[%c40, %c0_43] : memref<400x20xf32, #tpu.memory_space<vmem>>, vector<6x8xf32>
    %cst_44 = arith.constant dense<0.000000e+00> : vector<6x16xf32>
    %133 = tpu.matmul %132, %131, %cst_44 {dimension_numbers = #tpu.dot_dimension_numbers<[1], [0], [0], [1], [0, 0, 1, 1], [], []>} : vector<6x8xf32>, vector<8x16xf32>, vector<6x16xf32> -> vector<6x16xf32>
    %c48 = arith.constant 48 : index
    %c0_45 = arith.constant 0 : index
    %134 = vector.load %arg4[%c48, %c0_45] : memref<400x20xf32, #tpu.memory_space<vmem>>, vector<6x1xf32>
    %135 = vector.broadcast %134 : vector<6x1xf32> to vector<6x16xf32>
    %136 = arith.addf %133, %135 : vector<6x16xf32>
    %137 = vector.broadcast %61 : vector<1x16xf32> to vector<6x16xf32>
    %138 = arith.mulf %136, %137 : vector<6x16xf32>
    %c64 = arith.constant 64 : index
    %c0_46 = arith.constant 0 : index
    %139 = vector.load %arg4[%c64, %c0_46] : memref<400x20xf32, #tpu.memory_space<vmem>>, vector<8x6xf32>
    %cst_47 = arith.constant dense<0.000000e+00> : vector<8x16xf32>
    %140 = tpu.matmul %139, %138, %cst_47 {dimension_numbers = #tpu.dot_dimension_numbers<[1], [0], [0], [1], [0, 0, 1, 1], [], []>} : vector<8x6xf32>, vector<6x16xf32>, vector<8x16xf32> -> vector<8x16xf32>
    %c72 = arith.constant 72 : index
    %c0_48 = arith.constant 0 : index
    %141 = vector.load %arg4[%c72, %c0_48] : memref<400x20xf32, #tpu.memory_space<vmem>>, vector<8x6xf32>
    %cst_49 = arith.constant dense<0.000000e+00> : vector<8x16xf32>
    %142 = tpu.matmul %141, %138, %cst_49 {dimension_numbers = #tpu.dot_dimension_numbers<[1], [0], [0], [1], [0, 0, 1, 1], [], []>} : vector<8x6xf32>, vector<6x16xf32>, vector<8x16xf32> -> vector<8x16xf32>
    %c56 = arith.constant 56 : index
    %c0_50 = arith.constant 0 : index
    %143 = vector.load %arg4[%c56, %c0_50] : memref<400x20xf32, #tpu.memory_space<vmem>>, vector<8x2xf32>
    %cst_51 = arith.constant dense<0.000000e+00> : vector<8x256xf32>
    %144 = tpu.matmul %143, %78, %cst_51 {dimension_numbers = #tpu.dot_dimension_numbers<[1], [0], [0], [1], [0, 0, 1, 1], [], []>} : vector<8x2xf32>, vector<2x256xf32>, vector<8x256xf32> -> vector<8x256xf32>
    %cst_52 = arith.constant dense<0.000000e+00> : vector<8x256xf32>
    %145 = tpu.matmul %140, %12, %cst_52 {dimension_numbers = #tpu.dot_dimension_numbers<[1], [0], [0], [1], [0, 0, 1, 1], [], []>} : vector<8x16xf32>, vector<16x256xf32>, vector<8x256xf32> -> vector<8x256xf32>
    %146 = arith.addf %144, %145 : vector<8x256xf32>
    %cst_53 = arith.constant dense<0.000000e+00> : vector<8x256xf32>
    %147 = tpu.matmul %142, %46, %cst_53 {dimension_numbers = #tpu.dot_dimension_numbers<[1], [0], [0], [1], [0, 0, 1, 1], [], []>} : vector<8x16xf32>, vector<16x256xf32>, vector<8x256xf32> -> vector<8x256xf32>
    %148 = arith.addf %146, %147 : vector<8x256xf32>
    %c80 = arith.constant 80 : index
    %c0_54 = arith.constant 0 : index
    %149 = vector.load %arg4[%c80, %c0_54] : memref<400x20xf32, #tpu.memory_space<vmem>>, vector<8x1xf32>
    %150 = vector.broadcast %149 : vector<8x1xf32> to vector<8x256xf32>
    %151 = arith.addf %148, %150 : vector<8x256xf32>
    %cst_55 = arith.constant 0.000000e+00 : f32
    %152 = vector.broadcast %cst_55 : f32 to vector<8x256xf32>
    %153 = arith.cmpf ogt, %151, %152 : vector<8x256xf32>
    %cst_56 = arith.constant 0.000000e+00 : f32
    %154 = vector.broadcast %cst_56 : f32 to vector<8x256xf32>
    %155 = arith.minimumf %151, %154 : vector<8x256xf32>
    %156 = math.exp %155 : vector<8x256xf32>
    %cst_57 = arith.constant 1.000000e+00 : f32
    %157 = vector.broadcast %cst_57 : f32 to vector<8x256xf32>
    %158 = arith.subf %156, %157 : vector<8x256xf32>
    %159 = arith.select %153, %151, %158 : vector<8x256xi1>, vector<8x256xf32>
    %c88 = arith.constant 88 : index
    %c0_58 = arith.constant 0 : index
    %160 = vector.load %arg4[%c88, %c0_58] : memref<400x20xf32, #tpu.memory_space<vmem>>, vector<8x8xf32>
    %cst_59 = arith.constant dense<0.000000e+00> : vector<8x256xf32>
    %161 = tpu.matmul %160, %159, %cst_59 {dimension_numbers = #tpu.dot_dimension_numbers<[1], [0], [0], [1], [0, 0, 1, 1], [], []>} : vector<8x8xf32>, vector<8x256xf32>, vector<8x256xf32> -> vector<8x256xf32>
    %c96 = arith.constant 96 : index
    %c0_60 = arith.constant 0 : index
    %162 = vector.load %arg4[%c96, %c0_60] : memref<400x20xf32, #tpu.memory_space<vmem>>, vector<8x1xf32>
    %163 = vector.broadcast %162 : vector<8x1xf32> to vector<8x256xf32>
    %164 = arith.addf %161, %163 : vector<8x256xf32>
    %cst_61 = arith.constant 0.000000e+00 : f32
    %165 = vector.broadcast %cst_61 : f32 to vector<8x256xf32>
    %166 = arith.cmpf ogt, %164, %165 : vector<8x256xf32>
    %cst_62 = arith.constant 0.000000e+00 : f32
    %167 = vector.broadcast %cst_62 : f32 to vector<8x256xf32>
    %168 = arith.minimumf %164, %167 : vector<8x256xf32>
    %169 = math.exp %168 : vector<8x256xf32>
    %cst_63 = arith.constant 1.000000e+00 : f32
    %170 = vector.broadcast %cst_63 : f32 to vector<8x256xf32>
    %171 = arith.subf %169, %170 : vector<8x256xf32>
    %172 = arith.select %166, %164, %171 : vector<8x256xi1>, vector<8x256xf32>
    %c104 = arith.constant 104 : index
    %c0_64 = arith.constant 0 : index
    %173 = vector.load %arg4[%c104, %c0_64] : memref<400x20xf32, #tpu.memory_space<vmem>>, vector<4x8xf32>
    %cst_65 = arith.constant dense<0.000000e+00> : vector<4x256xf32>
    %174 = tpu.matmul %173, %172, %cst_65 {dimension_numbers = #tpu.dot_dimension_numbers<[1], [0], [0], [1], [0, 0, 1, 1], [], []>} : vector<4x8xf32>, vector<8x256xf32>, vector<4x256xf32> -> vector<4x256xf32>
    %c112 = arith.constant 112 : index
    %c0_66 = arith.constant 0 : index
    %175 = vector.load %arg4[%c112, %c0_66] : memref<400x20xf32, #tpu.memory_space<vmem>>, vector<4x1xf32>
    %176 = vector.broadcast %175 : vector<4x1xf32> to vector<4x256xf32>
    %177 = arith.addf %174, %176 : vector<4x256xf32>
    %178 = vector.broadcast %64 : vector<1x256xf32> to vector<4x256xf32>
    %179 = arith.mulf %177, %178 : vector<4x256xf32>
    %cst_67 = arith.constant dense<0.000000e+00> : vector<4x256xf32>
    %180 = tpu.matmul %179, %54, %cst_67 {dimension_numbers = #tpu.dot_dimension_numbers<[1], [0], [0], [1], [0, 0, 1, 1], [], []>} : vector<4x256xf32>, vector<256x256xf32>, vector<4x256xf32> -> vector<4x256xf32>
    %181 = arith.addf %179, %180 : vector<4x256xf32>
    %cst_68 = arith.constant dense<0.000000e+00> : vector<256xf32>
    %182 = vector.multi_reduction <add>, %181, %cst_68 [0] : vector<4x256xf32> to vector<256xf32>
    %183 = vector.shape_cast %182 : vector<256xf32> to vector<1x256xf32>
    %cst_69 = arith.constant 2.500000e-01 : f32
    %184 = vector.broadcast %cst_69 : f32 to vector<1x256xf32>
    %185 = arith.mulf %183, %184 : vector<1x256xf32>
    %186 = vector.broadcast %185 : vector<1x256xf32> to vector<16x256xf32>
    %187 = arith.mulf %46, %186 : vector<16x256xf32>
    %cst_70 = arith.constant dense<0.000000e+00> : vector<16x16xf32>
    %188 = tpu.matmul %187, %25, %cst_70 {dimension_numbers = #tpu.dot_dimension_numbers<[1], [0], [0], [1], [0, 0, 1, 1], [], []>} : vector<16x256xf32>, vector<256x16xf32>, vector<16x16xf32> -> vector<16x16xf32>
    %cst_71 = arith.constant dense<0.000000e+00> : vector<4x16xf32>
    %189 = tpu.matmul %181, %25, %cst_71 {dimension_numbers = #tpu.dot_dimension_numbers<[1], [0], [0], [1], [0, 0, 1, 1], [], []>} : vector<4x256xf32>, vector<256x16xf32>, vector<4x16xf32> -> vector<4x16xf32>
    %190 = vector.broadcast %61 : vector<1x16xf32> to vector<4x16xf32>
    %191 = arith.mulf %189, %190 : vector<4x16xf32>
    %cst_72 = arith.constant dense<0.000000e+00> : vector<6x16xf32>
    %192 = tpu.matmul %138, %188, %cst_72 {dimension_numbers = #tpu.dot_dimension_numbers<[1], [0], [0], [1], [0, 0, 1, 1], [], []>} : vector<6x16xf32>, vector<16x16xf32>, vector<6x16xf32> -> vector<6x16xf32>
    %cst_73 = arith.constant dense<0.000000e+00> : vector<4x16xf32>
    %193 = tpu.matmul %191, %188, %cst_73 {dimension_numbers = #tpu.dot_dimension_numbers<[1], [0], [0], [1], [0, 0, 1, 1], [], []>} : vector<4x16xf32>, vector<16x16xf32>, vector<4x16xf32> -> vector<4x16xf32>
    %c120 = arith.constant 120 : index
    %c0_74 = arith.constant 0 : index
    %194 = vector.load %arg4[%c120, %c0_74] : memref<400x20xf32, #tpu.memory_space<vmem>>, vector<8x6xf32>
    %195 = arith.addf %192, %138 : vector<6x16xf32>
    %cst_75 = arith.constant dense<0.000000e+00> : vector<8x16xf32>
    %196 = tpu.matmul %194, %195, %cst_75 {dimension_numbers = #tpu.dot_dimension_numbers<[1], [0], [0], [1], [0, 0, 1, 1], [], []>} : vector<8x6xf32>, vector<6x16xf32>, vector<8x16xf32> -> vector<8x16xf32>
    %c128 = arith.constant 128 : index
    %c0_76 = arith.constant 0 : index
    %197 = vector.load %arg4[%c128, %c0_76] : memref<400x20xf32, #tpu.memory_space<vmem>>, vector<8x4xf32>
    %198 = arith.addf %193, %191 : vector<4x16xf32>
    %cst_77 = arith.constant dense<0.000000e+00> : vector<8x16xf32>
    %199 = tpu.matmul %197, %198, %cst_77 {dimension_numbers = #tpu.dot_dimension_numbers<[1], [0], [0], [1], [0, 0, 1, 1], [], []>} : vector<8x4xf32>, vector<4x16xf32>, vector<8x16xf32> -> vector<8x16xf32>
    %200 = arith.addf %196, %199 : vector<8x16xf32>
    %c136 = arith.constant 136 : index
    %c0_78 = arith.constant 0 : index
    %201 = vector.load %arg4[%c136, %c0_78] : memref<400x20xf32, #tpu.memory_space<vmem>>, vector<8x1xf32>
    %202 = vector.broadcast %201 : vector<8x1xf32> to vector<8x16xf32>
    %203 = arith.addf %200, %202 : vector<8x16xf32>
    %cst_79 = arith.constant 0.000000e+00 : f32
    %204 = vector.broadcast %cst_79 : f32 to vector<8x16xf32>
    %205 = arith.cmpf ogt, %203, %204 : vector<8x16xf32>
    %cst_80 = arith.constant 0.000000e+00 : f32
    %206 = vector.broadcast %cst_80 : f32 to vector<8x16xf32>
    %207 = arith.minimumf %203, %206 : vector<8x16xf32>
    %208 = math.exp %207 : vector<8x16xf32>
    %cst_81 = arith.constant 1.000000e+00 : f32
    %209 = vector.broadcast %cst_81 : f32 to vector<8x16xf32>
    %210 = arith.subf %208, %209 : vector<8x16xf32>
    %211 = arith.select %205, %203, %210 : vector<8x16xi1>, vector<8x16xf32>
    %212 = vector.broadcast %61 : vector<1x16xf32> to vector<8x16xf32>
    %213 = arith.mulf %211, %212 : vector<8x16xf32>
    %cst_82 = arith.constant dense<0.000000e+00> : vector<8x16xf32>
    %214 = tpu.matmul %213, %188, %cst_82 {dimension_numbers = #tpu.dot_dimension_numbers<[1], [0], [0], [1], [0, 0, 1, 1], [], []>} : vector<8x16xf32>, vector<16x16xf32>, vector<8x16xf32> -> vector<8x16xf32>
    %c144 = arith.constant 144 : index
    %c0_83 = arith.constant 0 : index
    %215 = vector.load %arg4[%c144, %c0_83] : memref<400x20xf32, #tpu.memory_space<vmem>>, vector<8x8xf32>
    %216 = arith.addf %214, %213 : vector<8x16xf32>
    %cst_84 = arith.constant dense<0.000000e+00> : vector<8x16xf32>
    %217 = tpu.matmul %215, %216, %cst_84 {dimension_numbers = #tpu.dot_dimension_numbers<[1], [0], [0], [1], [0, 0, 1, 1], [], []>} : vector<8x8xf32>, vector<8x16xf32>, vector<8x16xf32> -> vector<8x16xf32>
    %c152 = arith.constant 152 : index
    %c0_85 = arith.constant 0 : index
    %218 = vector.load %arg4[%c152, %c0_85] : memref<400x20xf32, #tpu.memory_space<vmem>>, vector<8x1xf32>
    %219 = vector.broadcast %218 : vector<8x1xf32> to vector<8x16xf32>
    %220 = arith.addf %217, %219 : vector<8x16xf32>
    %cst_86 = arith.constant 0.000000e+00 : f32
    %221 = vector.broadcast %cst_86 : f32 to vector<8x16xf32>
    %222 = arith.cmpf ogt, %220, %221 : vector<8x16xf32>
    %cst_87 = arith.constant 0.000000e+00 : f32
    %223 = vector.broadcast %cst_87 : f32 to vector<8x16xf32>
    %224 = arith.minimumf %220, %223 : vector<8x16xf32>
    %225 = math.exp %224 : vector<8x16xf32>
    %cst_88 = arith.constant 1.000000e+00 : f32
    %226 = vector.broadcast %cst_88 : f32 to vector<8x16xf32>
    %227 = arith.subf %225, %226 : vector<8x16xf32>
    %228 = arith.select %222, %220, %227 : vector<8x16xi1>, vector<8x16xf32>
    %229 = vector.broadcast %61 : vector<1x16xf32> to vector<8x16xf32>
    %230 = arith.mulf %228, %229 : vector<8x16xf32>
    %c160 = arith.constant 160 : index
    %c0_89 = arith.constant 0 : index
    %231 = vector.load %arg4[%c160, %c0_89] : memref<400x20xf32, #tpu.memory_space<vmem>>, vector<6x8xf32>
    %cst_90 = arith.constant dense<0.000000e+00> : vector<6x16xf32>
    %232 = tpu.matmul %231, %230, %cst_90 {dimension_numbers = #tpu.dot_dimension_numbers<[1], [0], [0], [1], [0, 0, 1, 1], [], []>} : vector<6x8xf32>, vector<8x16xf32>, vector<6x16xf32> -> vector<6x16xf32>
    %c168 = arith.constant 168 : index
    %c0_91 = arith.constant 0 : index
    %233 = vector.load %arg4[%c168, %c0_91] : memref<400x20xf32, #tpu.memory_space<vmem>>, vector<6x1xf32>
    %234 = vector.broadcast %233 : vector<6x1xf32> to vector<6x16xf32>
    %235 = arith.addf %232, %234 : vector<6x16xf32>
    %236 = vector.broadcast %61 : vector<1x16xf32> to vector<6x16xf32>
    %237 = arith.mulf %235, %236 : vector<6x16xf32>
    %c184 = arith.constant 184 : index
    %c0_92 = arith.constant 0 : index
    %238 = vector.load %arg4[%c184, %c0_92] : memref<400x20xf32, #tpu.memory_space<vmem>>, vector<8x6xf32>
    %cst_93 = arith.constant dense<0.000000e+00> : vector<8x16xf32>
    %239 = tpu.matmul %238, %237, %cst_93 {dimension_numbers = #tpu.dot_dimension_numbers<[1], [0], [0], [1], [0, 0, 1, 1], [], []>} : vector<8x6xf32>, vector<6x16xf32>, vector<8x16xf32> -> vector<8x16xf32>
    %c192 = arith.constant 192 : index
    %c0_94 = arith.constant 0 : index
    %240 = vector.load %arg4[%c192, %c0_94] : memref<400x20xf32, #tpu.memory_space<vmem>>, vector<8x6xf32>
    %cst_95 = arith.constant dense<0.000000e+00> : vector<8x16xf32>
    %241 = tpu.matmul %240, %237, %cst_95 {dimension_numbers = #tpu.dot_dimension_numbers<[1], [0], [0], [1], [0, 0, 1, 1], [], []>} : vector<8x6xf32>, vector<6x16xf32>, vector<8x16xf32> -> vector<8x16xf32>
    %c176 = arith.constant 176 : index
    %c0_96 = arith.constant 0 : index
    %242 = vector.load %arg4[%c176, %c0_96] : memref<400x20xf32, #tpu.memory_space<vmem>>, vector<8x4xf32>
    %cst_97 = arith.constant dense<0.000000e+00> : vector<8x256xf32>
    %243 = tpu.matmul %242, %181, %cst_97 {dimension_numbers = #tpu.dot_dimension_numbers<[1], [0], [0], [1], [0, 0, 1, 1], [], []>} : vector<8x4xf32>, vector<4x256xf32>, vector<8x256xf32> -> vector<8x256xf32>
    %cst_98 = arith.constant dense<0.000000e+00> : vector<8x256xf32>
    %244 = tpu.matmul %239, %12, %cst_98 {dimension_numbers = #tpu.dot_dimension_numbers<[1], [0], [0], [1], [0, 0, 1, 1], [], []>} : vector<8x16xf32>, vector<16x256xf32>, vector<8x256xf32> -> vector<8x256xf32>
    %245 = arith.addf %243, %244 : vector<8x256xf32>
    %cst_99 = arith.constant dense<0.000000e+00> : vector<8x256xf32>
    %246 = tpu.matmul %241, %46, %cst_99 {dimension_numbers = #tpu.dot_dimension_numbers<[1], [0], [0], [1], [0, 0, 1, 1], [], []>} : vector<8x16xf32>, vector<16x256xf32>, vector<8x256xf32> -> vector<8x256xf32>
    %247 = arith.addf %245, %246 : vector<8x256xf32>
    %c200 = arith.constant 200 : index
    %c0_100 = arith.constant 0 : index
    %248 = vector.load %arg4[%c200, %c0_100] : memref<400x20xf32, #tpu.memory_space<vmem>>, vector<8x1xf32>
    %249 = vector.broadcast %248 : vector<8x1xf32> to vector<8x256xf32>
    %250 = arith.addf %247, %249 : vector<8x256xf32>
    %cst_101 = arith.constant 0.000000e+00 : f32
    %251 = vector.broadcast %cst_101 : f32 to vector<8x256xf32>
    %252 = arith.cmpf ogt, %250, %251 : vector<8x256xf32>
    %cst_102 = arith.constant 0.000000e+00 : f32
    %253 = vector.broadcast %cst_102 : f32 to vector<8x256xf32>
    %254 = arith.minimumf %250, %253 : vector<8x256xf32>
    %255 = math.exp %254 : vector<8x256xf32>
    %cst_103 = arith.constant 1.000000e+00 : f32
    %256 = vector.broadcast %cst_103 : f32 to vector<8x256xf32>
    %257 = arith.subf %255, %256 : vector<8x256xf32>
    %258 = arith.select %252, %250, %257 : vector<8x256xi1>, vector<8x256xf32>
    %c208 = arith.constant 208 : index
    %c0_104 = arith.constant 0 : index
    %259 = vector.load %arg4[%c208, %c0_104] : memref<400x20xf32, #tpu.memory_space<vmem>>, vector<8x8xf32>
    %cst_105 = arith.constant dense<0.000000e+00> : vector<8x256xf32>
    %260 = tpu.matmul %259, %258, %cst_105 {dimension_numbers = #tpu.dot_dimension_numbers<[1], [0], [0], [1], [0, 0, 1, 1], [], []>} : vector<8x8xf32>, vector<8x256xf32>, vector<8x256xf32> -> vector<8x256xf32>
    %c216 = arith.constant 216 : index
    %c0_106 = arith.constant 0 : index
    %261 = vector.load %arg4[%c216, %c0_106] : memref<400x20xf32, #tpu.memory_space<vmem>>, vector<8x1xf32>
    %262 = vector.broadcast %261 : vector<8x1xf32> to vector<8x256xf32>
    %263 = arith.addf %260, %262 : vector<8x256xf32>
    %cst_107 = arith.constant 0.000000e+00 : f32
    %264 = vector.broadcast %cst_107 : f32 to vector<8x256xf32>
    %265 = arith.cmpf ogt, %263, %264 : vector<8x256xf32>
    %cst_108 = arith.constant 0.000000e+00 : f32
    %266 = vector.broadcast %cst_108 : f32 to vector<8x256xf32>
    %267 = arith.minimumf %263, %266 : vector<8x256xf32>
    %268 = math.exp %267 : vector<8x256xf32>
    %cst_109 = arith.constant 1.000000e+00 : f32
    %269 = vector.broadcast %cst_109 : f32 to vector<8x256xf32>
    %270 = arith.subf %268, %269 : vector<8x256xf32>
    %271 = arith.select %265, %263, %270 : vector<8x256xi1>, vector<8x256xf32>
    %c224 = arith.constant 224 : index
    %c0_110 = arith.constant 0 : index
    %272 = vector.load %arg4[%c224, %c0_110] : memref<400x20xf32, #tpu.memory_space<vmem>>, vector<4x8xf32>
    %cst_111 = arith.constant dense<0.000000e+00> : vector<4x256xf32>
    %273 = tpu.matmul %272, %271, %cst_111 {dimension_numbers = #tpu.dot_dimension_numbers<[1], [0], [0], [1], [0, 0, 1, 1], [], []>} : vector<4x8xf32>, vector<8x256xf32>, vector<4x256xf32> -> vector<4x256xf32>
    %c232 = arith.constant 232 : index
    %c0_112 = arith.constant 0 : index
    %274 = vector.load %arg4[%c232, %c0_112] : memref<400x20xf32, #tpu.memory_space<vmem>>, vector<4x1xf32>
    %275 = vector.broadcast %274 : vector<4x1xf32> to vector<4x256xf32>
    %276 = arith.addf %273, %275 : vector<4x256xf32>
    %277 = vector.broadcast %64 : vector<1x256xf32> to vector<4x256xf32>
    %278 = arith.mulf %276, %277 : vector<4x256xf32>
    %cst_113 = arith.constant dense<0.000000e+00> : vector<4x256xf32>
    %279 = tpu.matmul %278, %54, %cst_113 {dimension_numbers = #tpu.dot_dimension_numbers<[1], [0], [0], [1], [0, 0, 1, 1], [], []>} : vector<4x256xf32>, vector<256x256xf32>, vector<4x256xf32> -> vector<4x256xf32>
    %280 = arith.addf %278, %279 : vector<4x256xf32>
    %c240 = arith.constant 240 : index
    %c0_114 = arith.constant 0 : index
    %281 = vector.load %arg4[%c240, %c0_114] : memref<400x20xf32, #tpu.memory_space<vmem>>, vector<20x2xf32>
    %cst_115 = arith.constant dense<0.000000e+00> : vector<20x256xf32>
    %282 = tpu.matmul %281, %78, %cst_115 {dimension_numbers = #tpu.dot_dimension_numbers<[1], [0], [0], [1], [0, 0, 1, 1], [], []>} : vector<20x2xf32>, vector<2x256xf32>, vector<20x256xf32> -> vector<20x256xf32>
    %c264 = arith.constant 264 : index
    %c0_116 = arith.constant 0 : index
    %283 = vector.load %arg4[%c264, %c0_116] : memref<400x20xf32, #tpu.memory_space<vmem>>, vector<20x4xf32>
    %cst_117 = arith.constant dense<0.000000e+00> : vector<20x256xf32>
    %284 = tpu.matmul %283, %181, %cst_117 {dimension_numbers = #tpu.dot_dimension_numbers<[1], [0], [0], [1], [0, 0, 1, 1], [], []>} : vector<20x4xf32>, vector<4x256xf32>, vector<20x256xf32> -> vector<20x256xf32>
    %285 = arith.addf %282, %284 : vector<20x256xf32>
    %c288 = arith.constant 288 : index
    %c0_118 = arith.constant 0 : index
    %286 = vector.load %arg4[%c288, %c0_118] : memref<400x20xf32, #tpu.memory_space<vmem>>, vector<20x4xf32>
    %cst_119 = arith.constant dense<0.000000e+00> : vector<20x256xf32>
    %287 = tpu.matmul %286, %280, %cst_119 {dimension_numbers = #tpu.dot_dimension_numbers<[1], [0], [0], [1], [0, 0, 1, 1], [], []>} : vector<20x4xf32>, vector<4x256xf32>, vector<20x256xf32> -> vector<20x256xf32>
    %288 = arith.addf %285, %287 : vector<20x256xf32>
    %c312 = arith.constant 312 : index
    %c0_120 = arith.constant 0 : index
    %289 = vector.load %arg4[%c312, %c0_120] : memref<400x20xf32, #tpu.memory_space<vmem>>, vector<20x1xf32>
    %290 = vector.broadcast %289 : vector<20x1xf32> to vector<20x256xf32>
    %291 = arith.addf %288, %290 : vector<20x256xf32>
    %cst_121 = arith.constant 0.000000e+00 : f32
    %292 = vector.broadcast %cst_121 : f32 to vector<20x256xf32>
    %293 = arith.cmpf ogt, %291, %292 : vector<20x256xf32>
    %cst_122 = arith.constant 0.000000e+00 : f32
    %294 = vector.broadcast %cst_122 : f32 to vector<20x256xf32>
    %295 = arith.minimumf %291, %294 : vector<20x256xf32>
    %296 = math.exp %295 : vector<20x256xf32>
    %cst_123 = arith.constant 1.000000e+00 : f32
    %297 = vector.broadcast %cst_123 : f32 to vector<20x256xf32>
    %298 = arith.subf %296, %297 : vector<20x256xf32>
    %299 = arith.select %293, %291, %298 : vector<20x256xi1>, vector<20x256xf32>
    %c336 = arith.constant 336 : index
    %c0_124 = arith.constant 0 : index
    %300 = vector.load %arg4[%c336, %c0_124] : memref<400x20xf32, #tpu.memory_space<vmem>>, vector<20x20xf32>
    %cst_125 = arith.constant dense<0.000000e+00> : vector<20x256xf32>
    %301 = tpu.matmul %300, %299, %cst_125 {dimension_numbers = #tpu.dot_dimension_numbers<[1], [0], [0], [1], [0, 0, 1, 1], [], []>} : vector<20x20xf32>, vector<20x256xf32>, vector<20x256xf32> -> vector<20x256xf32>
    %c360 = arith.constant 360 : index
    %c0_126 = arith.constant 0 : index
    %302 = vector.load %arg4[%c360, %c0_126] : memref<400x20xf32, #tpu.memory_space<vmem>>, vector<20x1xf32>
    %303 = vector.broadcast %302 : vector<20x1xf32> to vector<20x256xf32>
    %304 = arith.addf %301, %303 : vector<20x256xf32>
    %cst_127 = arith.constant 0.000000e+00 : f32
    %305 = vector.broadcast %cst_127 : f32 to vector<20x256xf32>
    %306 = arith.cmpf ogt, %304, %305 : vector<20x256xf32>
    %cst_128 = arith.constant 0.000000e+00 : f32
    %307 = vector.broadcast %cst_128 : f32 to vector<20x256xf32>
    %308 = arith.minimumf %304, %307 : vector<20x256xf32>
    %309 = math.exp %308 : vector<20x256xf32>
    %cst_129 = arith.constant 1.000000e+00 : f32
    %310 = vector.broadcast %cst_129 : f32 to vector<20x256xf32>
    %311 = arith.subf %309, %310 : vector<20x256xf32>
    %312 = arith.select %306, %304, %311 : vector<20x256xi1>, vector<20x256xf32>
    %c384 = arith.constant 384 : index
    %c0_130 = arith.constant 0 : index
    %313 = vector.load %arg4[%c384, %c0_130] : memref<400x20xf32, #tpu.memory_space<vmem>>, vector<1x20xf32>
    %cst_131 = arith.constant dense<0.000000e+00> : vector<1x256xf32>
    %314 = tpu.matmul %313, %312, %cst_131 {dimension_numbers = #tpu.dot_dimension_numbers<[1], [0], [0], [1], [0, 0, 1, 1], [], []>} : vector<1x20xf32>, vector<20x256xf32>, vector<1x256xf32> -> vector<1x256xf32>
    %c392 = arith.constant 392 : index
    %c0_132 = arith.constant 0 : index
    %315 = vector.load %arg4[%c392, %c0_132] : memref<400x20xf32, #tpu.memory_space<vmem>>, vector<1x1xf32>
    %316 = vector.broadcast %315 : vector<1x1xf32> to vector<1x256xf32>
    %317 = arith.addf %314, %316 : vector<1x256xf32>
    %318 = arith.mulf %317, %59 : vector<1x256xf32>
    %c0_133 = arith.constant 0 : index
    %c0_134 = arith.constant 0 : index
    %c0_135 = arith.constant 0 : index
    %319 = vector.load %arg5[%c0_133, %c0_134, %c0_135] : memref<1x1x256xf32, #tpu.memory_space<vmem>>, vector<1x1x256xf32>
    %320 = vector.shape_cast %319 : vector<1x1x256xf32> to vector<1x256xf32>
    %321 = vector.shape_cast %318 : vector<1x256xf32> to vector<1x1x256xf32>
    tpu.vector_store %arg5[%c0_133, %c0_134, %c0_135], %321 {strides = array<i32>} : memref<1x1x256xf32, #tpu.memory_space<vmem>>, vector<1x1x256xf32>,
    return
  }
  func.func @transform_0(%arg0: i32) -> (i32, i32, i32) {
    %c0_i32 = arith.constant 0 : i32
    %c0_i32_0 = arith.constant 0 : i32
    %c0_i32_1 = arith.constant 0 : i32
    return %arg0, %c0_i32, %c0_i32_0 : i32, i32, i32
  }
  func.func @transform_1(%arg0: i32) -> (i32, i32, i32) {
    %c0_i32 = arith.constant 0 : i32
    %c0_i32_0 = arith.constant 0 : i32
    %c0_i32_1 = arith.constant 0 : i32
    return %arg0, %c0_i32, %c0_i32_0 : i32, i32, i32
  }
  func.func @transform_2(%arg0: i32) -> (i32, i32, i32) {
    %c0_i32 = arith.constant 0 : i32
    %c0_i32_0 = arith.constant 0 : i32
    %c0_i32_1 = arith.constant 0 : i32
    return %arg0, %c0_i32, %c0_i32_0 : i32, i32, i32
  }
  func.func @transform_3(%arg0: i32) -> (i32, i32) {
    %c0_i32 = arith.constant 0 : i32
    %c0_i32_0 = arith.constant 0 : i32
    %c0_i32_1 = arith.constant 0 : i32
    return %c0_i32, %c0_i32_0 : i32, i32
  }
  func.func @transform_4(%arg0: i32) -> (i32, i32, i32) {
    %c0_i32 = arith.constant 0 : i32
    %c0_i32_0 = arith.constant 0 : i32
    %c0_i32_1 = arith.constant 0 : i32
    return %arg0, %c0_i32, %c0_i32_0 : i32, i32, i32
  }
}

</mosaic_0001>

<bundles_post_ra>
// kernel: forward.1
= control target key start
LH: loop header
LB: loop body
LE: loop exit
PB: predicated region body
PF: predicated region fallthrough
CT: control target
= control target key end

     0   :  { %s6803_s15 = smov 0   ;;  %s8779_s0 = inlined_call_operand.vmem [shape: f32[2,1,256], index: 0, kind: input, shape index: {}]   ;;  %s8780_s1 = inlined_call_operand.vmem [shape: f32[2,4,16], index: 1, kind: input, shape index: {}]   ;;  %s8781_s2 = inlined_call_operand.vmem [shape: f32[2,1,16], index: 2, kind: input, shape index: {}]   ;;  %s8782_s3 = inlined_call_operand.vmem [shape: f32[400,20], index: 3, kind: input, shape index: {}]   ;;  %s8783_s4 = inlined_call_operand.vmem [shape: f32[2,1,256], index: 4, kind: output, shape index: {}]  }
   0x1 LB: > { %s5546_s16 = sadd.s32 4294967295, %s6770_s15   ;;  %p5550_p0 = scmp.ge.s32.totalorder %s6770_s15, 1  ;;  %s6770_s15 = sphi %s6803_s15, %s14_s15  }
   0x2   : > { %p178_p1 = scmp.lt.s32.totalorder %s6770_s15, 3 }
   0x4   : > { %p179_p2 = pnand %p5550_p0, %p178_p1 }
   0x6   : > { %182 = sbr.rel (%p179_p2) target bundleno = 6338 (0x18c2), region = 36 }
   0xd   : > { %v8789_v0 = vlaneseq  ;;  %v8794_v1 = vmov 0.0   ;;  %v8961_v25 = vmov 0  ;;  %v8791_v27 = vmov 1.0|1.0   ;;  %p209_p3 = scmp.lt.s32.totalorder %s5546_s16, 1 }
   0xe   : > { %520 = vmatprep.mubr.f32.mxu0 %v8794_v1  ;;  %v8965_v29 = vmov 0  ;;  %v8968_v33 = vmov 0  ;;  %v8971_v38 = vmov 0  ;;  %v8974_v44 = vmov 0 }
   0xf   : > { %v6813_v2 = vshrl.u32 %v8789_v0, 7  ;;  %v228_v3 = vand.u32 127, %v8789_v0  ;;  %v8977_v49 = vmov 0  ;;  %v8981_v53 = vmov 0  ;;  %s9418_s16 = smov (!%p209_p3, %s5546_s16), 1 }
  0x10   : > { %v8985_v58 = vmov 0  ;;  %v8990_v62 = vmov 0  ;;  %v9009_v17 = vmov 0  ;;  %v9021_v0 = vmov 0  ;;  %s219_s7 = scalar_lea.vmem %s8781_s2, %s9418_s16  ;;  %s5551_s8 = sshll.u32 %s9418_s16, 1 }
  0x11   : > { %8947 = vst [vmem:[#allocation2_spill] sm:$0xff] %v6813_v2  ;;  %v226_v4 = vadd.s32 8, %v6813_v2  ;;  %v6817_v5 = vadd.s32 128, %v228_v3  ;;  %v230_v6 = vmul.u32 16, %v6813_v2  ;;  %v236_v7 = vadd.s32 1, %v6813_v2  ;;  %s212_s11 = scalar_lea.vmem %s8779_s0, %s5551_s8  ;;  %s5552_s12 = sshll.u32 %s9418_s16, 2 }
  0x12   : > { %v319_v8 = vadd.s32 1, %v228_v3  ;;  %v6822_v9 = vcvt.s32.f32 %v6813_v2  ;;  %v6829_v14 = vmul.u32 16, %v228_v3  ;;  %v6869_v24 = vadd.s32 16, %v6813_v2  ;;  %s216_s17 = scalar_lea.vmem %s8780_s1, %s5552_s12 }
  0x13   : > { %v231_v10 = vmul.u32 16, %v226_v4  ;;  %vm6825_vm0 = vcmp.ge.s32.totalorder %v6817_v5, %v230_v6  ;;  %v237_v12 = vadd.s32 1, %v226_v4  ;;  %v238_v13 = vmul.u32 16, %v236_v7 }
  0x14   : > { %vm6831_vm1 = vcmp.ge.s32.totalorder %v228_v3, %v230_v6  ;;  %v6835_v16 = vcvt.s32.f32 %v226_v4  ;;  %v6843_v19 = vmul.u32 16, %v319_v8  ;;  %vm287_vm12 = vcmp.ge.s32.totalorder %v6813_v2, %v6829_v14 }
  0x15   : > { %vm6838_vm2 = vcmp.ge.s32.totalorder %v6817_v5, %v231_v10  ;;  %v239_v18 = vmul.u32 16, %v237_v12  ;;  %vm241_vm3 = vcmp.lt.s32.totalorder %v6817_v5, %v238_v13  ;;  %vm6847_vm5 = vcmp.lt.s32.totalorder %v228_v3, %v238_v13 }
  0x16   : > { %8952 = vst [vmem:[#allocation3_spill] sm:$0xff] %v6835_v16  ;;  %vm245_vm4 = vmand %vm6825_vm0, %vm241_vm3  ;;  %v6360_v21 = vpack.c.bf16 %v6835_v16, %v6822_v9  ;;  %vm6854_vm7 = vcmp.ge.s32.totalorder %v228_v3, %v231_v10  ;;  %vm321_vm13 = vcmp.lt.s32.totalorder %v6813_v2, %v6843_v19  ;;  %v6880_v26 = vadd.s32 24, %v6813_v2 }
  0x17   : > { %vm243_vm6 = vcmp.lt.s32.totalorder %v6817_v5, %v239_v18  ;;  %vm6858_vm8 = vcmp.lt.s32.totalorder %v228_v3, %v239_v18  ;;  %vm244_vm9 = vmand %vm6831_vm1, %vm6847_vm5  ;;  %vm288_vm15 = vcmp.ge.s32.totalorder %v226_v4, %v6829_v14  ;;  %vm322_vm0 = vcmp.lt.s32.totalorder %v226_v4, %v6843_v19 }
  0x18   : > { %vm247_vm10 = vmand %vm6838_vm2, %vm243_vm6  ;;  %6678 = vmatprep.subr.bf16.mxu1 %v6360_v21  ;;  %v6891_v28 = vcvt.s32.f32 %v228_v3  ;;  %v6903_v30 = vadd.s32 32, %v6813_v2  ;;  %vm8784_vm3 = vcmask 130048   ;;  %vm323_vm5 = vcmp.lt.s32.totalorder %v6869_v24, %v6843_v19 }
  0x19   : > { %vm6871_vm11 = vmpackc.low %vm247_vm10, %vm245_vm4  ;;  %6679 = vmatpush3.bf16.msra.mxu1 %v6360_v21  ;;  %vm289_vm4 = vcmp.ge.s32.totalorder %v6869_v24, %v6829_v14  ;;  %v6919_v31 = vadd.s32 40, %v6813_v2  ;;  %v6933_v34 = vadd.s32 48, %v6813_v2  ;;  %v6942_v35 = vadd.s32 56, %v6813_v2 }
  0x1a   : > { %v8962_v25 = vsel %vm6871_vm11, 4294967295, %v8961_v25  ;;  %6357 = vmatprep.subr.msk.bf16.mxu0 %vm6871_vm11, %v8791_v27  ;;  %vm246_vm14 = vmand %vm6854_vm7, %vm6858_vm8  ;;  %8964 = vst [vmem:[#allocation5_spill] sm:$0xff] %v6891_v28  ;;  %6369 = vmatprep.subr.msk.bf16.mxu1 %vm6871_vm11, %v8791_v27  ;;  %vm290_vm7 = vcmp.ge.s32.totalorder %v6880_v26, %v6829_v14  ;;  %vm324_vm8 = vcmp.lt.s32.totalorder %v6880_v26, %v6843_v19  ;;  %v6966_v40 = vadd.s32 64, %v6813_v2 }
  0x1b   : > { %8963 = vst [vmem:[#allocation4_spill] sm:$0xff] %v8962_v25  ;;  %vm6898_vm2 = vmpackc.low %vm246_vm14, %vm244_vm9  ;;  %v6978_v41 = vadd.s32 72, %v6813_v2  ;;  %v7002_v45 = vadd.s32 80, %v6813_v2  ;;  %v7010_v46 = vadd.s32 88, %v6813_v2  ;;  %v7031_v50 = vadd.s32 96, %v6813_v2 }
  0x1c   : > { %v8966_v29 = vsel %vm6898_vm2, 4294967295, %v8965_v29  ;;  %6359 = vmatpush1.bf16.msk.msra.mxu0 %vm6898_vm2, %v8791_v27  ;;  %vm353_vm1 = vmand %vm287_vm12, %vm321_vm13  ;;  %vm291_vm12 = vcmp.ge.s32.totalorder %v6903_v30, %v6829_v14  ;;  %vm325_vm13 = vcmp.lt.s32.totalorder %v6903_v30, %v6843_v19  ;;  %v7038_v51 = vadd.s32 104, %v6813_v2 }
  0x1d   : > { %8967 = vst [vmem:[#allocation6_spill] sm:$0xff] %v8966_v29  ;;  %6361 = vmatprep.subr.bf16.mxu0 %v6360_v21  ;;  %vm354_vm6 = vmand %vm288_vm15, %vm322_vm0  ;;  %v6922_v32 = vsel %vm353_vm1, 1.0, %v8794_v1  ;;  %vm292_vm15 = vcmp.ge.s32.totalorder %v6919_v31, %v6829_v14  ;;  %vm326_vm0 = vcmp.lt.s32.totalorder %v6919_v31, %v6843_v19  ;;  %v7054_v54 = vadd.s32 112, %v6813_v2 }
  0x1e   : > { %vm6928_vm9 = vmpackc.low %vm354_vm6, %vm353_vm1  ;;  %v6947_v36 = vsel %vm354_vm6, 1.0, %v8794_v1  ;;  %vm327_vm6 = vcmp.lt.s32.totalorder %v6933_v34, %v6843_v19  ;;  %v7066_v56 = vadd.s32 120, %v6813_v2  ;;  %v7086_v59 = vadd.s32 128, %v6813_v2 }
  0x1f   : > { %v8969_v33 = vsel %vm6928_vm9, 4294967295, %v8968_v33  ;;  %5594 = vmatmul.mubr.msk.f32.vlgmr.msra.gmra.mrb[0].mxu0 %vm8784_vm3, %v6891_v28  ;;  %vm355_vm10 = vmand %vm289_vm4, %vm323_vm5  ;;  %vm293_vm5 = vcmp.ge.s32.totalorder %v6933_v34, %v6829_v14  ;;  %v7105_v63 = vadd.s32 136, %v6813_v2  ;;  %v7118_v4 = vadd.s32 144, %v6813_v2 }
  0x20   : > { %8970 = vst [vmem:[#allocation7_spill] sm:$0xff] %v8969_v33  ;;  %6363 = vmatpush3.bf16.msra.mxu0 %v6360_v21  ;;  %6206 = vmatprep.mubr.msk.f32.mxu0 %vm8784_vm3, %v6922_v32  ;;  %vm356_vm14 = vmand %vm290_vm7, %vm324_vm8  ;;  %v6950_v37 = vsel %vm355_vm10, 1.0, %v8794_v1  ;;  %vm294_vm8 = vcmp.ge.s32.totalorder %v6942_v35, %v6829_v14  ;;  %v8998_v7 = vmov 0  ;;  %v9002_v10 = vmov 0 }
  0x21   : > { %6209 = vmatprep.mubr.msk.f32.mxu1 %vm8784_vm3, %v6950_v37  ;;  %vm6958_vm1 = vmpackc.low %vm356_vm14, %vm355_vm10  ;;  %v6963_v39 = vsel %vm356_vm14, 1.0, %v8794_v1  ;;  %vm328_vm10 = vcmp.lt.s32.totalorder %v6942_v35, %v6843_v19  ;;  %vm295_vm14 = vcmp.ge.s32.totalorder %v6966_v40, %v6829_v14  ;;  %v7143_v11 = vadd.s32 152, %v6813_v2 }
  0x22   : > { %v8972_v38 = vsel %vm6958_vm1, 4294967295, %v8971_v38  ;;  %6210 = vmatmul.mubr.msk.f32.vlgmr.msra.gmra.mrb[0].mxu1 %vm8784_vm3, %v6963_v39  ;;  %vm357_vm4 = vmand %vm291_vm12, %vm325_vm13  ;;  %v7152_v12 = vadd.s32 160, %v6813_v2  ;;  %v9012_v18 = vmov 0  ;;  %v7179_v20 = vadd.s32 168, %v6813_v2 }
  0x23   : > { %8973 = vst [vmem:[#allocation8_spill] sm:$0xff] %v8972_v38  ;;  %6207 = vmatmul.mubr.msk.f32.vlgmr.msra.gmra.mrb[2].mxu0 %vm8784_vm3, %v6947_v36  ;;  %v6983_v42 = vsel %vm357_vm4, 1.0, %v8794_v1  ;;  %vm358_vm7 = vmand %vm292_vm15, %vm326_vm0  ;;  %6371 = vmatpush1.bf16.msk.msra.mxu1 %vm6898_vm2, %v8791_v27  ;;  %vm329_vm15 = vcmp.lt.s32.totalorder %v6966_v40, %v6843_v19  ;;  %v7188_v21 = vadd.s32 176, %v6813_v2  ;;  %v9018_v3 = vmov 0 }
  0x24   : > { %6212 = vmatprep.mubr.msk.f32.mxu1 %vm8784_vm3, %v6983_v42  ;;  %v6995_v43 = vsel %vm358_vm7, 1.0, %v8794_v1  ;;  %vm6997_vm12 = vmpackc.low %vm358_vm7, %vm357_vm4  ;;  %1287 = vmatprep.mubr.f32.mxu0 %v8794_v1  ;;  %vm296_vm4 = vcmp.ge.s32.totalorder %v6978_v41, %v6829_v14  ;;  %v7215_v27 = vadd.s32 184, %v6813_v2  ;;  %v9042_v33 = vmov 0 }
  0x25   : > { %v8975_v44 = vsel %vm6997_vm12, 4294967295, %v8974_v44  ;;  %vm359_vm13 = vmand %vm293_vm5, %vm327_vm6  ;;  %vm330_vm5 = vcmp.lt.s32.totalorder %v6978_v41, %v6843_v19  ;;  %vm301_vm12 = vcmp.ge.s32.totalorder %v7054_v54, %v6829_v14 }
  0x26   : > { %8976 = vst [vmem:[#allocation9_spill] sm:$0xff] %v8975_v44  ;;  %6213 = vmatmul.mubr.msk.f32.gmra.mrb[2].mxu1 %vm8784_vm3, %v6995_v43  ;;  %v7015_v47 = vsel %vm359_vm13, 1.0, %v8794_v1  ;;  %vm360_vm0 = vmand %vm294_vm8, %vm328_vm10  ;;  %vm297_vm8 = vcmp.ge.s32.totalorder %v7002_v45, %v6829_v14  ;;  %vm331_vm10 = vcmp.lt.s32.totalorder %v7002_v45, %v6843_v19  ;;  %vm344_vm1 = vcmp.lt.s32.totalorder %v7215_v27, %v6843_v19 }
  0x27   : > { %6215 = vmatprep.mubr.msk.f32.mxu1 %vm8784_vm3, %v7015_v47  ;;  %v7024_v48 = vsel %vm360_vm0, 1.0, %v8794_v1  ;;  %vm7026_vm6 = vmpackc.low %vm360_vm0, %vm359_vm13  ;;  %vm298_vm0 = vcmp.ge.s32.totalorder %v7010_v46, %v6829_v14  ;;  %vm332_vm3 = vcmp.lt.s32.totalorder %v7010_v46, %v6843_v19  ;;  %v7251_v44 = vadd.s32 200, %v6813_v2 }
  0x28   : > { %v8978_v49 = vsel %vm7026_vm6, 4294967295, %v8977_v49  ;;  %vm361_vm7 = vmand %vm295_vm14, %vm329_vm15  ;;  %vm8980_vm14 = vcmask 130048  }
  0x29   : > { %8979 = vst [vmem:[#allocation10_spill] sm:$0xff] %v8978_v49  ;;  %v7041_v52 = vsel %vm361_vm7, 1.0, %v8794_v1  ;;  %vm362_vm13 = vmand %vm296_vm4, %vm330_vm5  ;;  %vm299_vm5 = vcmp.ge.s32.totalorder %v7031_v50, %v6829_v14  ;;  %v9032_v49 = vmov 0 }
  0x2a   : > { %6216 = vmatmul.mubr.msk.f32.gmra.mrb[4].mxu1 %vm8980_vm14, %v7024_v48  ;;  %vm7049_vm15 = vmpackc.low %vm362_vm13, %vm361_vm7  ;;  %v7059_v55 = vsel %vm362_vm13, 1.0, %v8794_v1  ;;  %vm334_vm13 = vcmp.lt.s32.totalorder %v7038_v51, %v6843_v19 }
  0x2b   : > { %v8982_v53 = vsel %vm7049_vm15, 4294967295, %v8981_v53  ;;  %vm8984_vm6 = vmmov %vm8980_vm14  ;;  %vm333_vm14 = vcmp.lt.s32.totalorder %v7031_v50, %v6843_v19 }
  0x2c   : > { %8983 = vst [vmem:[#allocation11_spill] sm:$0xff] %v8982_v53  ;;  %6218 = vmatprep.mubr.msk.f32.mxu1 %vm8984_vm6, %v7041_v52  ;;  %vm363_vm4 = vmand %vm297_vm8, %vm331_vm10  ;;  %vm300_vm6 = vcmp.ge.s32.totalorder %v7038_v51, %v6829_v14  ;;  %vm8988_vm10 = vcmask 130048   ;;  %v9029_v53 = vmov 0 }
  0x2d   : > { %v7069_v57 = vsel %vm363_vm4, 1.0, %v8794_v1  ;;  %vm364_vm7 = vmand %vm298_vm0, %vm332_vm3  ;;  %vm335_vm3 = vcmp.lt.s32.totalorder %v7054_v54, %v6843_v19 }
  0x2e   : > { %vm7075_vm8 = vmpackc.low %vm364_vm7, %vm363_vm4  ;;  %6219 = vmatmul.mubr.msk.f32.gmra.mrb[6].mxu1 %vm8988_vm10, %v7059_v55  ;;  %v7091_v60 = vsel %vm364_vm7, 1.0, %v8794_v1 }
  0x2f   : > { %v8986_v58 = vsel %vm7075_vm8, 4294967295, %v8985_v58  ;;  %vm365_vm15 = vmand %vm299_vm5, %vm333_vm14  ;;  %vm336_vm5 = vcmp.lt.s32.totalorder %v7066_v56, %v6843_v19 }
  0x30   : > { %8987 = vst [vmem:[#allocation12_spill] sm:$0xff] %v8986_v58  ;;  %vm8989_vm0 = vmmov %vm8988_vm10  ;;  %vm302_vm10 = vcmp.ge.s32.totalorder %v7066_v56, %v6829_v14  ;;  %v7098_v61 = vsel %vm365_vm15, 1.0, %v8794_v1 }
  0x31   : > { %6221 = vmatprep.mubr.msk.f32.mxu1 %vm8989_vm0, %v7069_v57  ;;  %vm366_vm4 = vmand %vm300_vm6, %vm334_vm13  ;;  %vm303_vm13 = vcmp.ge.s32.totalorder %v7086_v59, %v6829_v14 }
  0x32   : > { %vm7100_vm14 = vmpackc.low %vm366_vm4, %vm365_vm15  ;;  %vm337_vm15 = vcmp.lt.s32.totalorder %v7086_v59, %v6843_v19  ;;  %v7123_v6 = vsel %vm366_vm4, 1.0, %v8794_v1  ;;  %vm338_vm4 = vcmp.lt.s32.totalorder %v7105_v63, %v6843_v19 }
  0x33   : > { %v8991_v62 = vsel %vm7100_vm14, 4294967295, %v8990_v62  ;;  %vm367_vm8 = vmand %vm301_vm12, %vm335_vm3  ;;  %8997 = vst [vmem:[#allocation14_spill] sm:$0xff] %v7123_v6  ;;  %vm9024_vm14 = vcmask 130048  }
  0x34   : > { %8992 = vst [vmem:[#allocation13_spill] sm:$0xff] %v8991_v62  ;;  %vm8993_vm7 = vmmov %vm8989_vm0  ;;  %v7132_v8 = vsel %vm367_vm8, 1.0, %v8794_v1 }
  0x35   : > { %6222 = vmatmul.mubr.msk.f32.gmra.mrb[8].mxu1 %vm8993_vm7, %v7091_v60  ;;  %vm7109_vm6 = vmand %vm302_vm10, %vm336_vm5  ;;  %9001 = vst [vmem:[#allocation16_spill] sm:$0xff] %v7132_v8  ;;  %vm304_vm10 = vcmp.ge.s32.totalorder %v7105_v63, %v6829_v14 }
  0x36   : > { %vm8996_vm12 = vmmov %vm8989_vm0  ;;  %v7159_v13 = vsel %vm7109_vm6, 1.0, %v8794_v1 }
  0x37   : > { %6224 = vmatprep.mubr.msk.f32.mxu1 %vm8996_vm12, %v7098_v61  ;;  %vm7127_vm3 = vmpackc.low %vm7109_vm6, %vm367_vm8  ;;  %vm305_vm8 = vcmp.ge.s32.totalorder %v7118_v4, %v6829_v14  ;;  %9007 = vst [vmem:[#allocation18_spill] sm:$0xff] %v7159_v13  ;;  %vm340_vm6 = vcmp.lt.s32.totalorder %v7143_v11, %v6843_v19 }
  0x38   : > { %v8999_v7 = vsel %vm7127_vm3, 4294967295, %v8998_v7  ;;  %vm7134_vm0 = vmand %vm303_vm13, %vm337_vm15  ;;  %vm342_vm3 = vcmp.lt.s32.totalorder %v7179_v20, %v6843_v19 }
  0x39   : > { %9000 = vst [vmem:[#allocation15_spill] sm:$0xff] %v8999_v7  ;;  %v9003_v10 = vsel %vm7134_vm0, 4294967295, %v9002_v10  ;;  %vm9005_vm5 = vmmov %vm8993_vm7  ;;  %vm339_vm7 = vcmp.lt.s32.totalorder %v7118_v4, %v6843_v19  ;;  %v7164_v15 = vsel %vm7134_vm0, 1.0, %v8794_v1  ;;  %v9026_v7 = vmov 0.0  }
  0x3a   : > { %9004 = vst [vmem:[#allocation17_spill] sm:$0xff] %v9003_v10  ;;  %6225 = vmatmul.mubr.msk.f32.gmra.mrb[10].mxu1 %vm9005_vm5, %v7123_v6  ;;  %vm9006_vm13 = vmmov %vm9005_vm5  ;;  %vm306_vm5 = vcmp.ge.s32.totalorder %v7143_v11, %v6829_v14  ;;  %v853_v6 = vcvt.s32.f32 %v6869_v24 }
  0x3b   : > { %6227 = vmatprep.mubr.msk.f32.mxu1 %vm9006_vm13, %v7132_v8  ;;  %9008 = vst [vmem:[#allocation19_spill] sm:$0xff] %v7164_v15  ;;  %vm7166_vm15 = vmand %vm304_vm10, %vm338_vm4  ;;  %vm307_vm10 = vcmp.ge.s32.totalorder %v7152_v12, %v6829_v14  ;;  %vm341_vm4 = vcmp.lt.s32.totalorder %v7152_v12, %v6843_v19 }
  0x3c   : > { %v9010_v17 = vsel %vm7166_vm15, 4294967295, %v9009_v17  ;;  %vm7170_vm12 = vmand %vm305_vm8, %vm339_vm7  ;;  %v7195_v22 = vsel %vm7166_vm15, 1.0, %v8794_v1 }
  0x3d   : > { %9011 = vst [vmem:[#allocation20_spill] sm:$0xff] %v9010_v17  ;;  %v9013_v18 = vsel %vm7170_vm12, 4294967295, %v9012_v18  ;;  %vm9015_vm8 = vmmov %vm9006_vm13  ;;  %v7200_v23 = vsel %vm7170_vm12, 1.0, %v8794_v1  ;;  %v7224_v1 = vadd.s32 192, %v6813_v2 }
  0x3e   : > { %9014 = vst [vmem:[#allocation21_spill] sm:$0xff] %v9013_v18  ;;  %6228 = vmatmul.mubr.msk.f32.gmra.mrb[12].mxu1 %vm9006_vm13, %v7159_v13  ;;  %9016 = vst [vmem:[#allocation22_spill] sm:$0xff] %v7195_v22  ;;  %v9039_v18 = vmov 0 }
  0x3f   : > { %6230 = vmatprep.mubr.msk.f32.mxu1 %vm9015_vm8, %v7164_v15  ;;  %9017 = vst [vmem:[#allocation23_spill] sm:$0xff] %v7200_v23  ;;  %vm7202_vm7 = vmand %vm306_vm5, %vm340_vm6  ;;  %vm308_vm8 = vcmp.ge.s32.totalorder %v7179_v20, %v6829_v14  ;;  %vm309_vm5 = vcmp.ge.s32.totalorder %v7188_v21, %v6829_v14  ;;  %vm343_vm6 = vcmp.lt.s32.totalorder %v7188_v21, %v6843_v19 }
  0x40   : > { %v9019_v3 = vsel %vm7202_vm7, 4294967295, %v9018_v3  ;;  %vm7206_vm13 = vmand %vm307_vm10, %vm341_vm4  ;;  %v7231_v62 = vsel %vm7202_vm7, 1.0, %v9026_v7  ;;  %vm9076_vm7 = vcmask 130048  }
  0x41   : > { %9020 = vst [vmem:[#allocation24_spill] sm:$0xff] %v9019_v3  ;;  %v9022_v0 = vsel %vm7206_vm13, 4294967295, %v9021_v0  ;;  %vm9025_vm10 = vmmov %vm9024_vm14  ;;  %v7236_v58 = vsel %vm7206_vm13, 1.0, %v9026_v7  ;;  %vm9035_vm13 = vcmask 130048  }
  0x42   : > { %9023 = vst [vmem:[#allocation25_spill] sm:$0xff] %v9022_v0  ;;  %6231 = vmatmul.mubr.msk.f32.gmra.mrb[14].mxu1 %vm9024_vm14, %v7195_v22  ;;  %9027 = vst [vmem:[#allocation26_spill] sm:$0xff] %v7231_v62  ;;  %v7260_v0 = vadd.s32 208, %v6813_v2  ;;  %v9073_v22 = vmov 0 }
  0x43   : > { %6233 = vmatprep.mubr.msk.f32.mxu1 %vm9025_vm10, %v7200_v23  ;;  %9028 = vst [vmem:[#allocation27_spill] sm:$0xff] %v7236_v58  ;;  %vm7238_vm14 = vmand %vm308_vm8, %vm342_vm3  ;;  %vm310_vm10 = vcmp.ge.s32.totalorder %v7215_v27, %v6829_v14  ;;  %vm311_vm3 = vcmp.ge.s32.totalorder %v7224_v1, %v6829_v14  ;;  %vm345_vm8 = vcmp.lt.s32.totalorder %v7224_v1, %v6843_v19  ;;  %v9062_v23 = vmov 0 }
  0x44   : > { %v9030_v53 = vsel %vm7238_vm14, 4294967295, %v9029_v53  ;;  %vm7242_vm4 = vmand %vm309_vm5, %vm343_vm6  ;;  %v7267_v38 = vsel %vm7238_vm14, 1.0, %v9026_v7  ;;  %vm346_vm14 = vcmp.lt.s32.totalorder %v7251_v44, %v6843_v19 }
  0x45   : > { %9031 = vst [vmem:[#allocation28_spill] sm:$0xff] %v9030_v53  ;;  %v9033_v49 = vsel %vm7242_vm4, 4294967295, %v9032_v49  ;;  %vm9036_vm5 = vmmov %vm9035_vm13  ;;  %v7272_v3 = vsel %vm7242_vm4, 1.0, %v9026_v7  ;;  %v7287_v53 = vadd.s32 216, %v6813_v2  ;;  %vm9045_vm4 = vcmask 130048  }
  0x46   : > { %9034 = vst [vmem:[#allocation29_spill] sm:$0xff] %v9033_v49  ;;  %6234 = vmatmul.mubr.msk.f32.gmra.mrb[16].mxu1 %vm9035_vm13, %v7231_v62  ;;  %9037 = vst [vmem:[#allocation30_spill] sm:$0xff] %v7267_v38  ;;  %v7296_v49 = vadd.s32 224, %v6813_v2  ;;  %v9059_v62 = vmov 0 }
  0x47   : > { %6236 = vmatprep.mubr.msk.f32.mxu1 %vm9036_vm5, %v7236_v58  ;;  %9038 = vst [vmem:[#allocation31_spill] sm:$0xff] %v7272_v3  ;;  %vm7274_vm13 = vmand %vm310_vm10, %vm344_vm1  ;;  %vm312_vm5 = vcmp.ge.s32.totalorder %v7251_v44, %v6829_v14  ;;  %vm313_vm1 = vcmp.ge.s32.totalorder %v7260_v0, %v6829_v14  ;;  %vm347_vm10 = vcmp.lt.s32.totalorder %v7260_v0, %v6843_v19  ;;  %v9052_v58 = vmov 0 }
  0x48   : > { %v9040_v18 = vsel %vm7274_vm13, 4294967295, %v9039_v18  ;;  %vm7278_vm6 = vmand %vm311_vm3, %vm345_vm8  ;;  %v7303_v17 = vsel %vm7274_vm13, 1.0, %v9026_v7  ;;  %vm348_vm13 = vcmp.lt.s32.totalorder %v7287_v53, %v6843_v19 }
  0x49   : > { %9041 = vst [vmem:[#allocation32_spill] sm:$0xff] %v9040_v18  ;;  %v9043_v33 = vsel %vm7278_vm6, 4294967295, %v9042_v33  ;;  %vm9046_vm3 = vmmov %vm9045_vm4  ;;  %v7308_v10 = vsel %vm7278_vm6, 1.0, %v9026_v7  ;;  %v7323_v18 = vadd.s32 232, %v6813_v2  ;;  %vm9055_vm6 = vcmask 130048  }
  0x4a   : > { %9044 = vst [vmem:[#allocation33_spill] sm:$0xff] %v9043_v33  ;;  %6237 = vmatmul.mubr.msk.f32.gmra.mrb[18].mxu1 %vm9045_vm4, %v7267_v38  ;;  %9047 = vst [vmem:[#allocation34_spill] sm:$0xff] %v7303_v17  ;;  %v9049_v38 = vmov 0  ;;  %v7332_v33 = vadd.s32 240, %v6813_v2 }
  0x4b   : > { %6239 = vmatprep.mubr.msk.f32.mxu1 %vm9046_vm3, %v7272_v3  ;;  %9048 = vst [vmem:[#allocation35_spill] sm:$0xff] %v7308_v10  ;;  %vm7310_vm4 = vmand %vm312_vm5, %vm346_vm14  ;;  %vm314_vm3 = vcmp.ge.s32.totalorder %v7287_v53, %v6829_v14  ;;  %vm315_vm14 = vcmp.ge.s32.totalorder %v7296_v49, %v6829_v14  ;;  %vm349_vm5 = vcmp.lt.s32.totalorder %v7296_v49, %v6843_v19 }
  0x4c   : > { %v9050_v38 = vsel %vm7310_vm4, 4294967295, %v9049_v38  ;;  %vm7314_vm8 = vmand %vm313_vm1, %vm347_vm10  ;;  %v7339_v3 = vsel %vm7310_vm4, 1.0, %v9026_v7  ;;  %vm350_vm4 = vcmp.lt.s32.totalorder %v7323_v18, %v6843_v19 }
  0x4d   : > { %9051 = vst [vmem:[#allocation36_spill] sm:$0xff] %v9050_v38  ;;  %v9053_v58 = vsel %vm7314_vm8, 4294967295, %v9052_v58  ;;  %vm9056_vm1 = vmmov %vm9055_vm6  ;;  %v7359_v38 = vadd.s32 248, %v6813_v2 }
  0x4e   : > { %9054 = vst [vmem:[#allocation37_spill] sm:$0xff] %v9053_v58  ;;  %6240 = vmatmul.mubr.msk.f32.gmra.mrb[20].mxu1 %vm9055_vm6, %v7303_v17  ;;  %9057 = vst [vmem:[#allocation38_spill] sm:$0xff] %v7339_v3  ;;  %v7344_v17 = vsel %vm7314_vm8, 1.0, %v9026_v7  ;;  %vm9066_vm8 = vcmask 130048  }
  0x4f   : > { %6242 = vmatprep.mubr.msk.f32.mxu1 %vm9056_vm1, %v7308_v10  ;;  %9058 = vst [vmem:[#allocation39_spill] sm:$0xff] %v7344_v17  ;;  %vm7346_vm6 = vmand %vm314_vm3, %vm348_vm13  ;;  %vm316_vm1 = vcmp.ge.s32.totalorder %v7323_v18, %v6829_v14  ;;  %vm317_vm13 = vcmp.ge.s32.totalorder %v7332_v33, %v6829_v14  ;;  %vm351_vm3 = vcmp.lt.s32.totalorder %v7332_v33, %v6843_v19 }
  0x50   : > { %v9060_v62 = vsel %vm7346_vm6, 4294967295, %v9059_v62  ;;  %vm7350_vm10 = vmand %vm315_vm14, %vm349_vm5  ;;  %9065 = vst [vmem:[#allocation42_spill] sm:$0xff] %v7359_v38  ;;  %v7372_v58 = vsel %vm7346_vm6, 1.0, %v9026_v7  ;;  %vm352_vm6 = vcmp.lt.s32.totalorder %v7359_v38, %v6843_v19 }
  0x51   : > { %9061 = vst [vmem:[#allocation40_spill] sm:$0xff] %v9060_v62  ;;  %v9063_v23 = vsel %vm7350_vm10, 4294967295, %v9062_v23  ;;  %vm9067_vm14 = vmmov %vm9066_vm8  ;;  %v7377_v10 = vsel %vm7350_vm10, 1.0, %v9026_v7 }
  0x52   : > { %9064 = vst [vmem:[#allocation41_spill] sm:$0xff] %v9063_v23  ;;  %6243 = vmatmul.mubr.msk.f32.gmra.mrb[22].mxu1 %vm9066_vm8, %v7339_v3  ;;  %9068 = vst [vmem:[#allocation43_spill] sm:$0xff] %v7372_v58  ;;  %v9070_v3 = vmov 0 }
  0x53   : > { %6245 = vmatprep.mubr.msk.f32.mxu1 %vm9067_vm14, %v7344_v17  ;;  %9069 = vst [vmem:[#allocation44_spill] sm:$0xff] %v7377_v10  ;;  %vm7379_vm8 = vmand %vm316_vm1, %vm350_vm4  ;;  %vm318_vm14 = vcmp.ge.s32.totalorder %v7359_v38, %v6829_v14  ;;  %v9080_v14 = vmov 0 }
  0x54   : > { %v9071_v3 = vsel %vm7379_vm8, 4294967295, %v9070_v3  ;;  %vm7383_vm5 = vmand %vm317_vm13, %vm351_vm3  ;;  %v7398_v23 = vsel %vm7379_vm8, 1.0, %v9026_v7 }
  0x55   : > { %9072 = vst [vmem:[#allocation45_spill] sm:$0xff] %v9071_v3  ;;  %v9074_v22 = vsel %vm7383_vm5, 4294967295, %v9073_v22  ;;  %vm9077_vm10 = vmmov %vm9076_vm7  ;;  %v7403_v62 = vsel %vm7383_vm5, 1.0, %v9026_v7 }
  0x56   : > { %9075 = vst [vmem:[#allocation46_spill] sm:$0xff] %v9074_v22  ;;  %6246 = vmatmul.mubr.msk.f32.gmra.mrb[24].mxu1 %vm9076_vm7, %v7372_v58  ;;  %9078 = vst [vmem:[#allocation47_spill] sm:$0xff] %v7398_v23  ;;  %v6774_v22 = vmov 0  }
  0x57   : > { %6248 = vmatprep.mubr.msk.f32.mxu1 %vm9077_vm10, %v7377_v10  ;;  %9079 = vst [vmem:[#allocation48_spill] sm:$0xff] %v7403_v62  ;;  %vm7405_vm4 = vmand %vm318_vm14, %vm352_vm6  ;;  %6714 = vset.pattern.permute.xlu0 %v6774_v22  ;;  %vm9098_vm6 = vcmask 130048  }
  0x58   : > { %v9081_v14 = vsel %vm7405_vm4, 4294967295, %v9080_v14  ;;  %vm9083_vm1 = vmmov %vm9076_vm7  ;;  %v7416_v19 = vsel %vm7405_vm4, 1.0, %v9026_v7  ;;  %6715 = vset.pattern.permute.xlu1 %v6774_v22 }
  0x59   : > { %9082 = vst [vmem:[#allocation49_spill] sm:$0xff] %v9081_v14  ;;  %vm9084_vm7 = vmmov %vm9083_vm1 }
  0x5a   : > { %6249 = vmatmul.mubr.msk.f32.gmra.mrb[26].mxu1 %vm9083_vm1, %v7398_v23  ;;  %9085 = vst [vmem:[#allocation50_spill] sm:$0xff] %v7416_v19  ;;  %vm9086_vm10 = vmmov %vm9083_vm1  ;;  %v527_v23 = vcvt.s32.f32 %v6817_v5 }
  0x5b   : > { %6251 = vmatprep.mubr.msk.f32.mxu1 %vm9084_vm7, %v7403_v62  ;;  %v7426_v62 = vsub.s32 0, %v6813_v2 }
  0x5e   : > { %6252 = vmatmul.mubr.msk.f32.gmra.mrb[28].mxu1 %vm9086_vm10, %v7416_v19 }
  0x5f   : > { %1640 = vmatprep.mubr.f32.mxu1 %v9026_v7 }
  0xf2   : > { %v7421_v3 = vpop.f32.mrb[0].mxu0 }
  0xf3   : > { %9087 = vst [vmem:[#allocation51_spill] sm:$0xff] %v7421_v3  ;;  %v528_v10 = vmul.f32 16.0, %v7421_v3  ;;  %v7428_v14 = vpop.f32.mrb[1].mxu0 }
  0xf4   : > { %9088 = vst [vmem:[#allocation52_spill] sm:$0xff] %v7428_v14  ;;  %v529_v58 = vmul.f32 16.0, %v7428_v14 }
  0xf5   : > { %v7432_v19 = vsub.f32 %v6891_v28, %v528_v10  ;;  %v6211_v17 = vpop.f32.mrb[0].mxu1  ;;  %v854_v28 = vcvt.s32.f32 %v6880_v26 }
  0xf6   : > { %v7434_v15 = vsub.f32 %v527_v23, %v529_v58  ;;  %v6208_v22 = vpop.f32.mrb[2].mxu0  ;;  %v704_v13 = vpop.f32.mrb[1].mxu1  ;;  %v886_v24 = vmul.f32 16.0, %v6211_v17  ;;  %v9095_v17 = vmov 0 }
  0xf7   : > { %9089 = vst [vmem:[#allocation53_spill] sm:$0xff] %v7432_v19  ;;  %v7438_v5 = vrot.slane %v7432_v19, %v7426_v62  ;;  %v694_v2 = vpop.f32.mrb[3].mxu0  ;;  %v885_v8 = vmul.f32 16.0, %v704_v13  ;;  %v884_v58 = vmul.f32 16.0, %v6208_v22 }
  0xf8   : > { %9090 = vst [vmem:[#allocation54_spill] sm:$0xff] %v7434_v15  ;;  %v7445_v10 = vrot.slane %v7434_v15, %v7426_v62  ;;  %v883_v23 = vmul.f32 16.0, %v694_v2  ;;  %v9091_v2 = vmov 0  ;;  %v855_v15 = vcvt.s32.f32 %v6903_v30 }
  0xf9   : > { %vm8871_vm3 = vcmp.eq.f32.partialorder %v7438_v5, %v6822_v9  ;;  %v6214_v38 = vpop.f32.mrb[2].mxu1  ;;  %vm8869_vm10 = vcmp.eq.f32.partialorder %v7438_v5, %v6835_v16  ;;  %v917_v26 = vsub.f32 %v853_v6, %v885_v8  ;;  %v916_v22 = vsub.f32 %v6835_v16, %v884_v58 }
  0xfa   : > { %v915_v19 = vsub.f32 %v6822_v9, %v883_v23  ;;  %vm8872_vm14 = vcmp.eq.f32.partialorder %v7445_v10, %v6822_v9  ;;  %vm8870_vm1 = vcmp.eq.f32.partialorder %v7445_v10, %v6835_v16  ;;  %v714_v13 = vpop.f32.mrb[3].mxu1  ;;  %v9094_v23 = vmov 1.0|1.0   ;;  %vm7479_vm13 = vmpackc.low %vm8869_vm10, %vm8871_vm3 }
  0xfb   : > { %vm7463_vm7 = vmpackc.low %vm8870_vm1, %vm8872_vm14  ;;  %v9096_v17 = vsel %vm7479_vm13, 4294967295, %v9095_v17  ;;  %v887_v6 = vmul.f32 16.0, %v714_v13  ;;  %979 = vperm.xlu1 %6715, %v917_v26   ;;  %v856_v58 = vcvt.s32.f32 %v6919_v31  ;;  %v888_v14 = vmul.f32 16.0, %v6214_v38 }
  0xfc   : > { %v9092_v2 = vsel %vm7463_vm7, 4294967295, %v9091_v2  ;;  %969 = vperm.xlu0 %6714, %v915_v19   ;;  %6365 = vmatprep.subr.msk.bf16.mxu0 %vm7463_vm7, %v9094_v23  ;;  %9097 = vst [vmem:[#allocation56_spill] sm:$0xff] %v9096_v17  ;;  %v918_v19 = vsub.f32 %v854_v28, %v886_v24  ;;  %v857_v13 = vcvt.s32.f32 %v6933_v34  ;;  %v858_v38 = vcvt.s32.f32 %v6942_v35  ;;  %vm9099_vm10 = vmmov %vm9098_vm6 }
  0xfd   : > { %9093 = vst [vmem:[#allocation55_spill] sm:$0xff] %v9092_v2  ;;  %6367 = vmatpush1.bf16.msk.msra.mxu0 %vm7479_vm13, %v9094_v23  ;;  %v6217_v8 = vpop.f32.mrb[4].mxu1  ;;  %v919_v30 = vsub.f32 %v855_v15, %v887_v6  ;;  %v920_v31 = vsub.f32 %v856_v58, %v888_v14  ;;  %v860_v14 = vcvt.s32.f32 %v6978_v41  ;;  %v862_v58 = vcvt.s32.f32 %v7010_v46  ;;  %vm9125_vm1 = vmmov %vm9098_vm6 }
  0xfe   : > { %6373 = vmatprep.subr.msk.bf16.mxu0 %vm6871_vm11, %v9094_v23  ;;  %v724_v3 = vpop.f32.mrb[5].mxu1  ;;  %vm9129_vm3 = vmmov %vm9125_vm1 }
  0xff   : > { %v889_v16 = vmul.f32 16.0, %v724_v3  ;;  %984 = vperm.xlu1 %6715, %v918_v19   ;;  %v859_v3 = vcvt.s32.f32 %v6966_v40  ;;  %vm9139_vm14 = vmmov %vm9125_vm1 }
 0x100   : > { %974 = vperm.xlu0 %6714, %v916_v22   ;;  %5667 = vmatmul.mubr.msk.f32.vlgmr.msra.gmra.mrb[4].mxu0 %vm9098_vm6, %v6922_v32  ;;  %v890_v32 = vmul.f32 16.0, %v6217_v8 }
 0x101   : > { %6375 = vmatpush1.bf16.msk.msra.mxu0 %vm6898_vm2, %v9094_v23  ;;  %1293 = vmatprep.mubr.f32.mxu0 %v9026_v7  ;;  %v6220_v28 = vpop.f32.mrb[6].mxu1  ;;  %v921_v34 = vsub.f32 %v857_v13, %v889_v16 }
 0x102   : > { %6377 = vmatprep.subr.msk.bf16.mxu0 %vm7463_vm7, %v9094_v23  ;;  %v734_v15 = vpop.f32.mrb[7].mxu1  ;;  %v922_v22 = vsub.f32 %v858_v38, %v890_v32  ;;  %v892_v6 = vmul.f32 16.0, %v6220_v28  ;;  %v864_v38 = vcvt.s32.f32 %v7038_v51 }
 0x103   : > { %v891_v24 = vmul.f32 16.0, %v734_v15  ;;  %994 = vperm.xlu1 %6715, %v920_v31  }
 0x104   : > { %5668 = vmatmul.mubr.msk.f32.gmra.mrb[6].mxu0 %vm9098_vm6, %v6947_v36  ;;  %989 = vperm.xlu0 %6714, %v919_v30   ;;  %v861_v36 = vcvt.s32.f32 %v7002_v45  ;;  %v924_v8 = vsub.f32 %v860_v14, %v892_v6 }
 0x105   : > { %1299 = vmatprep.mubr.f32.mxu0 %v9026_v7  ;;  %v923_v35 = vsub.f32 %v859_v3, %v891_v24  ;;  %v866_v24 = vcvt.s32.f32 %v7066_v56 }
 0x107   : > { %1004 = vperm.xlu1 %6715, %v922_v22  }
 0x108   : > { %v6223_v26 = vpop.f32.mrb[8].mxu1  ;;  %5669 = vmatmul.mubr.msk.f32.gmra.mrb[8].mxu0 %vm9099_vm10, %v6950_v37  ;;  %999 = vperm.xlu0 %6714, %v921_v34   ;;  %v863_v37 = vcvt.s32.f32 %v7031_v50  ;;  %vm9100_vm10 = vmmov %vm9098_vm6 }
 0x109   : > { %v744_v19 = vpop.f32.mrb[9].mxu1  ;;  %1305 = vmatprep.mubr.f32.mxu0 %v9026_v7  ;;  %v894_v30 = vmul.f32 16.0, %v6223_v26 }
 0x10a   : > { %v893_v16 = vmul.f32 16.0, %v744_v19  ;;  %v868_v19 = vcvt.s32.f32 %v7105_v63 }
 0x10b   : > { %v926_v31 = vsub.f32 %v862_v58, %v894_v30  ;;  %1014 = vperm.xlu1 %6715, %v924_v8   ;;  %v870_v8 = vcvt.s32.f32 %v7143_v11 }
 0x10c   : > { %5670 = vmatmul.mubr.msk.f32.gmra.mrb[10].mxu0 %vm9098_vm6, %v6963_v39  ;;  %1009 = vperm.xlu0 %6714, %v923_v35   ;;  %v925_v41 = vsub.f32 %v861_v36, %v893_v16  ;;  %v865_v39 = vcvt.s32.f32 %v7054_v54 }
 0x10d   : > { %v6226_v40 = vpop.f32.mrb[10].mxu1  ;;  %1311 = vmatprep.mubr.f32.mxu0 %v9026_v7 }
 0x10e   : > { %v754_v13 = vpop.f32.mrb[11].mxu1  ;;  %v896_v32 = vmul.f32 16.0, %v6226_v40 }
 0x10f   : > { %v895_v28 = vmul.f32 16.0, %v754_v13  ;;  %1024 = vperm.xlu1 %6715, %v926_v31  }
 0x110   : > { %5671 = vmatmul.mubr.msk.f32.gmra.mrb[12].mxu0 %vm9100_vm10, %v6983_v42  ;;  %1019 = vperm.xlu0 %6714, %v925_v41   ;;  %v928_v3 = vsub.f32 %v864_v38, %v896_v32  ;;  %v867_v42 = vcvt.s32.f32 %v7086_v59  ;;  %vm9101_vm10 = vmmov %vm9098_vm6  ;;  %v874_v32 = vcvt.s32.f32 %v7215_v27 }
 0x111   : > { %v6229_v45 = vpop.f32.mrb[12].mxu1  ;;  %v927_v46 = vsub.f32 %v863_v37, %v895_v28  ;;  %1317 = vmatprep.mubr.f32.mxu0 %v9026_v7  ;;  %v872_v37 = vcvt.s32.f32 %v7179_v20 }
 0x112   : > { %v764_v15 = vpop.f32.mrb[13].mxu1  ;;  %v898_v26 = vmul.f32 16.0, %v6229_v45 }
 0x113   : > { %v897_v34 = vmul.f32 16.0, %v764_v15  ;;  %1034 = vperm.xlu1 %6715, %v928_v3  }
 0x114   : > { %5672 = vmatmul.mubr.msk.f32.gmra.mrb[14].mxu0 %vm9098_vm6, %v6995_v43  ;;  %1029 = vperm.xlu0 %6714, %v927_v46   ;;  %v930_v6 = vsub.f32 %v866_v24, %v898_v26  ;;  %v869_v43 = vcvt.s32.f32 %v7118_v4 }
 0x115   : > { %v6232_v50 = vpop.f32.mrb[14].mxu1  ;;  %v929_v51 = vsub.f32 %v865_v39, %v897_v34  ;;  %1323 = vmatprep.mubr.f32.mxu0 %v9026_v7 }
 0x116   : > { %v774_v22 = vpop.f32.mrb[15].mxu1  ;;  %v900_v35 = vmul.f32 16.0, %v6232_v50  ;;  %v876_v50 = vcvt.s32.f32 %v7251_v44 }
 0x117   : > { %v899_v14 = vmul.f32 16.0, %v774_v22  ;;  %1044 = vperm.xlu1 %6715, %v930_v6  }
 0x118   : > { %5673 = vmatmul.mubr.msk.f32.gmra.mrb[16].mxu0 %vm9101_vm10, %v7015_v47  ;;  %1039 = vperm.xlu0 %6714, %v929_v51   ;;  %v932_v40 = vsub.f32 %v868_v19, %v900_v35  ;;  %v871_v47 = vcvt.s32.f32 %v7152_v12  ;;  %vm9102_vm10 = vmmov %vm9098_vm6  ;;  %v878_v51 = vcvt.s32.f32 %v7287_v53  ;;  %v880_v19 = vcvt.s32.f32 %v7323_v18 }
 0x119   : > { %v6235_v54 = vpop.f32.mrb[16].mxu1  ;;  %v931_v56 = vsub.f32 %v867_v42, %v899_v14  ;;  %1329 = vmatprep.mubr.f32.mxu0 %v9026_v7 }
 0x11a   : > { %v784_v36 = vpop.f32.mrb[17].mxu1  ;;  %v902_v58 = vmul.f32 16.0, %v6235_v54 }
 0x11b   : > { %v901_v16 = vmul.f32 16.0, %v784_v36  ;;  %1054 = vperm.xlu1 %6715, %v932_v40   ;;  %v9106_v40 = vld [vmem:[#allocation14_spill] sm:$0xff] }
 0x11c   : > { %5674 = vmatmul.mubr.msk.f32.gmra.mrb[18].mxu0 %vm9098_vm6, %v7024_v48  ;;  %1049 = vperm.xlu0 %6714, %v931_v56   ;;  %v934_v41 = vsub.f32 %v870_v8, %v902_v58  ;;  %v873_v48 = vcvt.s32.f32 %v7188_v21  ;;  %v9107_v8 = vld [vmem:[#allocation16_spill] sm:$0xff]  ;;  %v2655_v58 = vld [vmem:[%s8782_s3 + $0x20] sm:$0xff] }
 0x11d   : > { %v6238_v59 = vpop.f32.mrb[18].mxu1  ;;  %v933_v63 = vsub.f32 %v869_v43, %v901_v16  ;;  %1335 = vmatprep.mubr.f32.mxu0 %v9026_v7  ;;  %v9105_v43 = vld [vmem:[#allocation42_spill] sm:$0xff] }
 0x11e   : > { %v794_v30 = vpop.f32.mrb[19].mxu1  ;;  %v904_v28 = vmul.f32 16.0, %v6238_v59  ;;  %v882_v16 = vcvt.s32.f32 %v9105_v43  ;;  %v9144_v43 = vmov 0 }
 0x11f   : > { %v903_v13 = vmul.f32 16.0, %v794_v30  ;;  %1064 = vperm.xlu1 %6715, %v934_v41   ;;  %v9109_v30 = vld [vmem:[#allocation18_spill] sm:$0xff]  ;;  %v3321_v41 = vld [vmem:[%s8782_s3 + $0x70] sm:$0xf] }
 0x120   : > { %5675 = vmatmul.mubr.msk.f32.gmra.mrb[20].mxu0 %vm9102_vm10, %v7041_v52  ;;  %1059 = vperm.xlu0 %6714, %v933_v63   ;;  %v936_v38 = vsub.f32 %v872_v37, %v904_v28  ;;  %v875_v52 = vcvt.s32.f32 %v7224_v1  ;;  %vm9103_vm10 = vmmov %vm9098_vm6  ;;  %v2743_v63 = vld [vmem:[%s8782_s3 + $0x30] sm:$0x3f]  ;;  %v9112_v37 = vld [vmem:[#allocation22_spill] sm:$0xff] }
 0x121   : > { %v6241_v4 = vpop.f32.mrb[20].mxu1  ;;  %v935_v11 = vsub.f32 %v871_v47, %v903_v13  ;;  %1341 = vmatprep.mubr.f32.mxu0 %v9026_v7  ;;  %v3207_v47 = vld [vmem:[%s8782_s3 + $0x50] sm:$0xff]  ;;  %v9110_v13 = vld [vmem:[#allocation19_spill] sm:$0xff] }
 0x122   : > { %v804_v45 = vpop.f32.mrb[21].mxu1  ;;  %v906_v15 = vmul.f32 16.0, %v6241_v4  ;;  %v3228_v4 = vld [vmem:[%s8782_s3 + $0x60] sm:$0xff]  ;;  %v3941_v28 = vld [vmem:[%s8782_s3 + $0x88] sm:$0xff] }
 0x123   : > { %v905_v31 = vmul.f32 16.0, %v804_v45  ;;  %1074 = vperm.xlu1 %6715, %v936_v38   ;;  %v4029_v45 = vld [vmem:[%s8782_s3 + $0x98] sm:$0xff] }
 0x124   : > { %5676 = vmatmul.mubr.msk.f32.gmra.mrb[22].mxu0 %vm9098_vm6, %v7059_v55  ;;  %1069 = vperm.xlu0 %6714, %v935_v11   ;;  %v938_v34 = vsub.f32 %v874_v32, %v906_v15  ;;  %v877_v55 = vcvt.s32.f32 %v7260_v0  ;;  %v9113_v11 = vld [vmem:[#allocation23_spill] sm:$0xff]  ;;  %v4599_v38 = vld [vmem:[%s8782_s3 + $0xd8] sm:$0xff] }
 0x125   : > { %v6244_v12 = vpop.f32.mrb[22].mxu1  ;;  %v937_v20 = vsub.f32 %v873_v48, %v905_v31  ;;  %1347 = vmatprep.mubr.f32.mxu0 %v9026_v7  ;;  %v4116_v48 = vld [vmem:[%s8782_s3 + $0xa8] sm:$0x3f] }
 0x126   : > { %v814_v46 = vpop.f32.mrb[23].mxu1  ;;  %v908_v3 = vmul.f32 16.0, %v6244_v12  ;;  %v4578_v31 = vld [vmem:[%s8782_s3 + $0xc8] sm:$0xff]  ;;  %v9115_v12 = vld [vmem:[#allocation26_spill] sm:$0xff] }
 0x127   : > { %v907_v39 = vmul.f32 16.0, %v814_v46  ;;  %1084 = vperm.xlu1 %6715, %v938_v34   ;;  %v4692_v32 = vld [vmem:[%s8782_s3 + $0xe8] sm:$0xf]  ;;  %v5144_v46 = vld [vmem:[%s8782_s3 + $0x138] sm:$0xff] }
 0x128   : > { %5677 = vmatmul.mubr.msk.f32.gmra.mrb[24].mxu0 %vm9103_vm10, %v7069_v57  ;;  %1079 = vperm.xlu0 %6714, %v937_v20   ;;  %v940_v22 = vsub.f32 %v876_v50, %v908_v3  ;;  %v879_v57 = vcvt.s32.f32 %v7296_v49  ;;  %vm9104_vm10 = vmmov %vm9098_vm6  ;;  %v9116_v15 = vld [vmem:[#allocation27_spill] sm:$0xff]  ;;  %v5145_v20 = vld [vmem:[%s8782_s3 + $0x140] sm:$0xff] }
 0x129   : > { %v6247_v21 = vpop.f32.mrb[24].mxu1  ;;  %v939_v27 = vsub.f32 %v875_v52, %v907_v39  ;;  %1353 = vmatprep.mubr.f32.mxu0 %v9026_v7  ;;  %v9118_v52 = vld [vmem:[#allocation30_spill] sm:$0xff]  ;;  %v5146_v39 = vld [vmem:[%s8782_s3 + $0x148] sm:$0xf]  ;;  %v5208_v50 = vld [vmem:[%s8782_s3 + $0x170] sm:$0xff] }
 0x12a   : > { %v824_v24 = vpop.f32.mrb[25].mxu1  ;;  %v910_v42 = vmul.f32 16.0, %v6247_v21  ;;  %v5207_v21 = vld [vmem:[%s8782_s3 + $0x168] sm:$0xff]  ;;  %v5209_v3 = vld [vmem:[%s8782_s3 + $0x178] sm:$0xf] }
 0x12b   : > { %v909_v26 = vmul.f32 16.0, %v824_v24  ;;  %1094 = vperm.xlu1 %6715, %v940_v22   ;;  %v9119_v34 = vld [vmem:[#allocation31_spill] sm:$0xff]  ;;  %v9121_v24 = vld [vmem:[#allocation34_spill] sm:$0xff] }
 0x12c   : > { %5678 = vmatmul.mubr.msk.f32.gmra.mrb[26].mxu0 %vm9098_vm6, %v7091_v60  ;;  %1089 = vperm.xlu0 %6714, %v939_v27   ;;  %v942_v6 = vsub.f32 %v878_v51, %v910_v42  ;;  %v881_v60 = vcvt.s32.f32 %v7332_v33  ;;  %v2567_v33 = vld [vmem:[%s8782_s3 + $0x10] sm:$0xff]  ;;  %v5361_v27 = vld [vmem:[%s8782_s3 + $0x188] sm:$0x1] }
 0x12d   : > { %v6250_v1 = vpop.f32.mrb[26].mxu1  ;;  %v941_v44 = vsub.f32 %v877_v55, %v909_v26  ;;  %1359 = vmatprep.mubr.f32.mxu0 %v9026_v7  ;;  %v9122_v55 = vld [vmem:[#allocation35_spill] sm:$0xff]  ;;  %v9124_v26 = vld [vmem:[#allocation38_spill] sm:$0xff]  ;;  %v9130_v51 = vld [vmem:[#allocation44_spill] sm:$0xff] }
 0x12e   : > { %v834_v14 = vpop.f32.mrb[27].mxu1  ;;  %v912_v35 = vmul.f32 16.0, %v6250_v1  ;;  %v9126_v1 = vld [vmem:[#allocation39_spill] sm:$0xff] }
 0x12f   : > { %v911_v54 = vmul.f32 16.0, %v834_v14  ;;  %1104 = vperm.xlu1 %6715, %v942_v6   ;;  %v9128_v22 = vld [vmem:[#allocation43_spill] sm:$0xff]  ;;  %v9133_v14 = vld [vmem:[#allocation48_spill] sm:$0xff] }
 0x130   : > { %5679 = vmatmul.mubr.msk.f32.gmra.mrb[28].mxu0 %vm9104_vm10, %v7098_v61  ;;  %1099 = vperm.xlu0 %6714, %v941_v44   ;;  %v944_v49 = vsub.f32 %v880_v19, %v912_v35  ;;  %vm9108_vm10 = vmmov %vm9098_vm6  ;;  %v9132_v42 = vld [vmem:[#allocation47_spill] sm:$0xff]  ;;  %v7688_v19 = vld [vmem:[%s219_s7] sm:$0x1] }
 0x131   : > { %v6253_v0 = vpop.f32.mrb[28].mxu1  ;;  %v943_v53 = vsub.f32 %v879_v57, %v911_v54  ;;  %1365 = vmatprep.mubr.f32.mxu0 %v9026_v7  ;;  %v9135_v57 = vld [vmem:[#allocation5_spill] sm:$0xff]  ;;  %v9136_v54 = vld [vmem:[#allocation50_spill] sm:$0xff]  ;;  %9138 = vst [vmem:[#allocation42_spill] sm:$0xff] %v7688_v19 }
 0x132   : > { %v844_v36 = vpop.f32.mrb[29].mxu1  ;;  %v914_v59 = vmul.f32 16.0, %v6253_v0 }
 0x133   : > { %v913_v56 = vmul.f32 16.0, %v844_v36  ;;  %1114 = vperm.xlu1 %6715, %v944_v49  }
 0x134   : > { %5680 = vmatmul.mubr.msk.f32.gmra.mrb[30].mxu0 %vm9098_vm6, %v9106_v40  ;;  %1109 = vperm.xlu0 %6714, %v943_v53   ;;  %v946_v61 = vsub.f32 %v882_v16, %v914_v59 }
 0x135   : > { %v945_v18 = vsub.f32 %v881_v60, %v913_v56  ;;  %1371 = vmatprep.mubr.f32.mxu0 %v9026_v7 }
 0x137   : > { %1124 = vperm.xlu1 %6715, %v946_v61  }
 0x138   : > { %5681 = vmatmul.mubr.msk.f32.gmra.mrb[32].mxu0 %vm9108_vm10, %v9107_v8  ;;  %1119 = vperm.xlu0 %6714, %v945_v18   ;;  %vm9111_vm10 = vmmov %vm9098_vm6 }
 0x139   : > { %1377 = vmatprep.mubr.f32.mxu0 %v9026_v7 }
 0x13b   : > { %2658 = vperm.xlu1 %6715, %v2655_v58  }
 0x13c   : > { %5682 = vmatmul.mubr.msk.f32.gmra.mrb[34].mxu0 %vm9098_vm6, %v9109_v30  ;;  %2570 = vperm.xlu0 %6714, %v2567_v33  }
 0x13d   : > { %1383 = vmatprep.mubr.f32.mxu0 %v9026_v7 }
 0x13f   : > { %3210 = vperm.xlu1 %6715, %v3207_v47   ;;  %v9152_v47 = vld [vmem:[#allocation24_spill] sm:$0xff] }
 0x140   : > { %5683 = vmatmul.mubr.msk.f32.gmra.mrb[36].mxu0 %vm9111_vm10, %v9110_v13  ;;  %2746 = vperm.xlu0 %6714, %v2743_v63   ;;  %vm9114_vm10 = vmmov %vm9098_vm6  ;;  %v9154_v13 = vmov 0  ;;  %v9199_v63 = vld [vmem:[#allocation37_spill] sm:$0xff] }
 0x141   : > { %1389 = vmatprep.mubr.f32.mxu0 %v9026_v7 }
 0x143   : > { %3324 = vperm.xlu1 %6715, %v3321_v41   ;;  %v9158_v41 = vld [vmem:[#allocation8_spill] sm:$0xff] }
 0x144   : > { %5684 = vmatmul.mubr.msk.f32.gmra.mrb[38].mxu0 %vm9098_vm6, %v9112_v37  ;;  %3231 = vperm.xlu0 %6714, %v3228_v4  }
 0x145   : > { %1395 = vmatprep.mubr.f32.mxu0 %v9026_v7 }
 0x147   : > { %4032 = vperm.xlu1 %6715, %v4029_v45  }
 0x148   : > { %5685 = vmatmul.mubr.msk.f32.gmra.mrb[40].mxu0 %vm9114_vm10, %v9113_v11  ;;  %3944 = vperm.xlu0 %6714, %v3941_v28   ;;  %vm9117_vm10 = vmmov %vm9098_vm6 }
 0x149   : > { %1401 = vmatprep.mubr.f32.mxu0 %v9026_v7 }
 0x14b   : > { %4581 = vperm.xlu1 %6715, %v4578_v31  }
 0x14c   : > { %5686 = vmatmul.mubr.msk.f32.gmra.mrb[42].mxu0 %vm9098_vm6, %v9115_v12  ;;  %4119 = vperm.xlu0 %6714, %v4116_v48  }
 0x14d   : > { %1407 = vmatprep.mubr.f32.mxu0 %v9026_v7 }
 0x14f   : > { %4695 = vperm.xlu1 %6715, %v4692_v32   ;;  %v9165_v32 = vld [vmem:[#allocation28_spill] sm:$0xff] }
 0x150   : > { %5687 = vmatmul.mubr.msk.f32.gmra.mrb[44].mxu0 %vm9117_vm10, %v9116_v15  ;;  %4602 = vperm.xlu0 %6714, %v4599_v38   ;;  %vm9120_vm10 = vmmov %vm9098_vm6  ;;  %v9163_v38 = vld [vmem:[#allocation25_spill] sm:$0xff]  ;;  %v9167_v15 = vmov 0 }
 0x151   : > { %1413 = vmatprep.mubr.f32.mxu0 %v9026_v7 }
 0x153   : > { %5154 = vperm.xlu1 %6715, %v5145_v20   ;;  %v9171_v20 = vld [vmem:[#allocation9_spill] sm:$0xff] }
 0x154   : > { %5688 = vmatmul.mubr.msk.f32.gmra.mrb[46].mxu0 %vm9098_vm6, %v9118_v52  ;;  %5149 = vperm.xlu0 %6714, %v5144_v46  }
 0x155   : > { %1419 = vmatprep.mubr.f32.mxu0 %v9026_v7 }
 0x157   : > { %5212 = vperm.xlu1 %6715, %v5207_v21  }
 0x158   : > { %5689 = vmatmul.mubr.msk.f32.gmra.mrb[48].mxu0 %vm9120_vm10, %v9119_v34  ;;  %5159 = vperm.xlu0 %6714, %v5146_v39   ;;  %vm9123_vm10 = vmmov %vm9098_vm6 }
 0x159   : > { %1425 = vmatprep.mubr.f32.mxu0 %v9026_v7 }
 0x15b   : > { %5222 = vperm.xlu1 %6715, %v5209_v3  }
 0x15c   : > { %5690 = vmatmul.mubr.msk.f32.gmra.mrb[50].mxu0 %vm9098_vm6, %v9121_v24  ;;  %5217 = vperm.xlu0 %6714, %v5208_v50   ;;  %vm9127_vm6 = vmmov %vm9125_vm1 }
 0x15d   : > { %1431 = vmatprep.mubr.f32.mxu0 %v9026_v7 }
 0x160   : > { %5691 = vmatmul.mubr.msk.f32.gmra.mrb[52].mxu0 %vm9123_vm10, %v9122_v55  ;;  %5364 = vperm.xlu0 %6714, %v5361_v27   ;;  %vm9131_vm10 = vmmov %vm9125_vm1  ;;  %v9175_v27 = vld [vmem:[#allocation29_spill] sm:$0xff]  ;;  %v9177_v55 = vld [vmem:[#allocation32_spill] sm:$0xff] }
 0x161   : > { %1437 = vmatprep.mubr.f32.mxu0 %v9026_v7 }
 0x164   : > { %5692 = vmatmul.mubr.msk.f32.gmra.mrb[54].mxu0 %vm9125_vm1, %v9124_v26  ;;  %v9179_v26 = vmov 0 }
 0x165   : > { %1443 = vmatprep.mubr.f32.mxu0 %v9026_v7 }
 0x168   : > { %5693 = vmatmul.mubr.msk.f32.gmra.mrb[56].mxu0 %vm9127_vm6, %v9126_v1  ;;  %vm9134_vm6 = vmmov %vm9125_vm1  ;;  %v9182_v1 = vld [vmem:[#allocation10_spill] sm:$0xff] }
 0x169   : > { %1449 = vmatprep.mubr.f32.mxu0 %v9026_v7 }
 0x16c   : > { %5694 = vmatmul.mubr.msk.f32.gmra.mrb[58].mxu0 %vm9129_vm3, %v9128_v22 }
 0x16d   : > { %1455 = vmatprep.mubr.f32.mxu0 %v9026_v7 }
 0x170   : > { %5695 = vmatmul.mubr.msk.f32.gmra.mrb[60].mxu0 %vm9131_vm10, %v9130_v51  ;;  %vm9137_vm10 = vmmov %vm9125_vm1 }
 0x171   : > { %1461 = vmatprep.mubr.f32.mxu0 %v9026_v7 }
 0x174   : > { %5696 = vmatmul.mubr.msk.f32.gmra.mrb[62].mxu0 %vm9125_vm1, %v9132_v42 }
 0x175   : > { %1467 = vmatprep.mubr.f32.mxu0 %v9026_v7 }
 0x178   : > { %5697 = vmatmul.mubr.msk.f32.gmra.mrb[64].mxu0 %vm9134_vm6, %v9133_v14 }
 0x179   : > { %1473 = vmatprep.mubr.f32.mxu0 %v9026_v7 }
 0x17a   : > { %v980_v0 = vpop.permute.xlu1 %979 }
 0x17b   : > { %v970_v44 = vpop.permute.xlu0 %969  ;;  %vm1129_vm7 = vcmp.eq.f32.partialorder %v980_v0, %v9135_v57 }
 0x17c   : > { %vm1127_vm3 = vcmp.eq.f32.partialorder %v970_v44, %v9135_v57  ;;  %5698 = vmatmul.mubr.msk.f32.gmra.mrb[66].mxu0 %vm9137_vm10, %v9136_v54  ;;  %v5633_v60 = vsel %vm1129_vm7, 1.0, %v9026_v7  ;;  %vm9141_vm10 = vmmov %vm9125_vm1 }
 0x17d   : > { %v5631_v6 = vsel %vm1127_vm3, 1.0, %v9026_v7  ;;  %1973 = vmatprep.mubr.f32.mxu0 %v9026_v7  ;;  %vm9140_vm3 = vmmov %vm9125_vm1 }
 0x17e   : > { %5703 = vmatmul.mubr.msk.f32.vlgmr.msra.gmra.mrb[30].mxu1 %vm9125_vm1, %v5631_v6  ;;  %v985_v53 = vpop.permute.xlu1 %984  ;;  %vm7711_vm1 = vmpackc.low %vm7166_vm15, %vm7134_vm0 }
 0x17f   : > { %v975_v35 = vpop.permute.xlu0 %974  ;;  %1646 = vmatprep.mubr.f32.mxu1 %v9026_v7  ;;  %v9145_v43 = vsel %vm7711_vm1, 4294967295, %v9144_v43  ;;  %6413 = vmatprep.subr.msk.bf16.mxu1 %vm7711_vm1, %v9094_v23  ;;  %vm9147_vm7 = vmmov %vm9140_vm3 }
 0x180   : > { %vm1128_vm6 = vcmp.eq.f32.partialorder %v975_v35, %v9135_v57  ;;  %5741 = vmatmul.mubr.msk.f32.vlgmr.msra.gmra.mrb[68].mxu0 %vm9139_vm14, %v7688_v19  ;;  %vm1130_vm14 = vcmp.eq.f32.partialorder %v985_v53, %v9135_v57  ;;  %9146 = vst [vmem:[#allocation14_spill] sm:$0xff] %v9145_v43  ;;  %6415 = vmatpush3.bf16.msk.msra.mxu1 %vm6928_vm9, %v9094_v23  ;;  %vm9149_vm15 = vmmov %vm9140_vm3  ;;  %v9187_v35 = vld [vmem:[#allocation33_spill] sm:$0xff]  ;;  %v9191_v53 = vmov 0 }
 0x181   : > { %v5632_v36 = vsel %vm1128_vm6, 1.0, %v9026_v7  ;;  %6379 = vmatpush1.bf16.msk.msra.mxu0 %vm7479_vm13, %v9094_v23  ;;  %2044 = vmatprep.mubr.f32.mxu0 %v9026_v7  ;;  %v5634_v40 = vsel %vm1130_vm14, 1.0, %v9026_v7  ;;  %vm9150_vm14 = vmmov %vm9140_vm3 }
 0x182   : > { %5704 = vmatmul.mubr.msk.f32.gmra.mrb[32].mxu1 %vm9140_vm3, %v5632_v36  ;;  %6381 = vmatprep.subr.msk.bf16.mxu0 %vm7711_vm1, %v9094_v23  ;;  %v995_v18 = vpop.permute.xlu1 %994  ;;  %v9189_v36 = vld [vmem:[#allocation36_spill] sm:$0xff] }
 0x183   : > { %1652 = vmatprep.mubr.f32.mxu1 %v9026_v7  ;;  %v990_v16 = vpop.permute.xlu0 %989  ;;  %vm1132_vm6 = vcmp.eq.f32.partialorder %v995_v18, %v9135_v57 }
 0x184   : > { %5746 = vmatmul.mubr.msk.f32.vlgmr.msra.gmra.mrb[70].mxu0 %vm9141_vm10, %v7688_v19  ;;  %vm1131_vm0 = vcmp.eq.f32.partialorder %v990_v16, %v9135_v57  ;;  %v5636_v33 = vsel %vm1132_vm6, 1.0, %v9026_v7  ;;  %vm9157_vm6 = vmmov %vm9140_vm3 }
 0x185   : > { %6383 = vmatpush3.bf16.msk.msra.mxu0 %vm6928_vm9, %v9094_v23  ;;  %v5635_v61 = vsel %vm1131_vm0, 1.0, %v9026_v7  ;;  %vm9153_vm0 = vnez %v9152_v47  ;;  %v9201_v47 = vld [vmem:[#allocation40_spill] sm:$0xff] }
 0x186   : > { %5705 = vmatmul.mubr.msk.f32.gmra.mrb[34].mxu1 %vm9147_vm7, %v5633_v60  ;;  %v1005_v58 = vpop.permute.xlu1 %1004  ;;  %v9194_v60 = vld [vmem:[#allocation11_spill] sm:$0xff] }
 0x187   : > { %1658 = vmatprep.mubr.f32.mxu1 %v9026_v7  ;;  %v1000_v8 = vpop.permute.xlu0 %999  ;;  %vm1134_vm7 = vcmp.eq.f32.partialorder %v1005_v58, %v9135_v57 }
 0x188   : > { %vm1133_vm10 = vcmp.eq.f32.partialorder %v1000_v8, %v9135_v57  ;;  %v5638_v37 = vsel %vm1134_vm7, 1.0, %v9026_v7 }
 0x189   : > { %v5637_v30 = vsel %vm1133_vm10, 1.0, %v9026_v7  ;;  %vm9160_vm10 = vmmov %vm9157_vm6 }
 0x18a   : > { %5706 = vmatmul.mubr.msk.f32.gmra.mrb[36].mxu1 %vm9149_vm15, %v5634_v40  ;;  %vm7747_vm15 = vmpackc.low %vm9153_vm0, %vm7170_vm12  ;;  %v1015_v28 = vpop.permute.xlu1 %1014 }
 0x18b   : > { %1664 = vmatprep.mubr.f32.mxu1 %v9026_v7  ;;  %v9155_v13 = vsel %vm7747_vm15, 4294967295, %v9154_v13  ;;  %v1010_v4 = vpop.permute.xlu0 %1009  ;;  %6417 = vmatprep.subr.msk.bf16.mxu1 %vm7747_vm15, %v9094_v23  ;;  %vm9161_vm0 = vmmov %vm9157_vm6 }
 0x18c   : > { %9156 = vst [vmem:[#allocation16_spill] sm:$0xff] %v9155_v13  ;;  %6385 = vmatprep.subr.msk.bf16.mxu0 %vm7747_vm15, %v9094_v23  ;;  %vm1135_vm12 = vcmp.eq.f32.partialorder %v1010_v4, %v9135_v57  ;;  %v9203_v4 = vmov 0 }
 0x18d   : > { %v5639_v45 = vsel %vm1135_vm12, 1.0, %v9026_v7 }
 0x18e   : > { %5707 = vmatmul.mubr.msk.f32.gmra.mrb[38].mxu1 %vm9140_vm3, %v5635_v61  ;;  %vm9159_vm3 = vnez %v9158_v41  ;;  %v1025_v31 = vpop.permute.xlu1 %1024 }
 0x18f   : > { %1670 = vmatprep.mubr.f32.mxu1 %v9026_v7  ;;  %6387 = vmatpush3.bf16.msk.msra.mxu0 %vm9159_vm3, %v9094_v23  ;;  %v1020_v11 = vpop.permute.xlu0 %1019  ;;  %vm1138_vm12 = vcmp.eq.f32.partialorder %v1025_v31, %v9135_v57  ;;  %v9208_v31 = vld [vmem:[#allocation41_spill] sm:$0xff] }
 0x190   : > { %6419 = vmatpush3.bf16.msk.msra.mxu1 %vm9159_vm3, %v9094_v23  ;;  %vm1137_vm7 = vcmp.eq.f32.partialorder %v1020_v11, %v9135_v57  ;;  %vm9166_vm3 = vnez %v9165_v32  ;;  %v5642_v52 = vsel %vm1138_vm12, 1.0, %v9026_v7 }
 0x191   : > { %v5641_v12 = vsel %vm1137_vm7, 1.0, %v9026_v7  ;;  %vm9172_vm7 = vnez %v9171_v20 }
 0x192   : > { %5708 = vmatmul.mubr.msk.f32.gmra.mrb[40].mxu1 %vm9150_vm14, %v5636_v33  ;;  %vm1136_vm14 = vcmp.eq.f32.partialorder %v1015_v28, %v9135_v57  ;;  %v1035_v39 = vpop.permute.xlu1 %1034 }
 0x193   : > { %1676 = vmatprep.mubr.f32.mxu1 %v9026_v7  ;;  %v5640_v48 = vsel %vm1136_vm14, 1.0, %v9026_v7  ;;  %v1030_v46 = vpop.permute.xlu0 %1029 }
 0x196   : > { %5709 = vmatmul.mubr.msk.f32.gmra.mrb[42].mxu1 %vm9157_vm6, %v5637_v30  ;;  %vm9162_vm6 = vmmov %vm9161_vm0  ;;  %v1045_v3 = vpop.permute.xlu1 %1044 }
 0x197   : > { %1682 = vmatprep.mubr.f32.mxu1 %v9026_v7  ;;  %vm9170_vm14 = vmmov %vm9162_vm6  ;;  %v1040_v50 = vpop.permute.xlu0 %1039 }
 0x198   : > { %vm1141_vm12 = vcmp.eq.f32.partialorder %v1040_v50, %v9135_v57 }
 0x199   : > { %v5645_v24 = vsel %vm1141_vm12, 1.0, %v9026_v7 }
 0x19a   : > { %5710 = vmatmul.mubr.msk.f32.gmra.mrb[44].mxu1 %vm9160_vm10, %v5638_v37  ;;  %vm9164_vm10 = vnez %v9163_v38  ;;  %v1055_v42 = vpop.permute.xlu1 %1054  ;;  %v9206_v37 = vld [vmem:[#allocation12_spill] sm:$0xff]  ;;  %v9211_v38 = vmov 0 }
 0x19b   : > { %1688 = vmatprep.mubr.f32.mxu1 %v9026_v7  ;;  %v1050_v22 = vpop.permute.xlu0 %1049 }
 0x19c   : > { %vm1143_vm12 = vcmp.eq.f32.partialorder %v1050_v22, %v9135_v57  ;;  %v9223_v22 = vld [vmem:[#allocation15_spill] sm:$0xff] }
 0x19d   : > { %v5647_v14 = vsel %vm1143_vm12, 1.0, %v9026_v7 }
 0x19e   : > { %5711 = vmatmul.mubr.msk.f32.gmra.mrb[46].mxu1 %vm9161_vm0, %v5639_v45  ;;  %vm7783_vm0 = vmpackc.low %vm9166_vm3, %vm9164_vm10  ;;  %vm1139_vm3 = vcmp.eq.f32.partialorder %v1030_v46, %v9135_v57  ;;  %vm1140_vm10 = vcmp.eq.f32.partialorder %v1035_v39, %v9135_v57  ;;  %v1065_v6 = vpop.permute.xlu1 %1064  ;;  %v9215_v39 = vld [vmem:[#allocation13_spill] sm:$0xff] }
 0x19f   : > { %1694 = vmatprep.mubr.f32.mxu1 %v9026_v7  ;;  %v9168_v15 = vsel %vm7783_vm0, 4294967295, %v9167_v15  ;;  %6421 = vmatprep.subr.msk.bf16.mxu1 %vm7783_vm0, %v9094_v23  ;;  %v5643_v21 = vsel %vm1139_vm3, 1.0, %v9026_v7  ;;  %v5644_v34 = vsel %vm1140_vm10, 1.0, %v9026_v7  ;;  %vm1142_vm3 = vcmp.eq.f32.partialorder %v1045_v3, %v9135_v57  ;;  %v1060_v44 = vpop.permute.xlu0 %1059 }
 0x1a0   : > { %9169 = vst [vmem:[#allocation18_spill] sm:$0xff] %v9168_v15  ;;  %6389 = vmatprep.subr.msk.bf16.mxu0 %vm7783_vm0, %v9094_v23  ;;  %6423 = vmatpush3.bf16.msk.msra.mxu1 %vm9172_vm7, %v9094_v23  ;;  %vm9183_vm10 = vnez %v9182_v1  ;;  %v5646_v51 = vsel %vm1142_vm3, 1.0, %v9026_v7  ;;  %vm1145_vm3 = vcmp.eq.f32.partialorder %v1060_v44, %v9135_v57  ;;  %vm1146_vm12 = vcmp.eq.f32.partialorder %v1065_v6, %v9135_v57 }
 0x1a1   : > { %6391 = vmatpush3.bf16.msk.msra.mxu0 %vm9172_vm7, %v9094_v23  ;;  %vm9174_vm7 = vmmov %vm9162_vm6  ;;  %v5649_v0 = vsel %vm1145_vm3, 1.0, %v9026_v7  ;;  %v5650_v49 = vsel %vm1146_vm12, 1.0, %v9026_v7  ;;  %v9219_v3 = vmov 0 }
 0x1a2   : > { %5712 = vmatmul.mubr.msk.f32.gmra.mrb[48].mxu1 %vm9162_vm6, %v5640_v48  ;;  %v1075_v40 = vpop.permute.xlu1 %1074 }
 0x1a3   : > { %1700 = vmatprep.mubr.f32.mxu1 %v9026_v7  ;;  %v1070_v56 = vpop.permute.xlu0 %1069 }
 0x1a4   : > { %vm1147_vm3 = vcmp.eq.f32.partialorder %v1070_v56, %v9135_v57 }
 0x1a5   : > { %v5651_v16 = vsel %vm1147_vm3, 1.0, %v9026_v7 }
 0x1a6   : > { %5713 = vmatmul.mubr.msk.f32.gmra.mrb[50].mxu1 %vm9170_vm14, %v5641_v12  ;;  %vm9173_vm14 = vmmov %vm9162_vm6  ;;  %v1085_v33 = vpop.permute.xlu1 %1084 }
 0x1a7   : > { %1706 = vmatprep.mubr.f32.mxu1 %v9026_v7  ;;  %v1080_v18 = vpop.permute.xlu0 %1079  ;;  %vm1150_vm3 = vcmp.eq.f32.partialorder %v1085_v33, %v9135_v57 }
 0x1a8   : > { %vm1149_vm12 = vcmp.eq.f32.partialorder %v1080_v18, %v9135_v57  ;;  %v5654_v45 = vsel %vm1150_vm3, 1.0, %v9026_v7  ;;  %vm9214_vm3 = vcmask 130048  }
 0x1a9   : > { %v5653_v8 = vsel %vm1149_vm12, 1.0, %v9026_v7  ;;  %vm9207_vm12 = vnez %v9206_v37 }
 0x1aa   : > { %5714 = vmatmul.mubr.msk.f32.gmra.mrb[52].mxu1 %vm9162_vm6, %v5642_v52  ;;  %vm9176_vm6 = vnez %v9175_v27  ;;  %v1095_v46 = vpop.permute.xlu1 %1094 }
 0x1ab   : > { %1712 = vmatprep.mubr.f32.mxu1 %v9026_v7  ;;  %v1090_v28 = vpop.permute.xlu0 %1089 }
 0x1ae   : > { %5715 = vmatmul.mubr.msk.f32.gmra.mrb[54].mxu1 %vm9173_vm14, %v5643_v21  ;;  %vm9178_vm14 = vnez %v9177_v55 }
 0x1af   : > { %1718 = vmatprep.mubr.f32.mxu1 %v9026_v7  ;;  %vm7819_vm0 = vmpackc.low %vm9178_vm14, %vm9176_vm6  ;;  %vm1144_vm14 = vcmp.eq.f32.partialorder %v1055_v42, %v9135_v57 }
 0x1b0   : > { %v9180_v26 = vsel %vm7819_vm0, 4294967295, %v9179_v26  ;;  %6425 = vmatprep.subr.msk.bf16.mxu1 %vm7819_vm0, %v9094_v23  ;;  %6393 = vmatprep.subr.msk.bf16.mxu0 %vm7819_vm0, %v9094_v23  ;;  %vm9184_vm6 = vmmov %vm9174_vm7  ;;  %v5648_v54 = vsel %vm1144_vm14, 1.0, %v9026_v7  ;;  %vm9195_vm14 = vnez %v9194_v60 }
 0x1b1   : > { %9181 = vst [vmem:[#allocation19_spill] sm:$0xff] %v9180_v26  ;;  %6395 = vmatpush3.bf16.msk.msra.mxu0 %vm9183_vm10, %v9094_v23  ;;  %6427 = vmatpush3.bf16.msk.msra.mxu1 %vm9183_vm10, %v9094_v23  ;;  %vm9186_vm10 = vmmov %vm9184_vm6 }
 0x1b2   : > { %5716 = vmatmul.mubr.msk.f32.gmra.mrb[56].mxu1 %vm9174_vm7, %v5644_v34 }
 0x1b3   : > { %1724 = vmatprep.mubr.f32.mxu1 %v9026_v7 }
 0x1b6   : > { %5717 = vmatmul.mubr.msk.f32.gmra.mrb[58].mxu1 %vm9174_vm7, %v5645_v24  ;;  %vm9185_vm7 = vmmov %vm9184_vm6  ;;  %v1100_v24 = vpop.permute.xlu0 %1099 }
 0x1b7   : > { %1730 = vmatprep.mubr.f32.mxu1 %v9026_v7 }
 0x1ba   : > { %5718 = vmatmul.mubr.msk.f32.gmra.mrb[60].mxu1 %vm9184_vm6, %v5646_v51  ;;  %vm9188_vm6 = vnez %v9187_v35 }
 0x1bb   : > { %1736 = vmatprep.mubr.f32.mxu1 %v9026_v7 }
 0x1be   : > { %5719 = vmatmul.mubr.msk.f32.gmra.mrb[62].mxu1 %vm9185_vm7, %v5647_v14  ;;  %vm9190_vm7 = vnez %v9189_v36  ;;  %v1105_v14 = vpop.permute.xlu1 %1104 }
 0x1bf   : > { %1742 = vmatprep.mubr.f32.mxu1 %v9026_v7  ;;  %vm7855_vm0 = vmpackc.low %vm9190_vm7, %vm9188_vm6  ;;  %vm1148_vm7 = vcmp.eq.f32.partialorder %v1075_v40, %v9135_v57 }
 0x1c0   : > { %v9192_v53 = vsel %vm7855_vm0, 4294967295, %v9191_v53  ;;  %6429 = vmatprep.subr.msk.bf16.mxu1 %vm7855_vm0, %v9094_v23  ;;  %6397 = vmatprep.subr.msk.bf16.mxu0 %vm7855_vm0, %v9094_v23  ;;  %vm9196_vm6 = vmmov %vm9186_vm10  ;;  %v5652_v61 = vsel %vm1148_vm7, 1.0, %v9026_v7  ;;  %vm9202_vm7 = vnez %v9201_v47 }
 0x1c1   : > { %9193 = vst [vmem:[#allocation22_spill] sm:$0xff] %v9192_v53  ;;  %6399 = vmatpush3.bf16.msk.msra.mxu0 %vm9195_vm14, %v9094_v23  ;;  %6431 = vmatpush3.bf16.msk.msra.mxu1 %vm9195_vm14, %v9094_v23  ;;  %vm9198_vm14 = vmmov %vm9196_vm6 }
 0x1c2   : > { %5720 = vmatmul.mubr.msk.f32.gmra.mrb[64].mxu1 %vm9186_vm10, %v5648_v54 }
 0x1c3   : > { %1748 = vmatprep.mubr.f32.mxu1 %v9026_v7 }
 0x1c6   : > { %5721 = vmatmul.mubr.msk.f32.gmra.mrb[66].mxu1 %vm9186_vm10, %v5649_v0  ;;  %vm9197_vm10 = vmmov %vm9196_vm6  ;;  %v1110_v0 = vpop.permute.xlu0 %1109 }
 0x1c7   : > { %1754 = vmatprep.mubr.f32.mxu1 %v9026_v7 }
 0x1ca   : > { %5722 = vmatmul.mubr.msk.f32.gmra.mrb[68].mxu1 %vm9196_vm6, %v5650_v49  ;;  %vm9200_vm6 = vnez %v9199_v63  ;;  %v1115_v49 = vpop.permute.xlu1 %1114  ;;  %v1120_v18 = vpop.permute.xlu0 %1119 }
 0x1cb   : > { %1760 = vmatprep.mubr.f32.mxu1 %v9026_v7 }
 0x1ce   : > { %5723 = vmatmul.mubr.msk.f32.gmra.mrb[70].mxu1 %vm9197_vm10, %v5651_v16  ;;  %vm7895_vm10 = vmpackc.low %vm9202_vm7, %vm9200_vm6  ;;  %vm1151_vm6 = vcmp.eq.f32.partialorder %v1090_v28, %v9135_v57  ;;  %vm9209_vm7 = vnez %v9208_v31  ;;  %v1125_v47 = vpop.permute.xlu1 %1124 }
 0x1cf   : > { %1766 = vmatprep.mubr.f32.mxu1 %v9026_v7  ;;  %v9204_v4 = vsel %vm7895_vm10, 4294967295, %v9203_v4  ;;  %6433 = vmatprep.subr.msk.bf16.mxu1 %vm7895_vm10, %v9094_v23  ;;  %v5655_v32 = vsel %vm1151_vm6, 1.0, %v9026_v7  ;;  %vm7948_vm6 = vmpackc.low %vm7405_vm4, %vm7383_vm5  ;;  %vm9224_vm5 = vnez %v9223_v22  ;;  %vm1153_vm4 = vcmp.eq.f32.partialorder %v1100_v24, %v9135_v57 }
 0x1d0   : > { %9205 = vst [vmem:[#allocation23_spill] sm:$0xff] %v9204_v4  ;;  %6401 = vmatprep.subr.msk.bf16.mxu0 %vm7895_vm10, %v9094_v23  ;;  %6435 = vmatpush3.bf16.msk.msra.mxu1 %vm9207_vm12, %v9094_v23  ;;  %v9220_v3 = vsel %vm7948_vm6, 4294967295, %v9219_v3  ;;  %v5657_v42 = vsel %vm1153_vm4, 1.0, %v9026_v7  ;;  %vm1155_vm4 = vcmp.eq.f32.partialorder %v1110_v0, %v9135_v57 }
 0x1d1   : > { %6403 = vmatpush3.bf16.msk.msra.mxu0 %vm9207_vm12, %v9094_v23  ;;  %vm9216_vm12 = vnez %v9215_v39  ;;  %9221 = vst [vmem:[#allocation27_spill] sm:$0xff] %v9220_v3  ;;  %v5659_v56 = vsel %vm1155_vm4, 1.0, %v9026_v7  ;;  %vm1157_vm4 = vcmp.eq.f32.partialorder %v1120_v18, %v9135_v57 }
 0x1d2   : > { %5724 = vmatmul.mubr.msk.f32.gmra.mrb[72].mxu1 %vm9198_vm14, %v5652_v61  ;;  %v5661_v63 = vsel %vm1157_vm4, 1.0, %v9026_v7  ;;  %vm9228_vm4 = vmmov %vm9214_vm3 }
 0x1d3   : > { %v7885_v58 = vpop.f32.mrb[4].mxu0  ;;  %1772 = vmatprep.mubr.f32.mxu1 %v9026_v7 }
 0x1d4   : > { %v7889_v30 = vpop.f32.mrb[5].mxu0 }
 0x1d6   : > { %5725 = vmatmul.mubr.msk.f32.gmra.mrb[74].mxu1 %vm9198_vm14, %v5653_v8  ;;  %vm7923_vm14 = vmpackc.low %vm7379_vm8, %vm9209_vm7  ;;  %vm1152_vm8 = vcmp.eq.f32.partialorder %v1095_v46, %v9135_v57 }
 0x1d7   : > { %v7910_v11 = vpop.f32.mrb[6].mxu0  ;;  %1778 = vmatprep.mubr.f32.mxu1 %v9026_v7  ;;  %v9212_v38 = vsel %vm7923_vm14, 4294967295, %v9211_v38  ;;  %6437 = vmatprep.subr.msk.bf16.mxu1 %vm7923_vm14, %v9094_v23  ;;  %vm9222_vm7 = vmmov %vm9214_vm3  ;;  %v5656_v27 = vsel %vm1152_vm8, 1.0, %v9026_v7  ;;  %vm1154_vm8 = vcmp.eq.f32.partialorder %v1105_v14, %v9135_v57 }
 0x1d8   : > { %v7917_v48 = vpop.f32.mrb[7].mxu0  ;;  %9213 = vst [vmem:[#allocation26_spill] sm:$0xff] %v9212_v38  ;;  %6439 = vmatpush3.bf16.msk.msra.mxu1 %vm9216_vm12, %v9094_v23  ;;  %6405 = vmatprep.subr.msk.bf16.mxu0 %vm7923_vm14, %v9094_v23  ;;  %v5658_v6 = vsel %vm1154_vm8, 1.0, %v9026_v7  ;;  %vm9226_vm8 = vmmov %vm9214_vm3 }
 0x1d9   : > { %6407 = vmatpush3.bf16.msk.msra.mxu0 %vm9216_vm12, %v9094_v23  ;;  %6441 = vmatprep.subr.msk.bf16.mxu1 %vm7948_vm6, %v9094_v23 }
 0x1da   : > { %5726 = vmatmul.mubr.msk.f32.gmra.mrb[76].mxu1 %vm9214_vm3, %v5654_v45  ;;  %6409 = vmatprep.subr.msk.bf16.mxu0 %vm7948_vm6, %v9094_v23 }
 0x1db   : > { %v7932_v52 = vpop.f32.mrb[8].mxu0  ;;  %1784 = vmatprep.mubr.f32.mxu1 %v9026_v7 }
 0x1dc   : > { %v7939_v21 = vpop.f32.mrb[9].mxu0  ;;  %6443 = vmatpush3.bf16.msk.msra.mxu1 %vm9224_vm5, %v9094_v23 }
 0x1dd   : > { %6290 = vmatprep.subr.mxu1 %v9026_v7  ;;  %6411 = vmatpush3.bf16.msk.msra.mxu0 %vm9224_vm5, %v9094_v23  ;;  %vm9303_vm5 = vcmask 1041408  }
 0x1de   : > { %5727 = vmatmul.mubr.msk.f32.gmra.mrb[78].mxu1 %vm9222_vm7, %v5655_v32  ;;  %vm9225_vm7 = vmmov %vm9214_vm3 }
 0x1df   : > { %v7960_v55 = vpop.f32.mrb[10].mxu0  ;;  %1790 = vmatprep.mubr.f32.mxu1 %v9026_v7 }
 0x1e0   : > { %v7967_v51 = vpop.f32.mrb[11].mxu0 }
 0x1e2   : > { %5728 = vmatmul.mubr.msk.f32.gmra.mrb[80].mxu1 %vm9214_vm3, %v5656_v27 }
 0x1e3   : > { %v7978_v44 = vpop.f32.mrb[12].mxu0  ;;  %1796 = vmatprep.mubr.f32.mxu1 %v9026_v7 }
 0x1e4   : > { %v7982_v54 = vpop.f32.mrb[13].mxu0 }
 0x1e6   : > { %5729 = vmatmul.mubr.msk.f32.gmra.mrb[82].mxu1 %vm9225_vm7, %v5657_v42  ;;  %vm1156_vm7 = vcmp.eq.f32.partialorder %v1115_v49, %v9135_v57 }
 0x1e7   : > { %v7986_v35 = vpop.f32.mrb[14].mxu0  ;;  %1802 = vmatprep.mubr.f32.mxu1 %v9026_v7  ;;  %v5660_v61 = vsel %vm1156_vm7, 1.0, %v9026_v7  ;;  %vm9227_vm7 = vmmov %vm9214_vm3 }
 0x1e8   : > { %v7990_v36 = vpop.f32.mrb[15].mxu0 }
 0x1ea   : > { %5730 = vmatmul.mubr.msk.f32.gmra.mrb[84].mxu1 %vm9214_vm3, %v5658_v6 }
 0x1eb   : > { %v7994_v16 = vpop.f32.mrb[16].mxu0  ;;  %1808 = vmatprep.mubr.f32.mxu1 %v9026_v7 }
 0x1ec   : > { %v7998_v40 = vpop.f32.mrb[17].mxu0 }
 0x1ee   : > { %5731 = vmatmul.mubr.msk.f32.gmra.mrb[86].mxu1 %vm9226_vm8, %v5659_v56  ;;  %vm1158_vm8 = vcmp.eq.f32.partialorder %v1125_v47, %v9135_v57 }
 0x1ef   : > { %v8002_v8 = vpop.f32.mrb[18].mxu0  ;;  %1814 = vmatprep.mubr.f32.mxu1 %v9026_v7  ;;  %v5662_v31 = vsel %vm1158_vm8, 1.0, %v9026_v7  ;;  %vm8918_vm8 = vcmask 1041408  }
 0x1f0   : > { %v8006_v33 = vpop.f32.mrb[19].mxu0 }
 0x1f2   : > { %5732 = vmatmul.mubr.msk.f32.gmra.mrb[88].mxu1 %vm9214_vm3, %v5660_v61 }
 0x1f3   : > { %v8010_v28 = vpop.f32.mrb[20].mxu0  ;;  %1820 = vmatprep.mubr.f32.mxu1 %v9026_v7 }
 0x1f4   : > { %v8014_v45 = vpop.f32.mrb[21].mxu0 }
 0x1f6   : > { %5733 = vmatmul.mubr.msk.f32.gmra.mrb[90].mxu1 %vm9227_vm7, %v5661_v63  ;;  %vm9262_vm7 = vcmp.eq.f32.partialorder %v7445_v10, %v6822_v9 }
 0x1f7   : > { %v8018_v12 = vpop.f32.mrb[22].mxu0  ;;  %1826 = vmatprep.mubr.f32.mxu1 %v9026_v7 }
 0x1f8   : > { %v8021_v32 = vpop.f32.mrb[23].mxu0 }
 0x1fa   : > { %5734 = vmatmul.mubr.msk.f32.gmra.mrb[92].mxu1 %vm9228_vm4, %v5662_v31  ;;  %vm9263_vm4 = vcmp.eq.f32.partialorder %v7438_v5, %v6822_v9 }
 0x1fb   : > { %v8024_v46 = vpop.f32.mrb[24].mxu0 }
 0x1fc   : > { %v8026_v34 = vpop.f32.mrb[25].mxu0 }
 0x1ff   : > { %v8028_v50 = vpop.f32.mrb[26].mxu0 }
 0x200   : > { %v8030_v57 = vpop.f32.mrb[27].mxu0 }
 0x203   : > { %v8032_v24 = vpop.f32.mrb[28].mxu0 }
 0x204   : > { %v8034_v27 = vpop.f32.mrb[29].mxu0 }
 0x207   : > { %v8036_v42 = vpop.f32.mrb[30].mxu0 }
 0x208   : > { %v8038_v14 = vpop.f32.mrb[31].mxu0 }
 0x20b   : > { %v8040_v0 = vpop.f32.mrb[32].mxu0 }
 0x20c   : > { %v8042_v6 = vpop.f32.mrb[33].mxu0 }
 0x20f   : > { %v8044_v56 = vpop.f32.mrb[34].mxu0 }
 0x210   : > { %v8046_v49 = vpop.f32.mrb[35].mxu0 }
 0x213   : > { %v8048_v18 = vpop.f32.mrb[36].mxu0 }
 0x214   : > { %v8050_v61 = vpop.f32.mrb[37].mxu0 }
 0x217   : > { %v8052_v63 = vpop.f32.mrb[38].mxu0 }
 0x218   : > { %v8054_v47 = vpop.f32.mrb[39].mxu0 }
 0x21b   : > { %v8056_v31 = vpop.f32.mrb[40].mxu0 }
 0x21c   : > { %9229 = vst [vmem:[#allocation30_spill] sm:$0xff] %v8056_v31  ;;  %v8058_v22 = vpop.f32.mrb[41].mxu0 }
 0x21d   : > { %9230 = vst [vmem:[#allocation31_spill] sm:$0xff] %v8058_v22 }
 0x21f   : > { %v8060_v3 = vpop.f32.mrb[42].mxu0 }
 0x220   : > { %9231 = vst [vmem:[#allocation34_spill] sm:$0xff] %v8060_v3  ;;  %v8062_v39 = vpop.f32.mrb[43].mxu0 }
 0x221   : > { %9232 = vst [vmem:[#allocation35_spill] sm:$0xff] %v8062_v39 }
 0x223   : > { %v8064_v38 = vpop.f32.mrb[44].mxu0 }
 0x224   : > { %9233 = vst [vmem:[#allocation38_spill] sm:$0xff] %v8064_v38  ;;  %v8066_v37 = vpop.f32.mrb[45].mxu0 }
 0x225   : > { %9234 = vst [vmem:[#allocation39_spill] sm:$0xff] %v8066_v37 }
 0x227   : > { %v8068_v4 = vpop.f32.mrb[46].mxu0 }
 0x228   : > { %9235 = vst [vmem:[#allocation43_spill] sm:$0xff] %v8068_v4  ;;  %v8070_v60 = vpop.f32.mrb[47].mxu0 }
 0x229   : > { %9236 = vst [vmem:[#allocation44_spill] sm:$0xff] %v8070_v60 }
 0x22b   : > { %v8072_v53 = vpop.f32.mrb[48].mxu0 }
 0x22c   : > { %9237 = vst [vmem:[#allocation47_spill] sm:$0xff] %v8072_v53  ;;  %v8074_v1 = vpop.f32.mrb[49].mxu0 }
 0x22d   : > { %9238 = vst [vmem:[#allocation48_spill] sm:$0xff] %v8074_v1 }
 0x22f   : > { %v8076_v26 = vpop.f32.mrb[50].mxu0 }
 0x230   : > { %9239 = vst [vmem:[#allocation5_spill] sm:$0xff] %v8076_v26  ;;  %v8078_v20 = vpop.f32.mrb[51].mxu0 }
 0x231   : > { %9240 = vst [vmem:[#allocation50_spill] sm:$0xff] %v8078_v20 }
 0x233   : > { %v8080_v15 = vpop.f32.mrb[52].mxu0 }
 0x234   : > { %9241 = vst [vmem:[#allocation17_spill] sm:$0xff] %v8080_v15  ;;  %v8082_v41 = vpop.f32.mrb[53].mxu0 }
 0x235   : > { %9242 = vst [vmem:[#allocation20_spill] sm:$0xff] %v8082_v41 }
 0x237   : > { %v8084_v13 = vpop.f32.mrb[54].mxu0 }
 0x238   : > { %9243 = vst [vmem:[#allocation21_spill] sm:$0xff] %v8084_v13  ;;  %v8086_v59 = vpop.f32.mrb[55].mxu0 }
 0x239   : > { %9244 = vst [vmem:[#allocation24_spill] sm:$0xff] %v8086_v59  ;;  %v9257_v59 = vld [vmem:[#allocation2_spill] sm:$0xff] }
 0x23a   : > { %v2063_v41 = vsub.s32 1, %v9257_v59  ;;  %vm2054_vm3 = vcmp.eq.s32.totalorder %v9257_v59, 0  ;;  %v9338_v59 = vld [vmem:[#allocation15_spill] sm:$0xff] }
 0x23b   : > { %v8088_v43 = vpop.f32.mrb[56].mxu0 }
 0x23c   : > { %9245 = vst [vmem:[#allocation25_spill] sm:$0xff] %v8088_v43  ;;  %v8090_v17 = vpop.f32.mrb[57].mxu0 }
 0x23d   : > { %9246 = vst [vmem:[#allocation28_spill] sm:$0xff] %v8090_v17 }
 0x23f   : > { %v8092_v2 = vpop.f32.mrb[58].mxu0 }
 0x240   : > { %9247 = vst [vmem:[#allocation29_spill] sm:$0xff] %v8092_v2  ;;  %v8094_v29 = vpop.f32.mrb[59].mxu0  ;;  %v2053_v2 = vld [vmem:[%s212_s11] sm:$0x3]  ;;  %s223_s11 = scalar_lea.vmem %s8783_s4, %s5551_s8 }
 0x241   : > { %9248 = vst [vmem:[#allocation32_spill] sm:$0xff] %v8094_v29  ;;  %v2055_v43 = vsub.f32 1.0, %v2053_v2  ;;  %v2060_v53 = vrot.slane %v2053_v2, %v7426_v62 }
 0x243   : > { %v8096_v25 = vpop.f32.mrb[60].mxu0  ;;  %v2075_v4 = vrot.slane %v2055_v43, %v2063_v41 }
 0x244   : > { %9249 = vst [vmem:[#allocation33_spill] sm:$0xff] %v8096_v25  ;;  %v8098_v23 = vpop.f32.mrb[61].mxu0 }
 0x245   : > { %9250 = vst [vmem:[#allocation36_spill] sm:$0xff] %v8098_v23 }
 0x247   : > { %v8100_v19 = vpop.f32.mrb[62].mxu0 }
 0x248   : > { %9251 = vst [vmem:[#allocation37_spill] sm:$0xff] %v8100_v19  ;;  %v8102_v15 = vpop.f32.mrb[63].mxu0 }
 0x249   : > { %9252 = vst [vmem:[#allocation40_spill] sm:$0xff] %v8102_v15 }
 0x24b   : > { %v8105_v13 = vpop.f32.mrb[64].mxu0 }
 0x24c   : > { %9253 = vst [vmem:[#allocation41_spill] sm:$0xff] %v8105_v13  ;;  %v8112_v17 = vpop.f32.mrb[65].mxu0 }
 0x24d   : > { %9254 = vst [vmem:[#allocation45_spill] sm:$0xff] %v8112_v17  ;;  %v2071_v17 = vrot.slane %v2055_v43, %v7426_v62 }
 0x24f   : > { %v8114_v29 = vpop.f32.mrb[66].mxu0  ;;  %v2078_v39 = vsel %vm2054_vm3, %v2060_v53, %v2071_v17 }
 0x250   : > { %9255 = vst [vmem:[#allocation46_spill] sm:$0xff] %v8114_v29  ;;  %v8116_v25 = vpop.f32.mrb[67].mxu0 }
 0x251   : > { %9256 = vst [vmem:[#allocation49_spill] sm:$0xff] %v8116_v25  ;;  %v1642_v23 = vpop.f32.mrb[30].mxu1  ;;  %v2064_v25 = vrot.slane %v2053_v2, %v2063_v41 }
 0x252   : > { %v1833_v19 = vmul.f32 %v1642_v23, %v7885_v58  ;;  %v1644_v15 = vpop.f32.mrb[31].mxu1 }
 0x253   : > { %v1834_v13 = vmul.f32 %v1644_v15, %v7889_v30  ;;  %v1975_v20 = vpop.f32.mrb[68].mxu0 }
 0x254   : > { %v1977_v26 = vpop.f32.mrb[69].mxu0 }
 0x255   : > { %v1648_v1 = vpop.f32.mrb[32].mxu1 }
 0x256   : > { %v1835_v29 = vmul.f32 %v1648_v1, %v7910_v11  ;;  %v1650_v60 = vpop.f32.mrb[33].mxu1  ;;  %v2079_v1 = vsel %vm2054_vm3, %v2064_v25, %v2075_v4 }
 0x257   : > { %v1836_v23 = vmul.f32 %v1650_v60, %v7917_v48  ;;  %v2046_v58 = vpop.f32.mrb[70].mxu0 }
 0x258   : > { %v8126_v37 = vpack.c.bf16 %v1835_v29, %v1833_v19  ;;  %v2051_v15 = vmul.f32 %v2046_v58, %v1975_v20  ;;  %v2048_v30 = vpop.f32.mrb[71].mxu0 }
 0x259   : > { %v8128_v38 = vpack.c.bf16 %v1836_v23, %v1834_v13  ;;  %v2052_v3 = vmul.f32 %v2048_v30, %v1977_v26  ;;  %v1654_v22 = vpop.f32.mrb[34].mxu1 }
 0x25a   : > { %v8131_v31 = vrot.slane %v2051_v15, %v7426_v62  ;;  %v1837_v11 = vmul.f32 %v1654_v22, %v7932_v52  ;;  %v1656_v2 = vpop.f32.mrb[35].mxu1 }
 0x25b   : > { %v8135_v43 = vrot.slane %v2052_v3, %v7426_v62  ;;  %v1838_v29 = vmul.f32 %v1656_v2, %v7939_v21 }
 0x25c   : > { %9258 = vst [vmem:[#allocation57_spill] sm:$0xff] %v8131_v31  ;;  %v8139_v19 = vmul.f32 %v8131_v31, %v2078_v39 }
 0x25d   : > { %9259 = vst [vmem:[#allocation58_spill] sm:$0xff] %v8135_v43  ;;  %v8142_v17 = vmul.f32 %v8135_v43, %v2079_v1  ;;  %v1660_v13 = vpop.f32.mrb[36].mxu1 }
 0x25e   : > { %9260 = vst [vmem:[#allocation59_spill] sm:$0xff] %v8139_v19  ;;  %v1839_v41 = vmul.f32 %v1660_v13, %v7960_v55  ;;  %v1662_v20 = vpop.f32.mrb[37].mxu1  ;;  %v2098_v25 = vsel %vm8918_vm8, %v8139_v19, 0.0 }
 0x25f   : > { %9261 = vst [vmem:[#allocation60_spill] sm:$0xff] %v8142_v17  ;;  %v1840_v26 = vmul.f32 %v1662_v20, %v7967_v51  ;;  %2257 = vmatprep.mubr.f32.mxu1 %v8142_v17  ;;  %v2105_v53 = vsel %vm8918_vm8, %v8142_v17, 0.0  ;;  %v2099_v60 = vrot.slane %v2098_v25, 4  ;;  %vm8921_vm8 = vcmask 1043456  }
 0x260   : > { %v8151_v4 = vpack.c.bf16 %v1839_v41, %v1837_v11  ;;  %2258 = vmatmul.mubr.f32.vlgmr.msra.gmra.mrb[94].mxu1 %v8139_v19  ;;  %v2106_v48 = vrot.slane %v2105_v53, 4 }
 0x261   : > { %v8154_v52 = vpack.c.bf16 %v1840_v26, %v1838_v29  ;;  %v1666_v39 = vpop.f32.mrb[38].mxu1  ;;  %v2100_v21 = vadd.f32 %v2099_v60, %v2098_v25 }
 0x262   : > { %v1841_v3 = vmul.f32 %v1666_v39, %v7978_v44  ;;  %v1668_v55 = vpop.f32.mrb[39].mxu1  ;;  %v2107_v22 = vadd.f32 %v2106_v48, %v2105_v53 }
 0x263   : > { %v1842_v51 = vmul.f32 %v1668_v55, %v7982_v54  ;;  %v2101_v23 = vrot.slane %v2100_v21, 2 }
 0x264   : > { %v2108_v58 = vrot.slane %v2107_v22, 2 }
 0x265   : > { %v1672_v15 = vpop.f32.mrb[40].mxu1  ;;  %v2102_v30 = vadd.f32 %v2101_v23, %v2100_v21  ;;  %v9264_v23 = vld [vmem:[#allocation3_spill] sm:$0xff] }
 0x266   : > { %v1843_v1 = vmul.f32 %v1672_v15, %v7986_v35  ;;  %v1674_v11 = vpop.f32.mrb[41].mxu1  ;;  %v2109_v2 = vadd.f32 %v2108_v58, %v2107_v22  ;;  %vm9265_vm3 = vcmp.eq.f32.partialorder %v7445_v10, %v9264_v23 }
 0x267   : > { %v1844_v13 = vmul.f32 %v1674_v11, %v7990_v36  ;;  %v2103_v29 = vrot.slane %v2102_v30, 1  ;;  %v8170_v36 = vsel %vm9262_vm7, 1.0, %v9026_v7  ;;  %v8186_v58 = vsel %vm9265_vm3, 1.0, %v9026_v7 }
 0x268   : > { %v8160_v41 = vpack.c.bf16 %v1843_v1, %v1841_v3  ;;  %v2110_v20 = vrot.slane %v2109_v2, 1  ;;  %v8176_v3 = vsel %vm9263_vm4, 1.0, %v9026_v7  ;;  %vm9266_vm7 = vcmp.eq.f32.partialorder %v7438_v5, %v9264_v23 }
 0x269   : > { %v8162_v25 = vpack.c.bf16 %v1844_v13, %v1842_v51  ;;  %v1678_v44 = vpop.f32.mrb[42].mxu1  ;;  %v2104_v26 = vadd.f32 %v2103_v29, %v2102_v30  ;;  %v8198_v10 = vsel %vm9266_vm7, 1.0, %v9026_v7  ;;  %vm8922_vm4 = vmmov 0  }
 0x26a   : > { %v1845_v54 = vmul.f32 %v1678_v44, %v7994_v16  ;;  %v1680_v53 = vpop.f32.mrb[43].mxu1  ;;  %v2111_v60 = vadd.f32 %v2110_v20, %v2109_v2  ;;  %6292 = vmatprep.mubr.msk.f32.mxu1 %vm8922_vm4, %v9026_v7  ;;  %vm9301_vm3 = vcmask 130048  }
 0x26b   : > { %v1846_v48 = vmul.f32 %v1680_v53, %v7998_v40  ;;  %v2112_v39 = vmul.f32 0.5, %v2104_v26  ;;  %vm9302_vm7 = vmmov %vm9301_vm3 }
 0x26c   : > { %v2113_v35 = vmul.f32 0.5, %v2111_v60 }
 0x26d   : > { %v1684_v21 = vpop.f32.mrb[44].mxu1  ;;  %v2114_v51 = vmul.f32 %v8176_v3, %v2112_v39  ;;  %v2116_v2 = vmul.f32 %v8198_v10, %v2112_v39 }
 0x26e   : > { %v1847_v16 = vmul.f32 %v1684_v21, %v8002_v8  ;;  %v1686_v55 = vpop.f32.mrb[45].mxu1  ;;  %v2115_v40 = vmul.f32 %v8170_v36, %v2113_v35  ;;  %v2117_v9 = vmul.f32 %v8186_v58, %v2113_v35 }
 0x26f   : > { %v1848_v22 = vmul.f32 %v1686_v55, %v8006_v33 }
 0x270   : > { %v8188_v15 = vpack.c.bf16 %v1847_v16, %v1845_v54  ;;  %2182 = vmatprep.mubr.f32.mxu0 %v2115_v40 }
 0x271   : > { %v8191_v30 = vpack.c.bf16 %v1848_v22, %v1846_v48  ;;  %v1690_v8 = vpop.f32.mrb[46].mxu1  ;;  %2183 = vmatmul.mubr.f32.vlgmr.msra.gmra.mrb[72].mxu0 %v2114_v51 }
 0x272   : > { %v1849_v1 = vmul.f32 %v1690_v8, %v8010_v28  ;;  %v1692_v33 = vpop.f32.mrb[47].mxu1  ;;  %2187 = vmatprep.mubr.f32.mxu0 %v2117_v9 }
 0x273   : > { %v1850_v11 = vmul.f32 %v1692_v33, %v8014_v45 }
 0x275   : > { %v1696_v13 = vpop.f32.mrb[48].mxu1  ;;  %2188 = vmatmul.mubr.f32.gmra.mrb[74].mxu0 %v2116_v2 }
 0x276   : > { %v1851_v29 = vmul.f32 %v1696_v13, %v8018_v12  ;;  %v1698_v20 = vpop.f32.mrb[49].mxu1  ;;  %6258 = vmatprep.mubr.msk.f32.mxu0 %vm8922_vm4, %v9026_v7 }
 0x277   : > { %v1852_v44 = vmul.f32 %v1698_v20, %v8021_v32 }
 0x278   : > { %v8204_v28 = vpack.c.bf16 %v1851_v29, %v1849_v1 }
 0x279   : > { %v8206_v26 = vpack.c.bf16 %v1852_v44, %v1850_v11  ;;  %v1702_v54 = vpop.f32.mrb[50].mxu1 }
 0x27a   : > { %v1853_v5 = vmul.f32 %v1702_v54, %v8024_v46  ;;  %v1704_v53 = vpop.f32.mrb[51].mxu1 }
 0x27b   : > { %v1854_v60 = vmul.f32 %v1704_v53, %v8026_v34  ;;  %v9267_v53 = vld [vmem:[#allocation30_spill] sm:$0xff] }
 0x27d   : > { %v1708_v45 = vpop.f32.mrb[52].mxu1 }
 0x27e   : > { %v1855_v48 = vmul.f32 %v1708_v45, %v8028_v50  ;;  %v1710_v39 = vpop.f32.mrb[53].mxu1 }
 0x27f   : > { %v1856_v35 = vmul.f32 %v1710_v39, %v8030_v57 }
 0x280   : > { %v8212_v12 = vpack.c.bf16 %v1855_v48, %v1853_v5  ;;  %v9268_v48 = vld [vmem:[#allocation31_spill] sm:$0xff] }
 0x281   : > { %v8214_v21 = vpack.c.bf16 %v1856_v35, %v1854_v60  ;;  %v1714_v32 = vpop.f32.mrb[54].mxu1  ;;  %v9269_v35 = vld [vmem:[#allocation34_spill] sm:$0xff] }
 0x282   : > { %v1857_v16 = vmul.f32 %v1714_v32, %v8032_v24  ;;  %v1716_v55 = vpop.f32.mrb[55].mxu1 }
 0x283   : > { %v1858_v40 = vmul.f32 %v1716_v55, %v8034_v27 }
 0x285   : > { %v1720_v46 = vpop.f32.mrb[56].mxu1 }
 0x286   : > { %v1859_v22 = vmul.f32 %v1720_v46, %v8036_v42  ;;  %v1722_v34 = vpop.f32.mrb[57].mxu1  ;;  %v9271_v46 = vld [vmem:[#allocation38_spill] sm:$0xff] }
 0x287   : > { %v1860_v51 = vmul.f32 %v1722_v34, %v8038_v14 }
 0x288   : > { %v8220_v50 = vpack.c.bf16 %v1859_v22, %v1857_v16  ;;  %v9270_v16 = vld [vmem:[#allocation35_spill] sm:$0xff] }
 0x289   : > { %v8222_v23 = vpack.c.bf16 %v1860_v51, %v1858_v40  ;;  %v1726_v57 = vpop.f32.mrb[58].mxu1  ;;  %v9272_v51 = vld [vmem:[#allocation39_spill] sm:$0xff] }
 0x28a   : > { %v1861_v9 = vmul.f32 %v1726_v57, %v8040_v0  ;;  %v1728_v8 = vpop.f32.mrb[59].mxu1 }
 0x28b   : > { %v1862_v1 = vmul.f32 %v1728_v8, %v8042_v6  ;;  %v9273_v8 = vld [vmem:[#allocation43_spill] sm:$0xff] }
 0x28d   : > { %v1732_v24 = vpop.f32.mrb[60].mxu1 }
 0x28e   : > { %v1863_v33 = vmul.f32 %v1732_v24, %v8044_v56  ;;  %v1734_v27 = vpop.f32.mrb[61].mxu1 }
 0x28f   : > { %v1864_v11 = vmul.f32 %v1734_v27, %v8046_v49 }
 0x290   : > { %v8228_v42 = vpack.c.bf16 %v1863_v33, %v1861_v9  ;;  %v9274_v33 = vld [vmem:[#allocation44_spill] sm:$0xff] }
 0x291   : > { %v8230_v2 = vpack.c.bf16 %v1864_v11, %v1862_v1  ;;  %v1738_v14 = vpop.f32.mrb[62].mxu1 }
 0x292   : > { %v1865_v13 = vmul.f32 %v1738_v14, %v8048_v18  ;;  %v1740_v29 = vpop.f32.mrb[63].mxu1 }
 0x293   : > { %v1866_v20 = vmul.f32 %v1740_v29, %v8050_v61  ;;  %v9275_v29 = vld [vmem:[#allocation47_spill] sm:$0xff] }
 0x295   : > { %v1744_v0 = vpop.f32.mrb[64].mxu1 }
 0x296   : > { %v1867_v44 = vmul.f32 %v1744_v0, %v8052_v63  ;;  %v1746_v6 = vpop.f32.mrb[65].mxu1 }
 0x297   : > { %v1868_v54 = vmul.f32 %v1746_v6, %v8054_v47 }
 0x298   : > { %v8236_v56 = vpack.c.bf16 %v1867_v44, %v1865_v13  ;;  %v9276_v44 = vld [vmem:[#allocation48_spill] sm:$0xff] }
 0x299   : > { %v8238_v5 = vpack.c.bf16 %v1868_v54, %v1866_v20  ;;  %v1750_v49 = vpop.f32.mrb[66].mxu1 }
 0x29a   : > { %v1869_v60 = vmul.f32 %v1750_v49, %v9267_v53  ;;  %v1752_v45 = vpop.f32.mrb[67].mxu1  ;;  %v9277_v49 = vld [vmem:[#allocation5_spill] sm:$0xff] }
 0x29b   : > { %v1870_v39 = vmul.f32 %v1752_v45, %v9268_v48  ;;  %v9278_v45 = vld [vmem:[#allocation50_spill] sm:$0xff] }
 0x29d   : > { %v1756_v18 = vpop.f32.mrb[68].mxu1 }
 0x29e   : > { %v1871_v32 = vmul.f32 %v1756_v18, %v9269_v35  ;;  %v1758_v61 = vpop.f32.mrb[69].mxu1 }
 0x29f   : > { %v1872_v55 = vmul.f32 %v1758_v61, %v9270_v16 }
 0x2a0   : > { %v8244_v63 = vpack.c.bf16 %v1871_v32, %v1869_v60  ;;  %v9279_v32 = vld [vmem:[#allocation17_spill] sm:$0xff] }
 0x2a1   : > { %v8246_v40 = vpack.c.bf16 %v1872_v55, %v1870_v39  ;;  %v1762_v47 = vpop.f32.mrb[70].mxu1  ;;  %v9280_v55 = vld [vmem:[#allocation20_spill] sm:$0xff] }
 0x2a2   : > { %v1873_v22 = vmul.f32 %v1762_v47, %v9271_v46  ;;  %v1764_v34 = vpop.f32.mrb[71].mxu1 }
 0x2a3   : > { %v1874_v57 = vmul.f32 %v1764_v34, %v9272_v51 }
 0x2a5   : > { %v1768_v9 = vpop.f32.mrb[72].mxu1 }
 0x2a6   : > { %v1875_v1 = vmul.f32 %v1768_v9, %v9273_v8  ;;  %v1770_v24 = vpop.f32.mrb[73].mxu1 }
 0x2a7   : > { %v1876_v27 = vmul.f32 %v1770_v24, %v9274_v33  ;;  %v9283_v33 = vld [vmem:[#allocation25_spill] sm:$0xff] }
 0x2a8   : > { %v8252_v11 = vpack.c.bf16 %v1875_v1, %v1873_v22  ;;  %v9281_v22 = vld [vmem:[#allocation21_spill] sm:$0xff] }
 0x2a9   : > { %v8254_v14 = vpack.c.bf16 %v1876_v27, %v1874_v57  ;;  %v1774_v13 = vpop.f32.mrb[74].mxu1  ;;  %v9282_v57 = vld [vmem:[#allocation24_spill] sm:$0xff] }
 0x2aa   : > { %v1877_v20 = vmul.f32 %v1774_v13, %v9275_v29  ;;  %v1776_v0 = vpop.f32.mrb[75].mxu1  ;;  %v9284_v29 = vld [vmem:[#allocation28_spill] sm:$0xff] }
 0x2ab   : > { %v1878_v6 = vmul.f32 %v1776_v0, %v9276_v44  ;;  %v9285_v44 = vld [vmem:[#allocation29_spill] sm:$0xff] }
 0x2ad   : > { %v1780_v54 = vpop.f32.mrb[76].mxu1 }
 0x2ae   : > { %v1879_v53 = vmul.f32 %v1780_v54, %v9277_v49  ;;  %v1782_v60 = vpop.f32.mrb[77].mxu1  ;;  %v9286_v49 = vld [vmem:[#allocation32_spill] sm:$0xff] }
 0x2af   : > { %v1880_v48 = vmul.f32 %v1782_v60, %v9278_v45 }
 0x2b0   : > { %v8260_v39 = vpack.c.bf16 %v1879_v53, %v1877_v20 }
 0x2b1   : > { %v8262_v18 = vpack.c.bf16 %v1880_v48, %v1878_v6  ;;  %v1786_v35 = vpop.f32.mrb[78].mxu1 }
 0x2b2   : > { %v1881_v61 = vmul.f32 %v1786_v35, %v9279_v32  ;;  %v1788_v16 = vpop.f32.mrb[79].mxu1  ;;  %v9287_v35 = vld [vmem:[#allocation33_spill] sm:$0xff] }
 0x2b3   : > { %v1882_v47 = vmul.f32 %v1788_v16, %v9280_v55  ;;  %v9288_v16 = vld [vmem:[#allocation36_spill] sm:$0xff] }
 0x2b5   : > { %v1792_v46 = vpop.f32.mrb[80].mxu1 }
 0x2b6   : > { %v1883_v34 = vmul.f32 %v1792_v46, %v9281_v22  ;;  %v1794_v51 = vpop.f32.mrb[81].mxu1  ;;  %v9289_v46 = vld [vmem:[#allocation37_spill] sm:$0xff] }
 0x2b7   : > { %v1884_v9 = vmul.f32 %v1794_v51, %v9282_v57  ;;  %v9290_v51 = vld [vmem:[#allocation40_spill] sm:$0xff] }
 0x2b8   : > { %v8268_v8 = vpack.c.bf16 %v1883_v34, %v1881_v61 }
 0x2b9   : > { %v8270_v1 = vpack.c.bf16 %v1884_v9, %v1882_v47  ;;  %v1798_v24 = vpop.f32.mrb[82].mxu1 }
 0x2ba   : > { %v1885_v27 = vmul.f32 %v1798_v24, %v9283_v33  ;;  %v1800_v13 = vpop.f32.mrb[83].mxu1 }
 0x2bb   : > { %v1886_v20 = vmul.f32 %v1800_v13, %v9284_v29 }
 0x2bd   : > { %v1804_v0 = vpop.f32.mrb[84].mxu1 }
 0x2be   : > { %v1887_v6 = vmul.f32 %v1804_v0, %v9285_v44  ;;  %v1806_v54 = vpop.f32.mrb[85].mxu1 }
 0x2bf   : > { %v1888_v53 = vmul.f32 %v1806_v54, %v9286_v49  ;;  %v9295_v54 = vld [vmem:[#allocation46_spill] sm:$0xff] }
 0x2c0   : > { %v8276_v60 = vpack.c.bf16 %v1887_v6, %v1885_v27  ;;  %v9293_v27 = vld [vmem:[#allocation41_spill] sm:$0xff]  ;;  %v8930_v6 = vmov 0.0|0.0  }
 0x2c1   : > { %v8278_v45 = vpack.c.bf16 %v1888_v53, %v1886_v20  ;;  %v1810_v48 = vpop.f32.mrb[86].mxu1  ;;  %v9294_v20 = vld [vmem:[#allocation45_spill] sm:$0xff]  ;;  %6444 = vmatprep.subr.bf16.mxu0 %v8930_v6 }
 0x2c2   : > { %v1889_v32 = vmul.f32 %v1810_v48, %v9287_v35  ;;  %v1812_v61 = vpop.f32.mrb[87].mxu1  ;;  %v9296_v48 = vld [vmem:[#allocation49_spill] sm:$0xff] }
 0x2c3   : > { %v1890_v55 = vmul.f32 %v1812_v61, %v9288_v16 }
 0x2c5   : > { %v1816_v47 = vpop.f32.mrb[88].mxu1 }
 0x2c6   : > { %v1891_v22 = vmul.f32 %v1816_v47, %v9289_v46  ;;  %v1818_v34 = vpop.f32.mrb[89].mxu1 }
 0x2c7   : > { %v1892_v57 = vmul.f32 %v1818_v34, %v9290_v51 }
 0x2c8   : > { %v8284_v9 = vpack.c.bf16 %v1891_v22, %v1889_v32 }
 0x2c9   : > { %v8286_v24 = vpack.c.bf16 %v1892_v57, %v1890_v55  ;;  %v1822_v33 = vpop.f32.mrb[90].mxu1 }
 0x2ca   : > { %9291 = vst [vmem:[#allocation3_spill] sm:$0xff] %v8284_v9  ;;  %v1893_v13 = vmul.f32 %v1822_v33, %v9293_v27  ;;  %v1824_v29 = vpop.f32.mrb[91].mxu1  ;;  %v2090_v33 = vld [vmem:[%s216_s17] sm:$0xf] }
 0x2cb   : > { %9292 = vst [vmem:[#allocation30_spill] sm:$0xff] %v8286_v24  ;;  %v1894_v0 = vmul.f32 %v1824_v29, %v9294_v20 }
 0x2cd   : > { %v1828_v44 = vpop.f32.mrb[92].mxu1 }
 0x2ce   : > { %v1895_v49 = vmul.f32 %v1828_v44, %v9295_v54  ;;  %v1830_v53 = vpop.f32.mrb[93].mxu1 }
 0x2cf   : > { %v1896_v35 = vmul.f32 %v1830_v53, %v9296_v48 }
 0x2d0   : > { %v8297_v32 = vpack.c.bf16 %v1895_v49, %v1893_v13  ;;  %v9299_v13 = vld [vmem:[#allocation42_spill] sm:$0xff] }
 0x2d1   : > { %v8299_v61 = vpack.c.bf16 %v1896_v35, %v1894_v0  ;;  %v8307_v29 = vrot.slane %v9299_v13, %v7426_v62  ;;  %v2338_v35 = vld [vmem:[%s8782_s3 + $0x8] sm:$0xff] }
 0x2d2   : > { %9297 = vst [vmem:[#allocation31_spill] sm:$0xff] %v8297_v32 }
 0x2d3   : > { %9298 = vst [vmem:[#allocation34_spill] sm:$0xff] %v8299_v61  ;;  %9300 = vst [vmem:[#allocation35_spill] sm:$0xff] %v8307_v29  ;;  %v2096_v0 = vmul.f32 %v8307_v29, %v2090_v33 }
 0x333   : > { %v6084_v16 = vpop.f32.mrb[94].mxu1 }
 0x334   : > { %v6085_v55 = vpop.f32.mrb[95].mxu1 }
 0x335   : > { %v6086_v47 = vadd.f32 %v6085_v55, %v6084_v16  ;;  %v2264_v55 = vld [vmem:[%s8782_s3] sm:$0xff] }
 0x337   : > { %v2263_v44 = vmul.f32 %v6086_v47, %v8307_v29 }
 0x344   : > { %v6046_v46 = vpop.f32.mrb[72].mxu0 }
 0x345   : > { %v6047_v22 = vpop.f32.mrb[73].mxu0 }
 0x346   : > { %v6048_v34 = vadd.f32 %v6047_v22, %v6046_v46 }
 0x348   : > { %v6049_v51 = vpop.f32.mrb[74].mxu0 }
 0x349   : > { %v6050_v57 = vpop.f32.mrb[75].mxu0 }
 0x34a   : > { %v6051_v27 = vadd.f32 %v6050_v57, %v6049_v51  ;;  %v2571_v57 = vpop.permute.xlu0 %2570 }
 0x34c   : > { %v6445_v20 = vpack.c.bf16 %v6051_v27, %v6048_v34 }
 0x34e   : > { %6446 = vmatpush3.bf16.msra.mxu0 %v6445_v20 }
 0x34f   : > { %6447 = vmatprep.subr.bf16.mxu0 %v8930_v6 }
 0x351   : > { %6259 = vmatmul.mubr.msk.f32.vlgmr.msra.gmra.mrb[76].mxu0 %vm9301_vm3, %v2096_v0  ;;  %vm8927_vm3 = vcmask 15360  }
 0x352   : > { %6449 = vmatpush3.bf16.msra.mxu0 %v6445_v20  ;;  %6265 = vmatprep.mubr.msk.f32.mxu0 %vm8922_vm4, %v9026_v7 }
 0x353   : > { %6268 = vmatprep.subr.mxu0 %v9026_v7 }
 0x355   : > { %6266 = vmatmul.mubr.msk.f32.vlgmr.msra.gmra.mrb[78].mxu0 %vm9302_vm7, %v2263_v44  ;;  %vm8920_vm7 = vcmask 31744  }
 0x356   : > { %6270 = vmatprep.mubr.msk.f32.mxu0 %vm8922_vm4, %v9026_v7 }
 0x424   : > { %v2334_v62 = vpop.f32.mrb[76].mxu0 }
 0x425   : > { %v6260_v54 = vpop.f32.mrb[77].mxu0  ;;  %v2335_v16 = vadd.f32 %v2334_v62, %v2096_v0 }
 0x428   : > { %v2408_v49 = vpop.f32.mrb[78].mxu0 }
 0x429   : > { %v2409_v53 = vadd.f32 %v2408_v49, %v2263_v44  ;;  %v6267_v48 = vpop.f32.mrb[79].mxu0 }
 0x42a   : > { %v2581_v48 = vld [vmem:[%s8782_s3 + $0x18] sm:$0xff] }
 0x42b   : > { %6269 = vmatpush3.msk.msra.mxu0 %vm9303_vm5, %v2409_v53 }
 0x42c   : > { %6271 = vmatmul.mubr.msk.f32.vlgmr.msra.gmra.mrb[80].mxu0 %vm8927_vm3, %v2338_v35  ;;  %6273 = vmatprep.subr.mxu0 %v9026_v7  ;;  %v2659_v35 = vpop.permute.xlu1 %2658 }
 0x42d   : > { %6274 = vmatpush3.msk.msra.mxu0 %vm8921_vm8, %v2335_v16  ;;  %6275 = vmatprep.mubr.msk.f32.mxu0 %vm8922_vm4, %v9026_v7  ;;  %vm8925_vm8 = vcmask 64512  }
 0x42e   : > { %6450 = vmatprep.subr.bf16.mxu0 %v8930_v6 }
 0x430   : > { %6276 = vmatmul.mubr.msk.f32.vlgmr.msra.gmra.mrb[82].mxu0 %vm8920_vm7, %v2264_v55  ;;  %vm9304_vm7 = vcmask 130048  }
 0x431   : > { %6452 = vmatpush3.bf16.msra.mxu0 %v6445_v20  ;;  %6282 = vmatprep.mubr.msk.f32.mxu0 %vm8922_vm4, %v9026_v7 }
 0x432   : > { %6285 = vmatprep.subr.mxu0 %v9026_v7 }
 0x4ff   : > { %v2485_v47 = vpop.f32.mrb[80].mxu0 }
 0x500   : > { %v6272_v46 = vpop.f32.mrb[81].mxu0 }
 0x503   : > { %v2563_v22 = vpop.f32.mrb[82].mxu0 }
 0x504   : > { %v2564_v34 = vadd.f32 %v2563_v22, %v2485_v47  ;;  %v6277_v51 = vpop.f32.mrb[83].mxu0 }
 0x506   : > { %v2573_v33 = vadd.f32 %v2571_v57, %v2564_v34 }
 0x508   : > { %v2575_v27 = vmin.f32 %v2573_v33, 0.0  ;;  %vm2574_vm5 = vcmp.gt.f32.partialorder %v2573_v33, 0.0 }
 0x50a   : > { %v2576_v13 = vmul.f32 1.442695, %v2575_v27  ;;  %v2742_v27 = vld [vmem:[%s8782_s3 + $0x28] sm:$0x3f] }
 0x50c   : > { %6716 = vpow2.f32 %v2576_v13  ;;  %v2747_v13 = vpop.permute.xlu0 %2746 }
 0x516   : > { %v6717_v0 = vpop.eup %6716 }
 0x517   : > { %v5817_v44 = vadd.f32 -1.0, %v6717_v0 }
 0x519   : > { %v2579_v62 = vsel %vm2574_vm5, %v2573_v33, %v5817_v44  ;;  %vm8924_vm5 = vcmask 1045504  }
 0x51a   : > { %v2580_v20 = vmul.f32 %v2579_v62, %v8307_v29 }
 0x51c   : > { %6283 = vmatmul.mubr.msk.f32.vlgmr.msra.gmra.mrb[84].mxu0 %vm9304_vm7, %v2580_v20 }
 0x51d   : > { %6287 = vmatprep.mubr.msk.f32.mxu0 %vm8922_vm4, %v9026_v7 }
 0x5ef   : > { %v2651_v54 = vpop.f32.mrb[84].mxu0 }
 0x5f0   : > { %v2652_v49 = vadd.f32 %v2651_v54, %v2580_v20  ;;  %v6284_v53 = vpop.f32.mrb[85].mxu0  ;;  %v2823_v54 = vld [vmem:[%s8782_s3 + $0x40] sm:$0xff] }
 0x5f1   : > { %v9306_v53 = vmov 1.0|1.0  }
 0x5f2   : > { %6286 = vmatpush3.msra.mxu0 %v2652_v49  ;;  %v2902_v49 = vld [vmem:[%s8782_s3 + $0x48] sm:$0xff] }
 0x5f3   : > { %6288 = vmatmul.mubr.msk.f32.vlgmr.msra.gmra.mrb[86].mxu0 %vm8925_vm8, %v2581_v48  ;;  %6295 = vmatprep.subr.mxu0 %v9026_v7 }
 0x5f4   : > { %6297 = vmatprep.mubr.msk.f32.mxu0 %vm8922_vm4, %v9026_v7 }
 0x6c6   : > { %v2731_v16 = vpop.f32.mrb[86].mxu0 }
 0x6c7   : > { %v2732_v55 = vadd.f32 %v2731_v16, %v2659_v35  ;;  %v6289_v47 = vpop.f32.mrb[87].mxu0 }
 0x6c9   : > { %v2736_v46 = vmin.f32 %v2732_v55, 0.0  ;;  %vm2735_vm7 = vcmp.gt.f32.partialorder %v2732_v55, 0.0 }
 0x6cb   : > { %v2737_v22 = vmul.f32 1.442695, %v2736_v46 }
 0x6cd   : > { %6718 = vpow2.f32 %v2737_v22  ;;  %v9312_v22 = vld [vmem:[#allocation55_spill] sm:$0xff] }
 0x6d7   : > { %v6719_v34 = vpop.eup %6718 }
 0x6d8   : > { %v5820_v51 = vadd.f32 -1.0, %v6719_v34  ;;  %v2976_v34 = vld [vmem:[%s8782_s3 + $0x38] sm:$0xff] }
 0x6da   : > { %v2740_v57 = vsel %vm2735_vm7, %v2732_v55, %v5820_v51  ;;  %vm8926_vm7 = vcmask 48128  }
 0x6db   : > { %v2741_v33 = vmul.f32 %v2740_v57, %v8307_v29  ;;  %v3227_v57 = vld [vmem:[%s8782_s3 + $0x58] sm:$0xff] }
 0x6dd   : > { %6291 = vmatpush3.msra.mxu1 %v2741_v33 }
 0x6de   : > { %6293 = vmatmul.mubr.msk.f32.vlgmr.msra.gmra.mrb[96].mxu1 %vm8925_vm8, %v2742_v27  ;;  %6300 = vmatprep.subr.mxu1 %v9026_v7 }
 0x6df   : > { %6302 = vmatprep.mubr.msk.f32.mxu1 %vm8922_vm4, %v9026_v7  ;;  %vm9309_vm4 = vcmask 1041408  }
 0x6e0   : > { %vm9311_vm8 = vmmov %vm9309_vm4 }
 0x7b1   : > { %v2818_v0 = vpop.f32.mrb[96].mxu1 }
 0x7b2   : > { %v2819_v44 = vadd.f32 %v2818_v0, %v2747_v13  ;;  %v6294_v62 = vpop.f32.mrb[97].mxu1  ;;  %v9319_v13 = vld [vmem:[#allocation8_spill] sm:$0xff]  ;;  %v9321_v0 = vld [vmem:[#allocation18_spill] sm:$0xff] }
 0x7b3   : > { %v9325_v62 = vld [vmem:[#allocation19_spill] sm:$0xff] }
 0x7b4   : > { %v8356_v20 = vmul.f32 %v2819_v44, %v8307_v29  ;;  %v9323_v44 = vld [vmem:[#allocation9_spill] sm:$0xff] }
 0x7b6   : > { %9305 = vst [vmem:[#allocation38_spill] sm:$0xff] %v8356_v20  ;;  %6296 = vmatpush3.msk.msra.mxu0 %vm8924_vm5, %v8356_v20  ;;  %6301 = vmatpush3.msk.msra.mxu1 %vm8924_vm5, %v8356_v20  ;;  %vm9310_vm5 = vcmask 130048  }
 0x7b7   : > { %6298 = vmatmul.mubr.msk.f32.vlgmr.msra.gmra.mrb[88].mxu0 %vm8926_vm7, %v2823_v54  ;;  %6454 = vmatprep.subr.msk.bf16.mxu0 %vm6871_vm11, %v9306_v53  ;;  %v9327_v54 = vld [vmem:[#allocation10_spill] sm:$0xff]  ;;  %vm9339_vm11 = vnez %v9338_v59 }
 0x7b8   : > { %6456 = vmatpush1.bf16.msk.msra.mxu0 %vm6898_vm2, %v9306_v53  ;;  %6303 = vmatmul.mubr.msk.f32.vlgmr.msra.gmra.mrb[98].mxu1 %vm8926_vm7, %v2902_v49  ;;  %vm9313_vm7 = vnez %v9312_v22 }
 0x7b9   : > { %5831 = vmatprep.subr.msk.mxu0 %vm9309_vm4, %v8142_v17  ;;  %3044 = vmatprep.mubr.f32.mxu0 %v9026_v7  ;;  %vm9320_vm4 = vnez %v9319_v13 }
 0x7ba   : > { %3301 = vmatprep.mubr.f32.mxu1 %v9026_v7 }
 0x88a   : > { %v2898_v16 = vpop.f32.mrb[88].mxu0 }
 0x88b   : > { %v6299_v55 = vpop.f32.mrb[89].mxu0  ;;  %5830 = vmatmul.mubr.msk.f32.vlgmr.msra.gmra.mrb[90].mxu0 %vm9310_vm5, %v2898_v16  ;;  %v2972_v47 = vpop.f32.mrb[98].mxu1  ;;  %v9330_v16 = vld [vmem:[#allocation11_spill] sm:$0xff] }
 0x88c   : > { %5832 = vmatpush1.msk.msra.mxu0 %vm9311_vm8, %v8139_v19  ;;  %3124 = vmatprep.mubr.f32.mxu0 %v9026_v7  ;;  %v6304_v46 = vpop.f32.mrb[99].mxu1  ;;  %vm9316_vm8 = vmmov %vm9310_vm5  ;;  %vm9322_vm5 = vnez %v9321_v0  ;;  %v3211_v19 = vpop.permute.xlu1 %3210 }
 0x88d   : > { %6458 = vmatprep.subr.msk.bf16.mxu0 %vm9313_vm7, %v9306_v53  ;;  %vm9331_vm7 = vnez %v9330_v16 }
 0x893   : > { %5833 = vmatmul.mubr.msk.f32.vlgmr.msra.gmra.mrb[90].mxu0 %vm8927_vm3, %v2976_v34  ;;  %vm9324_vm3 = vnez %v9323_v44 }
 0x894   : > { %6460 = vmatpush1.bf16.msk.msra.mxu0 %vm7479_vm13, %v9306_v53  ;;  %3198 = vmatprep.mubr.f32.mxu0 %v9026_v7  ;;  %vm9328_vm13 = vnez %v9327_v54 }
 0x895   : > { %6526 = vmatprep.subr.msk.bf16.mxu0 %vm7711_vm1, %v9306_v53 }
 0x89b   : > { %5838 = vmatmul.mubr.msk.f32.vlgmr.msra.gmra.mrb[90].mxu0 %vm9316_vm8, %v2972_v47  ;;  %vm9326_vm8 = vnez %v9325_v62  ;;  %v9333_v47 = vld [vmem:[#allocation12_spill] sm:$0xff]  ;;  %v9354_v62 = vld [vmem:[#allocation38_spill] sm:$0xff] }
 0x89c   : > { %6528 = vmatpush3.bf16.msk.msra.mxu0 %vm6928_vm9, %v9306_v53  ;;  %vm9334_vm2 = vnez %v9333_v47 }
 0x89d   : > { %6530 = vmatprep.subr.msk.bf16.mxu0 %vm7747_vm15, %v9306_v53 }
 0x8a0   : > { %6532 = vmatpush3.bf16.msk.msra.mxu0 %vm9320_vm4, %v9306_v53 }
 0x8a1   : > { %6534 = vmatprep.subr.msk.bf16.mxu0 %vm9322_vm5, %v9306_v53 }
 0x8a4   : > { %6536 = vmatpush3.bf16.msk.msra.mxu0 %vm9324_vm3, %v9306_v53 }
 0x8a5   : > { %6538 = vmatprep.subr.msk.bf16.mxu0 %vm9326_vm8, %v9306_v53 }
 0x8a8   : > { %6540 = vmatpush3.bf16.msk.msra.mxu0 %vm9328_vm13, %v9306_v53 }
 0x8a9   : > { %6542 = vmatprep.subr.msk.bf16.mxu0 %vm7855_vm0, %v9306_v53 }
 0x8ac   : > { %6544 = vmatpush3.bf16.msk.msra.mxu0 %vm9331_vm7, %v9306_v53 }
 0x8ad   : > { %6546 = vmatprep.subr.msk.bf16.mxu0 %vm7895_vm10, %v9306_v53 }
 0x8b0   : > { %6548 = vmatpush3.bf16.msk.msra.mxu0 %vm9334_vm2, %v9306_v53 }
 0x8b1   : > { %6550 = vmatprep.subr.msk.bf16.mxu0 %vm7923_vm14, %v9306_v53 }
 0x8b4   : > { %6552 = vmatpush3.bf16.msk.msra.mxu0 %vm9216_vm12, %v9306_v53 }
 0x8b5   : > { %6554 = vmatprep.subr.msk.bf16.mxu0 %vm7948_vm6, %v9306_v53 }
 0x8b8   : > { %6556 = vmatpush3.bf16.msk.msra.mxu0 %vm9339_vm11, %v9306_v53 }
 0x8b9   : > { %6558 = vmatprep.subr.msk.bf16.mxu0 %vm7711_vm1, %v9306_v53  ;;  %vm9340_vm1 = vcmask 64512  }
 0x96e   : > { %v3200_v17 = vpop.f32.mrb[90].mxu0 }
 0x96f   : > { %v3213_v51 = vadd.f32 %v3211_v19, %v3200_v17  ;;  %v3202_v22 = vpop.f32.mrb[91].mxu0 }
 0x970   : > { %v3214_v35 = vadd.f32 %v3211_v19, %v3202_v22  ;;  %v3232_v19 = vpop.permute.xlu0 %3231 }
 0x971   : > { %v3217_v48 = vmin.f32 %v3213_v51, 0.0  ;;  %vm3215_vm6 = vcmp.gt.f32.partialorder %v3213_v51, 0.0 }
 0x972   : > { %v3218_v29 = vmin.f32 %v3214_v35, 0.0  ;;  %vm3216_vm11 = vcmp.gt.f32.partialorder %v3214_v35, 0.0 }
 0x973   : > { %v3219_v20 = vmul.f32 1.442695, %v3217_v48 }
 0x974   : > { %v3221_v34 = vmul.f32 1.442695, %v3218_v29 }
 0x975   : > { %6720 = vpow2.f32 %v3219_v20 }
 0x976   : > { %6722 = vpow2.f32 %v3221_v34 }
 0x97f   : > { %v6721_v6 = vpop.eup %6720 }
 0x980   : > { %v6723_v46 = vpop.eup %6722  ;;  %v5839_v47 = vadd.f32 -1.0, %v6721_v6 }
 0x981   : > { %v5840_v59 = vadd.f32 -1.0, %v6723_v46 }
 0x982   : > { %v3225_v17 = vsel %vm3215_vm6, %v3213_v51, %v5839_v47 }
 0x983   : > { %v3226_v55 = vsel %vm3216_vm11, %v3214_v35, %v5840_v59 }
 0x984   : > { %3237 = vmatprep.subr.mxu1 %v3226_v55 }
 0x985   : > { %3238 = vmatpush1.msra.mxu1 %v3225_v17 }
 0x986   : > { %5841 = vmatmul.mubr.msk.f32.vlgmr.msra.gmra.mrb[100].mxu1 %vm9340_vm1, %v3227_v57  ;;  %v3320_v57 = vld [vmem:[%s8782_s3 + $0x68] sm:$0xf] }
 0x987   : > { %3394 = vmatprep.mubr.f32.mxu1 %v9026_v7 }
 0xa59   : > { %v3303_v29 = vpop.f32.mrb[100].mxu1 }
 0xa5a   : > { %v3304_v20 = vadd.f32 %v3303_v29, %v3232_v19  ;;  %v3305_v48 = vpop.f32.mrb[101].mxu1 }
 0xa5b   : > { %v3306_v6 = vadd.f32 %v3305_v48, %v3232_v19  ;;  %v3325_v19 = vpop.permute.xlu1 %3324 }
 0xa5c   : > { %v3310_v22 = vmin.f32 %v3304_v20, 0.0  ;;  %vm3308_vm6 = vcmp.gt.f32.partialorder %v3304_v20, 0.0 }
 0xa5d   : > { %v3311_v46 = vmin.f32 %v3306_v6, 0.0  ;;  %vm3309_vm11 = vcmp.gt.f32.partialorder %v3306_v6, 0.0 }
 0xa5e   : > { %v3312_v34 = vmul.f32 1.442695, %v3310_v22 }
 0xa5f   : > { %v3314_v59 = vmul.f32 1.442695, %v3311_v46 }
 0xa60   : > { %6724 = vpow2.f32 %v3312_v34 }
 0xa61   : > { %6726 = vpow2.f32 %v3314_v59 }
 0xa6a   : > { %v6725_v35 = vpop.eup %6724 }
 0xa6b   : > { %v6727_v16 = vpop.eup %6726  ;;  %v5842_v55 = vadd.f32 -1.0, %v6725_v35 }
 0xa6c   : > { %v5843_v51 = vadd.f32 -1.0, %v6727_v16  ;;  %v9341_v16 = vmov 0.0|0.0  }
 0xa6d   : > { %v3318_v17 = vsel %vm3308_vm6, %v3304_v20, %v5842_v55  ;;  %vm9343_vm6 = vcmask 1043456  }
 0xa6e   : > { %v3319_v47 = vsel %vm3309_vm11, %v3306_v6, %v5843_v51  ;;  %vm9342_vm11 = vmmov 0  }
 0xa6f   : > { %3330 = vmatprep.subr.mxu1 %v3319_v47 }
 0xa70   : > { %3331 = vmatpush1.msra.mxu1 %v3318_v17 }
 0xa71   : > { %5844 = vmatmul.mubr.msk.f32.vlgmr.msra.gmra.mrb[102].mxu1 %vm9340_vm1, %v3320_v57  ;;  %6462 = vmatprep.subr.bf16.mxu1 %v8128_v38  ;;  %vm9344_vm1 = vmmov %vm9343_vm6 }
 0xa72   : > { %6464 = vmatpush1.bf16.msra.mxu1 %v8126_v37 }
 0xa73   : > { %6466 = vmatprep.subr.bf16.mxu1 %v8154_v52 }
 0xa76   : > { %6468 = vmatpush1.bf16.msra.mxu1 %v8151_v4 }
 0xa77   : > { %6470 = vmatprep.subr.bf16.mxu1 %v8162_v25 }
 0xa7a   : > { %6472 = vmatpush1.bf16.msra.mxu1 %v8160_v41 }
 0xa7b   : > { %6474 = vmatprep.subr.bf16.mxu1 %v8191_v30 }
 0xa7e   : > { %6476 = vmatpush1.bf16.msra.mxu1 %v8188_v15 }
 0xa7f   : > { %6478 = vmatprep.subr.bf16.mxu1 %v8206_v26 }
 0xa82   : > { %6480 = vmatpush1.bf16.msra.mxu1 %v8204_v28 }
 0xa83   : > { %6482 = vmatprep.subr.bf16.mxu1 %v8214_v21 }
 0xa86   : > { %6484 = vmatpush1.bf16.msra.mxu1 %v8212_v12 }
 0xa87   : > { %6486 = vmatprep.subr.bf16.mxu1 %v8222_v23 }
 0xa8a   : > { %6488 = vmatpush1.bf16.msra.mxu1 %v8220_v50 }
 0xa8b   : > { %6490 = vmatprep.subr.bf16.mxu1 %v8230_v2 }
 0xa8e   : > { %6492 = vmatpush1.bf16.msra.mxu1 %v8228_v42 }
 0xa8f   : > { %6494 = vmatprep.subr.bf16.mxu1 %v8238_v5 }
 0xa92   : > { %6496 = vmatpush1.bf16.msra.mxu1 %v8236_v56 }
 0xa93   : > { %6498 = vmatprep.subr.bf16.mxu1 %v8246_v40 }
 0xa96   : > { %6500 = vmatpush1.bf16.msra.mxu1 %v8244_v63 }
 0xa97   : > { %6502 = vmatprep.subr.bf16.mxu1 %v8254_v14 }
 0xa9a   : > { %6504 = vmatpush1.bf16.msra.mxu1 %v8252_v11 }
 0xa9b   : > { %6506 = vmatprep.subr.bf16.mxu1 %v8262_v18 }
 0xa9e   : > { %6508 = vmatpush1.bf16.msra.mxu1 %v8260_v39 }
 0xa9f   : > { %6510 = vmatprep.subr.bf16.mxu1 %v8270_v1 }
 0xaa2   : > { %6512 = vmatpush1.bf16.msra.mxu1 %v8268_v8 }
 0xaa3   : > { %6514 = vmatprep.subr.bf16.mxu1 %v8278_v45 }
 0xaa6   : > { %6516 = vmatpush1.bf16.msra.mxu1 %v8276_v60 }
 0xaa7   : > { %6518 = vmatprep.subr.bf16.mxu1 %v8286_v24 }
 0xaaa   : > { %6520 = vmatpush1.bf16.msra.mxu1 %v8284_v9 }
 0xaab   : > { %6522 = vmatprep.subr.bf16.mxu1 %v8299_v61 }
 0xaae   : > { %6524 = vmatpush1.bf16.msra.mxu1 %v8297_v32 }
 0xaaf   : > { %6589 = vmatprep.subr.bf16.mxu1 %v9341_v16 }
 0xb44   : > { %v3396_v29 = vpop.f32.mrb[102].mxu1 }
 0xb45   : > { %v3397_v20 = vadd.f32 %v3396_v29, %v3325_v19  ;;  %v3398_v48 = vpop.f32.mrb[103].mxu1 }
 0xb46   : > { %v3399_v6 = vadd.f32 %v3398_v48, %v3325_v19 }
 0xb47   : > { %v3401_v46 = vmul.f32 %v3397_v20, %v8131_v31 }
 0xb48   : > { %v3402_v22 = vmul.f32 %v3399_v6, %v8135_v43 }
 0xb4a   : > { %3467 = vmatprep.mubr.f32.mxu1 %v3402_v22 }
 0xb4b   : > { %3468 = vmatmul.mubr.f32.vlgmr.msra.gmra.mrb[104].mxu1 %v3401_v46 }
 0xb4c   : > { %6309 = vmatprep.mubr.msk.f32.mxu1 %vm9342_vm11, %v9026_v7 }
 0xc1e   : > { %v3469_v34 = vpop.f32.mrb[104].mxu1 }
 0xc1f   : > { %v8493_v59 = vadd.f32 %v3469_v34, %v3401_v46  ;;  %v3471_v35 = vpop.f32.mrb[105].mxu1 }
 0xc20   : > { %v8495_v55 = vadd.f32 %v3471_v35, %v3402_v22 }
 0xc21   : > { %v3476_v51 = vsel %vm9343_vm6, %v8493_v59, 0.0 }
 0xc22   : > { %v3477_v47 = vrot.slane %v3476_v51, 4  ;;  %v3483_v57 = vsel %vm9344_vm1, %v8495_v55, 0.0 }
 0xc23   : > { %v3484_v17 = vrot.slane %v3483_v57, 4 }
 0xc24   : > { %v3478_v19 = vadd.f32 %v3477_v47, %v3476_v51  ;;  %v9356_v47 = vld [vmem:[#allocation35_spill] sm:$0xff] }
 0xc25   : > { %v3485_v29 = vadd.f32 %v3484_v17, %v3483_v57 }
 0xc26   : > { %v3479_v20 = vrot.slane %v3478_v19, 2 }
 0xc27   : > { %v3486_v48 = vrot.slane %v3485_v29, 2 }
 0xc28   : > { %v3480_v6 = vadd.f32 %v3479_v20, %v3478_v19  ;;  %v3642_v20 = vld [vmem:[%s8782_s3 + $0x78] sm:$0xff] }
 0xc29   : > { %v3487_v31 = vadd.f32 %v3486_v48, %v3485_v29 }
 0xc2a   : > { %v3481_v43 = vrot.slane %v3480_v6, 1 }
 0xc2b   : > { %v3488_v46 = vrot.slane %v3487_v31, 1 }
 0xc2c   : > { %v3482_v34 = vadd.f32 %v3481_v43, %v3480_v6 }
 0xc2d   : > { %v3489_v32 = vadd.f32 %v3488_v46, %v3487_v31 }
 0xc2e   : > { %v3490_v22 = vmul.f32 0.25, %v3482_v34  ;;  %v3715_v34 = vld [vmem:[%s8782_s3 + $0x80] sm:$0xff] }
 0xc2f   : > { %v3491_v35 = vmul.f32 0.25, %v3489_v32 }
 0xc30   : > { %v3492_v9 = vmul.f32 %v8176_v3, %v3490_v22  ;;  %v3494_v31 = vmul.f32 %v8198_v10, %v3490_v22  ;;  %v3945_v3 = vpop.permute.xlu0 %3944 }
 0xc31   : > { %v3493_v61 = vmul.f32 %v8170_v36, %v3491_v35  ;;  %v3495_v24 = vmul.f32 %v8186_v58, %v3491_v35 }
 0xc33   : > { %3560 = vmatprep.mubr.f32.mxu0 %v3493_v61 }
 0xc34   : > { %3561 = vmatmul.mubr.f32.vlgmr.msra.gmra.mrb[92].mxu0 %v3492_v9  ;;  %v9350_v9 = vld [vmem:[#allocation27_spill] sm:$0xff] }
 0xc35   : > { %6560 = vmatpush3.bf16.msk.msra.mxu0 %vm6928_vm9, %v9306_v53  ;;  %3565 = vmatprep.mubr.f32.mxu0 %v3495_v24  ;;  %vm9351_vm9 = vnez %v9350_v9  ;;  %v9352_v24 = vld [vmem:[#allocation15_spill] sm:$0xff] }
 0xc36   : > { %6562 = vmatprep.subr.msk.bf16.mxu0 %vm7747_vm15, %v9306_v53 }
 0xc38   : > { %3566 = vmatmul.mubr.f32.gmra.mrb[94].mxu0 %v3494_v31 }
 0xc39   : > { %6564 = vmatpush3.bf16.msk.msra.mxu0 %vm9320_vm4, %v9306_v53  ;;  %3635 = vmatprep.mubr.f32.mxu0 %v8495_v55  ;;  %vm9363_vm4 = vcmask 64512  }
 0xc3a   : > { %6566 = vmatprep.subr.msk.bf16.mxu0 %vm9322_vm5, %v9306_v53 }
 0xc3d   : > { %6568 = vmatpush3.bf16.msk.msra.mxu0 %vm9324_vm3, %v9306_v53 }
 0xc3e   : > { %6570 = vmatprep.subr.msk.bf16.mxu0 %vm9326_vm8, %v9306_v53  ;;  %vm9364_vm8 = vmmov %vm9363_vm4 }
 0xc41   : > { %6572 = vmatpush3.bf16.msk.msra.mxu0 %vm9328_vm13, %v9306_v53  ;;  %vm9353_vm13 = vnez %v9352_v24 }
 0xc42   : > { %6574 = vmatprep.subr.msk.bf16.mxu0 %vm7855_vm0, %v9306_v53  ;;  %vm9358_vm0 = vcmask 1045504  }
 0xc43   : > { %vm9365_vm6 = vmmov %vm9358_vm0 }
 0xc45   : > { %6576 = vmatpush3.bf16.msk.msra.mxu0 %vm9331_vm7, %v9306_v53 }
 0xc46   : > { %6578 = vmatprep.subr.msk.bf16.mxu0 %vm7895_vm10, %v9306_v53  ;;  %vm9359_vm10 = vcmask 48128  }
 0xc49   : > { %6580 = vmatpush3.bf16.msk.msra.mxu0 %vm9334_vm2, %v9306_v53  ;;  %vm9355_vm2 = vcmask 130048  }
 0xc4a   : > { %6582 = vmatprep.subr.msk.bf16.mxu0 %vm7923_vm14, %v9306_v53  ;;  %vm9357_vm15 = vmmov %vm9355_vm2  ;;  %vm9361_vm14 = vcmask 31744  }
 0xc4b   : > { %vm9362_vm7 = vmmov %vm9355_vm2 }
 0xc4d   : > { %6584 = vmatpush3.bf16.msk.msra.mxu0 %vm9216_vm12, %v9306_v53  ;;  %vm9360_vm12 = vmmov %vm9344_vm1 }
 0xc4e   : > { %6586 = vmatprep.subr.msk.bf16.mxu0 %vm9351_vm9, %v9306_v53  ;;  %vm9366_vm1 = vmmov %vm9358_vm0 }
 0xc4f   : > { %vm9367_vm9 = vmmov %vm9359_vm10 }
 0xc51   : > { %6588 = vmatpush3.bf16.msk.msra.mxu0 %vm9353_vm13, %v9306_v53 }
 0xc52   : > { %6592 = vmatprep.subr.bf16.mxu0 %v9341_v16 }
 0xc54   : > { %3636 = vmatmul.mubr.f32.vlgmr.msra.gmra.mrb[96].mxu0 %v8493_v59 }
 0xc55   : > { %6316 = vmatprep.mubr.msk.f32.mxu0 %vm9342_vm11, %v9026_v7 }
 0xd07   : > { %v6140_v32 = vpop.f32.mrb[92].mxu0 }
 0xd08   : > { %v6141_v61 = vpop.f32.mrb[93].mxu0 }
 0xd09   : > { %v6142_v33 = vadd.f32 %v6141_v61, %v6140_v32 }
 0xd0b   : > { %v6143_v27 = vpop.f32.mrb[94].mxu0 }
 0xd0c   : > { %v6144_v13 = vpop.f32.mrb[95].mxu0 }
 0xd0d   : > { %v6145_v0 = vadd.f32 %v6144_v13, %v6143_v27 }
 0xd0f   : > { %v6590_v44 = vpack.c.bf16 %v6145_v0, %v6142_v33  ;;  %v3955_v0 = vld [vmem:[%s8782_s3 + $0x90] sm:$0xff] }
 0xd11   : > { %6591 = vmatpush3.bf16.msra.mxu1 %v6590_v44  ;;  %6594 = vmatpush3.bf16.msra.mxu0 %v6590_v44 }
 0xd12   : > { %6324 = vmatprep.subr.mxu0 %v9026_v7  ;;  %6319 = vmatprep.subr.mxu1 %v9026_v7 }
 0xd14   : > { %6310 = vmatmul.mubr.msk.f32.vlgmr.msra.gmra.mrb[106].mxu1 %vm9355_vm2, %v9354_v62  ;;  %vm9372_vm2 = vmmov %vm9367_vm9 }
 0xd15   : > { %6321 = vmatprep.mubr.msk.f32.mxu1 %vm9342_vm11, %v9026_v7 }
 0xd27   : > { %v6178_v54 = vpop.f32.mrb[96].mxu0 }
 0xd28   : > { %v6179_v49 = vpop.f32.mrb[97].mxu0 }
 0xd29   : > { %v6180_v51 = vadd.f32 %v6179_v49, %v6178_v54 }
 0xd2b   : > { %v3641_v57 = vmul.f32 %v6180_v51, %v9356_v47 }
 0xd2d   : > { %6317 = vmatmul.mubr.msk.f32.vlgmr.msra.gmra.mrb[98].mxu0 %vm9357_vm15, %v3641_v57  ;;  %vm9373_vm15 = vmmov %vm9360_vm12 }
 0xd2e   : > { %6326 = vmatprep.mubr.msk.f32.mxu0 %vm9342_vm11, %v9026_v7 }
 0xde7   : > { %v3711_v17 = vpop.f32.mrb[106].mxu1 }
 0xde8   : > { %v3712_v19 = vadd.f32 %v3711_v17, %v9354_v62  ;;  %v6311_v29 = vpop.f32.mrb[107].mxu1 }
 0xdea   : > { %6325 = vmatpush3.msk.msra.mxu0 %vm9358_vm0, %v3712_v19  ;;  %vm9374_vm0 = vmmov %vm9362_vm7 }
 0xdeb   : > { %6327 = vmatmul.mubr.msk.f32.vlgmr.msra.gmra.mrb[100].mxu0 %vm9359_vm10, %v3642_v20  ;;  %6336 = vmatprep.subr.mxu0 %v9026_v7  ;;  %vm9375_vm10 = vmmov %vm9360_vm12 }
 0xdec   : > { %6338 = vmatprep.mubr.msk.f32.mxu0 %vm9342_vm11, %v9026_v7 }
 0xe00   : > { %v3785_v48 = vpop.f32.mrb[98].mxu0 }
 0xe01   : > { %v3786_v6 = vadd.f32 %v3785_v48, %v3641_v57  ;;  %v6318_v46 = vpop.f32.mrb[99].mxu0  ;;  %v4115_v48 = vld [vmem:[%s8782_s3 + $0xa0] sm:$0x3f] }
 0xe03   : > { %6320 = vmatpush3.msk.msra.mxu1 %vm9360_vm12, %v3786_v6  ;;  %v4120_v6 = vpop.permute.xlu0 %4119 }
 0xe04   : > { %6322 = vmatmul.mubr.msk.f32.vlgmr.msra.gmra.mrb[108].mxu1 %vm9361_vm14, %v3715_v34  ;;  %6595 = vmatprep.subr.bf16.mxu1 %v9341_v16 }
 0xe05   : > { %6597 = vmatpush3.bf16.msra.mxu1 %v6590_v44  ;;  %6333 = vmatprep.mubr.msk.f32.mxu1 %vm9342_vm11, %v9026_v7  ;;  %v4033_v44 = vpop.permute.xlu1 %4032 }
 0xe06   : > { %6341 = vmatprep.subr.mxu1 %v9026_v7 }
 0xebe   : > { %v3937_v22 = vpop.f32.mrb[100].mxu0 }
 0xebf   : > { %v6328_v35 = vpop.f32.mrb[101].mxu0 }
 0xed7   : > { %v3861_v31 = vpop.f32.mrb[108].mxu1 }
 0xed8   : > { %v3938_v43 = vadd.f32 %v3937_v22, %v3861_v31  ;;  %v6323_v36 = vpop.f32.mrb[109].mxu1  ;;  %v4196_v31 = vld [vmem:[%s8782_s3 + $0xb8] sm:$0xff] }
 0xed9   : > { %v9368_v36 = vld [vmem:[#allocation4_spill] sm:$0xff] }
 0xeda   : > { %v3947_v58 = vadd.f32 %v3945_v3, %v3938_v43  ;;  %v4273_v43 = vld [vmem:[%s8782_s3 + $0xc0] sm:$0xff] }
 0xedc   : > { %v3949_v10 = vmin.f32 %v3947_v58, 0.0  ;;  %vm3948_vm3 = vcmp.gt.f32.partialorder %v3947_v58, 0.0 }
 0xede   : > { %v3950_v9 = vmul.f32 1.442695, %v3949_v10 }
 0xee0   : > { %6728 = vpow2.f32 %v3950_v9 }
 0xeea   : > { %v6729_v24 = vpop.eup %6728 }
 0xeeb   : > { %v5915_v32 = vadd.f32 -1.0, %v6729_v24  ;;  %v9376_v24 = vld [vmem:[#allocation55_spill] sm:$0xff] }
 0xeec   : > { %vm9377_vm12 = vnez %v9376_v24 }
 0xeed   : > { %v3953_v16 = vsel %vm3948_vm3, %v3947_v58, %v5915_v32  ;;  %v4347_v32 = vld [vmem:[%s8782_s3 + $0xb0] sm:$0xff] }
 0xeee   : > { %v3954_v61 = vmul.f32 %v3953_v16, %v9356_v47  ;;  %v9378_v16 = vld [vmem:[#allocation56_spill] sm:$0xff] }
 0xeef   : > { %vm9379_vm3 = vnez %v9378_v16 }
 0xef0   : > { %6334 = vmatmul.mubr.msk.f32.vlgmr.msra.gmra.mrb[110].mxu1 %vm9362_vm7, %v3954_v61  ;;  %vm9380_vm7 = vmmov %vm9375_vm10 }
 0xef1   : > { %6343 = vmatprep.mubr.msk.f32.mxu1 %vm9342_vm11, %v9026_v7 }
 0xfc3   : > { %v4025_v33 = vpop.f32.mrb[110].mxu1 }
 0xfc4   : > { %v4026_v27 = vadd.f32 %v4025_v33, %v3954_v61  ;;  %v6335_v13 = vpop.f32.mrb[111].mxu1  ;;  %v4850_v61 = vld [vmem:[%s8782_s3 + $0x108] sm:$0xff]  ;;  %v9383_v33 = vld [vmem:[#allocation60_spill] sm:$0xff] }
 0xfc6   : > { %6337 = vmatpush3.msra.mxu0 %v4026_v27 }
 0xfc7   : > { %6339 = vmatmul.mubr.msk.f32.vlgmr.msra.gmra.mrb[102].mxu0 %vm9363_vm4, %v3955_v0  ;;  %6346 = vmatprep.subr.mxu0 %v9026_v7  ;;  %vm9381_vm4 = vmmov %vm9374_vm0 }
 0xfc8   : > { %6348 = vmatprep.mubr.msk.f32.mxu0 %vm9342_vm11, %v9026_v7 }
0x109a   : > { %v4104_v62 = vpop.f32.mrb[102].mxu0 }
0x109b   : > { %v4105_v54 = vadd.f32 %v4104_v62, %v4033_v44  ;;  %v6340_v49 = vpop.f32.mrb[103].mxu0 }
0x109d   : > { %v4109_v51 = vmin.f32 %v4105_v54, 0.0  ;;  %vm4108_vm5 = vcmp.gt.f32.partialorder %v4105_v54, 0.0 }
0x109f   : > { %v4110_v57 = vmul.f32 1.442695, %v4109_v51 }
0x10a1   : > { %6730 = vpow2.f32 %v4110_v57 }
0x10ab   : > { %v6731_v17 = vpop.eup %6730 }
0x10ac   : > { %v5918_v19 = vadd.f32 -1.0, %v6731_v17 }
0x10ae   : > { %v4113_v29 = vsel %vm4108_vm5, %v4105_v54, %v5918_v19  ;;  %vm9382_vm5 = vmmov %vm9380_vm7 }
0x10af   : > { %v4114_v20 = vmul.f32 %v4113_v29, %v9356_v47 }
0x10b1   : > { %6342 = vmatpush3.msra.mxu1 %v4114_v20  ;;  %v4598_v20 = vld [vmem:[%s8782_s3 + $0xd0] sm:$0xff] }
0x10b2   : > { %6344 = vmatmul.mubr.msk.f32.vlgmr.msra.gmra.mrb[112].mxu1 %vm9364_vm8, %v4115_v48  ;;  %6351 = vmatprep.subr.mxu1 %v9026_v7  ;;  %vm9384_vm8 = vcmask 1041408  }
0x10b3   : > { %6353 = vmatprep.mubr.msk.f32.mxu1 %vm9342_vm11, %v9026_v7  ;;  %vm9369_vm11 = vnez %v9368_v36 }
0x1185   : > { %v4191_v46 = vpop.f32.mrb[112].mxu1 }
0x1186   : > { %v4192_v34 = vadd.f32 %v4191_v46, %v4120_v6  ;;  %v6345_v22 = vpop.f32.mrb[113].mxu1  ;;  %v4603_v6 = vpop.permute.xlu0 %4602 }
0x1188   : > { %v4195_v35 = vmul.f32 %v4192_v34, %v9356_v47  ;;  %v9370_v47 = vld [vmem:[#allocation6_spill] sm:$0xff] }
0x1189   : > { %vm9371_vm13 = vnez %v9370_v47 }
0x118a   : > { %6347 = vmatpush3.msk.msra.mxu0 %vm9365_vm6, %v4195_v35  ;;  %6352 = vmatpush3.msk.msra.mxu1 %vm9366_vm1, %v4195_v35  ;;  %vm9385_vm6 = vmmov %vm9361_vm14 }
0x118b   : > { %6349 = vmatmul.mubr.msk.f32.vlgmr.msra.gmra.mrb[104].mxu0 %vm9367_vm9, %v4196_v31  ;;  %6599 = vmatprep.subr.msk.bf16.mxu0 %vm9369_vm11, %v9306_v53  ;;  %vm9387_vm1 = vmmov %vm9384_vm8 }
0x118c   : > { %6601 = vmatpush1.bf16.msk.msra.mxu0 %vm9371_vm13, %v9306_v53  ;;  %6354 = vmatmul.mubr.msk.f32.vlgmr.msra.gmra.mrb[114].mxu1 %vm9372_vm2, %v4273_v43  ;;  %vm9388_vm13 = vcmask 64512  }
0x118d   : > { %5929 = vmatprep.subr.msk.mxu0 %vm9373_vm15, %v8495_v55  ;;  %4415 = vmatprep.mubr.f32.mxu0 %v9026_v7 }
0x118e   : > { %4672 = vmatprep.mubr.f32.mxu1 %v9026_v7 }
0x125e   : > { %v4269_v3 = vpop.f32.mrb[104].mxu0 }
0x125f   : > { %v6350_v58 = vpop.f32.mrb[105].mxu0  ;;  %5928 = vmatmul.mubr.msk.f32.vlgmr.msra.gmra.mrb[106].mxu0 %vm9374_vm0, %v4269_v3  ;;  %v4343_v10 = vpop.f32.mrb[114].mxu1  ;;  %vm9389_vm0 = vmmov %vm9388_vm13 }
0x1260   : > { %5930 = vmatpush1.msk.msra.mxu0 %vm9375_vm10, %v8493_v59  ;;  %4495 = vmatprep.mubr.f32.mxu0 %v9026_v7  ;;  %v6355_v9 = vpop.f32.mrb[115].mxu1  ;;  %vm9394_vm10 = vmmov %vm9385_vm6 }
0x1261   : > { %6603 = vmatprep.subr.msk.bf16.mxu0 %vm9377_vm12, %v9306_v53  ;;  %vm9395_vm12 = vmmov %vm9385_vm6 }
0x1267   : > { %5931 = vmatmul.mubr.msk.f32.vlgmr.msra.gmra.mrb[106].mxu0 %vm9361_vm14, %v4347_v32  ;;  %v4691_v32 = vld [vmem:[%s8782_s3 + $0xe0] sm:$0xf]  ;;  %vm9396_vm14 = vcmask 15360  }
0x1268   : > { %6605 = vmatpush1.bf16.msk.msra.mxu0 %vm9379_vm3, %v9306_v53  ;;  %4569 = vmatprep.mubr.f32.mxu0 %v9026_v7  ;;  %v9386_v53 = vld [vmem:[#allocation59_spill] sm:$0xff]  ;;  %vm9397_vm3 = vmmov %vm9396_vm14 }
0x1269   : > { %5943 = vmatprep.subr.msk.mxu0 %vm9380_vm7, %v8495_v55  ;;  %v4582_v55 = vpop.permute.xlu1 %4581  ;;  %vm9400_vm7 = vmmov %vm9397_vm3 }
0x126f   : > { %5936 = vmatmul.mubr.msk.f32.vlgmr.msra.gmra.mrb[106].mxu0 %vm9381_vm4, %v4343_v10  ;;  %vm9401_vm4 = vmmov %vm9382_vm5 }
0x1270   : > { %5944 = vmatpush1.msk.msra.mxu0 %vm9382_vm5, %v8493_v59  ;;  %4926 = vmatprep.mubr.f32.mxu0 %v9026_v7  ;;  %vm9402_vm5 = vmmov %vm9401_vm4 }
0x1271   : > { %5948 = vmatprep.subr.msk.mxu0 %vm9384_vm8, %v9383_v33  ;;  %vm9403_vm8 = vmmov %vm9385_vm6 }
0x1273   : > { %5945 = vmatmul.mubr.msk.f32.vlgmr.msra.gmra.mrb[108].mxu0 %vm9385_vm6, %v4850_v61 }
0x1274   : > { %5949 = vmatpush1.msk.msra.mxu0 %vm9387_vm1, %v9386_v53  ;;  %4932 = vmatprep.mubr.f32.mxu0 %v9026_v7  ;;  %vm9404_vm1 = vmmov %vm9385_vm6 }
0x1342   : > { %v4571_v27 = vpop.f32.mrb[106].mxu0 }
0x1343   : > { %v4584_v13 = vadd.f32 %v4582_v55, %v4571_v27  ;;  %v4573_v59 = vpop.f32.mrb[107].mxu0 }
0x1344   : > { %v4585_v0 = vadd.f32 %v4582_v55, %v4573_v59 }
0x1345   : > { %v4588_v44 = vmin.f32 %v4584_v13, 0.0  ;;  %vm4586_vm11 = vcmp.gt.f32.partialorder %v4584_v13, 0.0 }
0x1346   : > { %v4589_v62 = vmin.f32 %v4585_v0, 0.0  ;;  %vm4587_vm9 = vcmp.gt.f32.partialorder %v4585_v0, 0.0 }
0x1347   : > { %v4590_v54 = vmul.f32 1.442695, %v4588_v44 }
0x1348   : > { %v4592_v49 = vmul.f32 1.442695, %v4589_v62 }
0x1349   : > { %6732 = vpow2.f32 %v4590_v54 }
0x134a   : > { %6734 = vpow2.f32 %v4592_v49 }
0x1353   : > { %v6733_v51 = vpop.eup %6732 }
0x1354   : > { %v6735_v57 = vpop.eup %6734  ;;  %v5937_v17 = vadd.f32 -1.0, %v6733_v51 }
0x1355   : > { %v5938_v19 = vadd.f32 -1.0, %v6735_v57 }
0x1356   : > { %v4596_v48 = vsel %vm4586_vm11, %v4584_v13, %v5937_v17 }
0x1357   : > { %v4597_v29 = vsel %vm4587_vm9, %v4585_v0, %v5938_v19 }
0x1358   : > { %4608 = vmatprep.subr.mxu1 %v4597_v29 }
0x1359   : > { %4609 = vmatpush1.msra.mxu1 %v4596_v48 }
0x135a   : > { %5939 = vmatmul.mubr.msk.f32.vlgmr.msra.gmra.mrb[116].mxu1 %vm9388_vm13, %v4598_v20 }
0x135b   : > { %4765 = vmatprep.mubr.f32.mxu1 %v9026_v7 }
0x142d   : > { %v4674_v46 = vpop.f32.mrb[116].mxu1 }
0x142e   : > { %v4675_v34 = vadd.f32 %v4674_v46, %v4603_v6  ;;  %v4676_v22 = vpop.f32.mrb[117].mxu1 }
0x142f   : > { %v4677_v35 = vadd.f32 %v4676_v22, %v4603_v6 }
0x1430   : > { %v4681_v31 = vmin.f32 %v4675_v34, 0.0  ;;  %vm4679_vm15 = vcmp.gt.f32.partialorder %v4675_v34, 0.0 }
0x1431   : > { %v4682_v43 = vmin.f32 %v4677_v35, 0.0  ;;  %vm4680_vm2 = vcmp.gt.f32.partialorder %v4677_v35, 0.0 }
0x1432   : > { %v4683_v36 = vmul.f32 1.442695, %v4681_v31 }
0x1433   : > { %v4685_v47 = vmul.f32 1.442695, %v4682_v43 }
0x1434   : > { %6736 = vpow2.f32 %v4683_v36 }
0x1435   : > { %6738 = vpow2.f32 %v4685_v47 }
0x143e   : > { %v6737_v3 = vpop.eup %6736 }
0x143f   : > { %v6739_v58 = vpop.eup %6738  ;;  %v5940_v10 = vadd.f32 -1.0, %v6737_v3 }
0x1440   : > { %v5941_v9 = vadd.f32 -1.0, %v6739_v58 }
0x1441   : > { %v4689_v16 = vsel %vm4679_vm15, %v4675_v34, %v5940_v10 }
0x1442   : > { %v4690_v24 = vsel %vm4680_vm2, %v4677_v35, %v5941_v9 }
0x1443   : > { %4701 = vmatprep.subr.mxu1 %v4690_v24 }
0x1444   : > { %4702 = vmatpush1.msra.mxu1 %v4689_v16 }
0x1445   : > { %5942 = vmatmul.mubr.msk.f32.vlgmr.msra.gmra.mrb[118].mxu1 %vm9389_vm0, %v4691_v32  ;;  %6607 = vmatprep.subr.bf16.mxu1 %v8128_v38  ;;  %v9391_v38 = vld [vmem:[#allocation3_spill] sm:$0xff]  ;;  %vm9405_vm0 = vmmov %vm9401_vm4 }
0x1446   : > { %6609 = vmatpush1.bf16.msra.mxu1 %v8126_v37  ;;  %v9390_v37 = vld [vmem:[#allocation30_spill] sm:$0xff] }
0x1447   : > { %6611 = vmatprep.subr.bf16.mxu1 %v8154_v52  ;;  %v9393_v52 = vld [vmem:[#allocation31_spill] sm:$0xff] }
0x144a   : > { %6613 = vmatpush1.bf16.msra.mxu1 %v8151_v4  ;;  %v9392_v4 = vld [vmem:[#allocation34_spill] sm:$0xff] }
0x144b   : > { %6615 = vmatprep.subr.bf16.mxu1 %v8162_v25  ;;  %v4852_v25 = vld [vmem:[%s8782_s3 + $0x118] sm:$0xf] }
0x144e   : > { %6617 = vmatpush1.bf16.msra.mxu1 %v8160_v41  ;;  %v4851_v41 = vld [vmem:[%s8782_s3 + $0x110] sm:$0xff] }
0x144f   : > { %6619 = vmatprep.subr.bf16.mxu1 %v8191_v30  ;;  %5946 = vmatmul.mubr.msk.f32.gmra.mrb[110].mxu0 %vm9394_vm10, %v4851_v41  ;;  %v4848_v30 = vld [vmem:[%s8782_s3 + $0xf8] sm:$0xff] }
0x1450   : > { %4938 = vmatprep.mubr.f32.mxu0 %v9026_v7 }
0x1452   : > { %6621 = vmatpush1.bf16.msra.mxu1 %v8188_v15  ;;  %v4847_v15 = vld [vmem:[%s8782_s3 + $0xf0] sm:$0xff] }
0x1453   : > { %6623 = vmatprep.subr.bf16.mxu1 %v8206_v26  ;;  %5947 = vmatmul.mubr.msk.f32.gmra.mrb[112].mxu0 %vm9395_vm12, %v4852_v25  ;;  %vm5225_vm12 = vcmask 162816  }
0x1454   : > { %5018 = vmatprep.mubr.f32.mxu0 %v9026_v7 }
0x1456   : > { %6625 = vmatpush1.bf16.msra.mxu1 %v8204_v28  ;;  %v4696_v28 = vpop.permute.xlu1 %4695 }
0x1457   : > { %6627 = vmatprep.subr.bf16.mxu1 %v8214_v21  ;;  %5950 = vmatmul.mubr.msk.f32.vlgmr.msra.gmra.mrb[108].mxu0 %vm9396_vm14, %v4847_v15  ;;  %vm9406_vm14 = vmmov %vm9405_vm0 }
0x1458   : > { %5024 = vmatprep.mubr.f32.mxu0 %v9026_v7 }
0x145a   : > { %6629 = vmatpush1.bf16.msra.mxu1 %v8212_v12  ;;  %v5155_v55 = vpop.permute.xlu1 %5154 }
0x145b   : > { %6631 = vmatprep.subr.bf16.mxu1 %v8222_v23  ;;  %5951 = vmatmul.mubr.msk.f32.gmra.mrb[110].mxu0 %vm9397_vm3, %v4848_v30  ;;  %v9398_v23 = vld [vmem:[#allocation58_spill] sm:$0xff] }
0x145c   : > { %5030 = vmatprep.mubr.f32.mxu0 %v9026_v7 }
0x145e   : > { %6633 = vmatpush1.bf16.msra.mxu1 %v8220_v50 }
0x145f   : > { %6635 = vmatprep.subr.bf16.mxu1 %v8230_v2  ;;  %v9399_v2 = vld [vmem:[#allocation57_spill] sm:$0xff] }
0x1462   : > { %6637 = vmatpush1.bf16.msra.mxu1 %v8228_v42 }
0x1463   : > { %6639 = vmatprep.subr.bf16.mxu1 %v8238_v5  ;;  %v4849_v5 = vld [vmem:[%s8782_s3 + $0x100] sm:$0xf] }
0x1464   : > { %5952 = vmatmul.mubr.msk.f32.gmra.mrb[112].mxu0 %vm9400_vm7, %v4849_v5 }
0x1465   : > { %5119 = vmatprep.mubr.f32.mxu0 %v9026_v7 }
0x1466   : > { %6641 = vmatpush1.bf16.msra.mxu1 %v8236_v56 }
0x1467   : > { %6643 = vmatprep.subr.bf16.mxu1 %v8246_v40 }
0x146a   : > { %6645 = vmatpush1.bf16.msra.mxu1 %v8244_v63 }
0x146b   : > { %6647 = vmatprep.subr.bf16.mxu1 %v8254_v14 }
0x146e   : > { %6649 = vmatpush1.bf16.msra.mxu1 %v8252_v11 }
0x146f   : > { %6651 = vmatprep.subr.bf16.mxu1 %v8262_v18  ;;  %v5038_v18 = vld [vmem:[%s8782_s3 + $0x128] sm:$0xff] }
0x1472   : > { %6653 = vmatpush1.bf16.msra.mxu1 %v8260_v39  ;;  %v5037_v39 = vld [vmem:[%s8782_s3 + $0x120] sm:$0xff] }
0x1473   : > { %6655 = vmatprep.subr.bf16.mxu1 %v8270_v1  ;;  %v5150_v1 = vpop.permute.xlu0 %5149 }
0x1476   : > { %6657 = vmatpush1.bf16.msra.mxu1 %v8268_v8  ;;  %v5039_v8 = vld [vmem:[%s8782_s3 + $0x130] sm:$0xf] }
0x1477   : > { %6659 = vmatprep.subr.bf16.mxu1 %v8278_v45  ;;  %v5160_v51 = vpop.permute.xlu0 %5159 }
0x147a   : > { %6661 = vmatpush1.bf16.msra.mxu1 %v8276_v60 }
0x147b   : > { %6663 = vmatprep.subr.bf16.mxu1 %v9390_v37 }
0x147e   : > { %6665 = vmatpush1.bf16.msra.mxu1 %v9391_v38 }
0x147f   : > { %6667 = vmatprep.subr.bf16.mxu1 %v9392_v4 }
0x1482   : > { %6669 = vmatpush1.bf16.msra.mxu1 %v9393_v52 }
0x1518   : > { %v4767_v26 = vpop.f32.mrb[118].mxu1 }
0x1519   : > { %v4768_v12 = vadd.f32 %v4767_v26, %v4696_v28  ;;  %v4769_v21 = vpop.f32.mrb[119].mxu1 }
0x151a   : > { %v4770_v50 = vadd.f32 %v4769_v21, %v4696_v28  ;;  %v5204_v28 = vld [vmem:[%s8782_s3 + $0x150] sm:$0xff]  ;;  %v5206_v21 = vld [vmem:[%s8782_s3 + $0x160] sm:$0xf] }
0x151b   : > { %v4772_v56 = vmul.f32 %v4768_v12, %v9399_v2  ;;  %v5205_v12 = vld [vmem:[%s8782_s3 + $0x158] sm:$0xff] }
0x151c   : > { %v4773_v42 = vmul.f32 %v4770_v50, %v9398_v23  ;;  %v5213_v50 = vpop.permute.xlu1 %5212 }
0x151e   : > { %4838 = vmatprep.mubr.f32.mxu1 %v4773_v42 }
0x151f   : > { %4839 = vmatmul.mubr.f32.vlgmr.msra.gmra.mrb[120].mxu1 %v4772_v56 }
0x15f2   : > { %v4840_v63 = vpop.f32.mrb[120].mxu1 }
0x15f3   : > { %v4842_v40 = vpop.f32.mrb[121].mxu1  ;;  %v4845_v14 = vadd.f32 %v4840_v63, %v4772_v56  ;;  %v5218_v63 = vpop.permute.xlu0 %5217 }
0x15f4   : > { %v4846_v11 = vadd.f32 %v4842_v40, %v4773_v42 }
0x15f6   : > { %5953 = vmatprep.subr.msk.mxu0 %vm9401_vm4, %v4846_v11 }
0x15f7   : > { %5954 = vmatpush1.msk.msra.mxu0 %vm9402_vm5, %v4845_v14 }
0x15f8   : > { %5955 = vmatmul.mubr.msk.f32.vlgmr.msra.gmra.mrb[108].mxu0 %vm9403_vm8, %v5037_v39 }
0x15f9   : > { %5125 = vmatprep.mubr.f32.mxu0 %v9026_v7 }
0x15fc   : > { %5956 = vmatmul.mubr.msk.f32.gmra.mrb[110].mxu0 %vm9385_vm6, %v5038_v18  ;;  %vm9407_vm6 = vmmov %vm9405_vm0 }
0x15fd   : > { %5131 = vmatprep.mubr.f32.mxu0 %v9026_v7 }
0x1600   : > { %5957 = vmatmul.mubr.msk.f32.gmra.mrb[112].mxu0 %vm9404_vm1, %v5039_v8 }
0x1601   : > { %5305 = vmatprep.mubr.f32.mxu0 %v9026_v7 }
0x16cb   : > { %v5121_v60 = vpop.f32.mrb[108].mxu0 }
0x16cc   : > { %v5162_v45 = vadd.f32 %v5150_v1, %v5121_v60  ;;  %v5123_v61 = vpop.f32.mrb[109].mxu0 }
0x16cd   : > { %v5163_v33 = vadd.f32 %v5150_v1, %v5123_v61 }
0x16ce   : > { %v5174_v53 = vmin.f32 %v5162_v45, 0.0  ;;  %vm5168_vm9 = vcmp.gt.f32.partialorder %v5162_v45, 0.0 }
0x16cf   : > { %v5175_v27 = vmin.f32 %v5163_v33, 0.0  ;;  %v5127_v13 = vpop.f32.mrb[110].mxu0  ;;  %vm5169_vm13 = vcmp.gt.f32.partialorder %v5163_v33, 0.0 }
0x16d0   : > { %v5180_v59 = vmul.f32 1.442695, %v5174_v53  ;;  %v5164_v0 = vadd.f32 %v5155_v55, %v5127_v13  ;;  %v5129_v44 = vpop.f32.mrb[111].mxu0 }
0x16d1   : > { %v5182_v62 = vmul.f32 1.442695, %v5175_v27  ;;  %v5165_v54 = vadd.f32 %v5155_v55, %v5129_v44 }
0x16d2   : > { %6740 = vpow2.f32 %v5180_v59  ;;  %v5176_v49 = vmin.f32 %v5164_v0, 0.0  ;;  %vm5170_vm11 = vcmp.gt.f32.partialorder %v5164_v0, 0.0 }
0x16d3   : > { %6742 = vpow2.f32 %v5182_v62  ;;  %v5177_v57 = vmin.f32 %v5165_v54, 0.0  ;;  %v5133_v17 = vpop.f32.mrb[112].mxu0  ;;  %vm5171_vm2 = vcmp.gt.f32.partialorder %v5165_v54, 0.0 }
0x16d4   : > { %v5184_v19 = vmul.f32 1.442695, %v5176_v49  ;;  %v5166_v29 = vadd.f32 %v5160_v51, %v5133_v17  ;;  %v5135_v20 = vpop.f32.mrb[113].mxu0 }
0x16d5   : > { %v5186_v48 = vmul.f32 1.442695, %v5177_v57  ;;  %v5167_v6 = vadd.f32 %v5160_v51, %v5135_v20 }
0x16d6   : > { %6744 = vpow2.f32 %v5184_v19  ;;  %v5178_v46 = vmin.f32 %v5166_v29, 0.0  ;;  %vm5172_vm10 = vcmp.gt.f32.partialorder %v5166_v29, 0.0 }
0x16d7   : > { %6746 = vpow2.f32 %v5186_v48  ;;  %v5179_v34 = vmin.f32 %v5167_v6, 0.0  ;;  %vm5173_vm15 = vcmp.gt.f32.partialorder %v5167_v6, 0.0 }
0x16d8   : > { %v5188_v22 = vmul.f32 1.442695, %v5178_v46 }
0x16d9   : > { %v5190_v35 = vmul.f32 1.442695, %v5179_v34 }
0x16da   : > { %6748 = vpow2.f32 %v5188_v22 }
0x16db   : > { %6750 = vpow2.f32 %v5190_v35 }
0x16dc   : > { %v6741_v31 = vpop.eup %6740 }
0x16dd   : > { %v6743_v43 = vpop.eup %6742  ;;  %v5958_v36 = vadd.f32 -1.0, %v6741_v31 }
0x16de   : > { %v5959_v3 = vadd.f32 -1.0, %v6743_v43 }
0x16df   : > { %v5198_v24 = vsel %vm5168_vm9, %v5162_v45, %v5958_v36  ;;  %v5223_v45 = vpop.permute.xlu1 %5222  ;;  %vm9408_vm9 = vmmov %vm9405_vm0 }
0x16e0   : > { %v6745_v47 = vpop.eup %6744  ;;  %v5199_v38 = vsel %vm5169_vm13, %v5163_v33, %v5959_v3 }
0x16e1   : > { %v6747_v58 = vpop.eup %6746  ;;  %v5960_v10 = vadd.f32 -1.0, %v6745_v47 }
0x16e2   : > { %v5961_v9 = vadd.f32 -1.0, %v6747_v58 }
0x16e3   : > { %v5200_v32 = vsel %vm5170_vm11, %v5164_v0, %v5960_v10  ;;  %v5360_v10 = vld [vmem:[%s8782_s3 + $0x180] sm:$0x1] }
0x16e4   : > { %v6749_v16 = vpop.eup %6748  ;;  %v6672_v37 = vpack.c.bf16 %v5200_v32, %v5198_v24  ;;  %v5201_v4 = vsel %vm5171_vm2, %v5165_v54, %v5961_v9  ;;  %v6777_v24 = vmov 1966171168  }
0x16e5   : > { %v6751_v52 = vpop.eup %6750  ;;  %v6670_v41 = vpack.c.bf16 %v5201_v4, %v5199_v38  ;;  %v5962_v15 = vadd.f32 -1.0, %v6749_v16  ;;  %v5453_v32 = vunpack.c.l.s4 %v6777_v24  ;;  %v9409_v16 = vld [vmem:[#allocation51_spill] sm:$0xff]  ;;  %v9412_v4 = vld [vmem:[#allocation52_spill] sm:$0xff] }
0x16e6   : > { %v5963_v25 = vadd.f32 -1.0, %v6751_v52  ;;  %v9413_v52 = vld [vmem:[#allocation54_spill] sm:$0xff] }
0x16e7   : > { %6671 = vmatprep.subr.bf16.mxu0 %v6670_v41  ;;  %v5202_v26 = vsel %vm5172_vm10, %v5166_v29, %v5962_v15  ;;  %vm9414_vm13 = vcmp.eq.f32.partialorder %v9412_v4, %v9413_v52 }
0x16e8   : > { %6673 = vmatpush1.bf16.msra.mxu0 %v6672_v37  ;;  %v5203_v30 = vsel %vm5173_vm15, %v5167_v6, %v5963_v25  ;;  %v9410_v37 = vld [vmem:[#allocation53_spill] sm:$0xff]  ;;  %v5736_v41 = vsel %vm9414_vm13, 1.0, %v9026_v7  ;;  %v5365_v25 = vpop.permute.xlu0 %5364 }
0x16e9   : > { %5964 = vmatprep.subr.msk.mxu0 %vm9405_vm0, %v5203_v30  ;;  %vm9411_vm11 = vcmp.eq.f32.partialorder %v9409_v16, %v9410_v37  ;;  %v5454_v30 = vunpack.c.0.s8 %v5453_v32 }
0x16ea   : > { %v5735_v38 = vsel %vm9411_vm11, 1.0, %v9026_v7 }
0x16ec   : > { %5965 = vmatpush1.msk.msra.mxu0 %vm9406_vm14, %v5202_v26 }
0x16ed   : > { %5966 = vmatmul.mubr.msk.f32.vlgmr.msra.gmra.mrb[114].mxu0 %vm5225_vm12, %v5204_v28  ;;  %v1903_v28 = vsub.f32 1.0, %v5735_v38 }
0x16ee   : > { %5311 = vmatprep.mubr.f32.mxu0 %v9026_v7 }
0x16f1   : > { %5967 = vmatmul.mubr.msk.f32.gmra.mrb[116].mxu0 %vm5225_vm12, %v5205_v12 }
0x16f2   : > { %5317 = vmatprep.mubr.f32.mxu0 %v9026_v7 }
0x16f5   : > { %5968 = vmatmul.mubr.msk.f32.gmra.mrb[118].mxu0 %vm5225_vm12, %v5206_v21  ;;  %v1904_v21 = vsub.f32 1.0, %v5736_v41 }
0x16f6   : > { %5440 = vmatprep.mubr.f32.mxu0 %v9026_v7  ;;  %v9416_v7 = vlaneseq }
0x16f8   : > { %vm5469_vm2 = vcmp.lt.s32.totalorder %v9416_v7, 256 }
0x17c0   : > { %v5307_v23 = vpop.f32.mrb[114].mxu0 }
0x17c1   : > { %v5308_v42 = vadd.f32 %v5307_v23, %v5213_v50  ;;  %v5309_v2 = vpop.f32.mrb[115].mxu0 }
0x17c2   : > { %v5310_v56 = vadd.f32 %v5309_v2, %v5213_v50  ;;  %v9415_v2 = vld [vmem:[#allocation2_spill] sm:$0xff] }
0x17c3   : > { %v5330_v5 = vmin.f32 %v5308_v42, 0.0  ;;  %vm5324_vm3 = vcmp.gt.f32.partialorder %v5308_v42, 0.0 }
0x17c4   : > { %v5331_v40 = vmin.f32 %v5310_v56, 0.0  ;;  %v5313_v11 = vpop.f32.mrb[116].mxu0  ;;  %vm5325_vm4 = vcmp.gt.f32.partialorder %v5310_v56, 0.0 }
0x17c5   : > { %v5336_v14 = vmul.f32 1.442695, %v5330_v5  ;;  %v5314_v39 = vadd.f32 %v5313_v11, %v5218_v63  ;;  %v5315_v18 = vpop.f32.mrb[117].mxu0 }
0x17c6   : > { %v5338_v8 = vmul.f32 1.442695, %v5331_v40  ;;  %v5316_v1 = vadd.f32 %v5315_v18, %v5218_v63 }
0x17c7   : > { %6752 = vpow2.f32 %v5336_v14  ;;  %v5332_v60 = vmin.f32 %v5314_v39, 0.0  ;;  %vm5326_vm7 = vcmp.gt.f32.partialorder %v5314_v39, 0.0 }
0x17c8   : > { %6754 = vpow2.f32 %v5338_v8  ;;  %v5333_v61 = vmin.f32 %v5316_v1, 0.0  ;;  %v5319_v33 = vpop.f32.mrb[118].mxu0  ;;  %vm5327_vm5 = vcmp.gt.f32.partialorder %v5316_v1, 0.0 }
0x17c9   : > { %v5340_v53 = vmul.f32 1.442695, %v5332_v60  ;;  %v5320_v55 = vadd.f32 %v5319_v33, %v5223_v45  ;;  %v5321_v27 = vpop.f32.mrb[119].mxu0 }
0x17ca   : > { %v5342_v13 = vmul.f32 1.442695, %v5333_v61  ;;  %v5322_v59 = vadd.f32 %v5321_v27, %v5223_v45 }
0x17cb   : > { %6756 = vpow2.f32 %v5340_v53  ;;  %v5334_v0 = vmin.f32 %v5320_v55, 0.0  ;;  %vm5328_vm1 = vcmp.gt.f32.partialorder %v5320_v55, 0.0 }
0x17cc   : > { %6758 = vpow2.f32 %v5342_v13  ;;  %v5335_v44 = vmin.f32 %v5322_v59, 0.0  ;;  %vm5329_vm8 = vcmp.gt.f32.partialorder %v5322_v59, 0.0 }
0x17cd   : > { %v5344_v62 = vmul.f32 1.442695, %v5334_v0 }
0x17ce   : > { %v5346_v54 = vmul.f32 1.442695, %v5335_v44 }
0x17cf   : > { %6760 = vpow2.f32 %v5344_v62 }
0x17d0   : > { %6762 = vpow2.f32 %v5346_v54 }
0x17d1   : > { %v6753_v49 = vpop.eup %6752 }
0x17d2   : > { %v6755_v51 = vpop.eup %6754  ;;  %v5969_v57 = vadd.f32 -1.0, %v6753_v49 }
0x17d3   : > { %v5970_v19 = vadd.f32 -1.0, %v6755_v51 }
0x17d4   : > { %v5354_v6 = vsel %vm5324_vm3, %v5308_v42, %v5969_v57 }
0x17d5   : > { %v6757_v17 = vpop.eup %6756  ;;  %v5355_v35 = vsel %vm5325_vm4, %v5310_v56, %v5970_v19  ;;  %v5457_v56 = vsub.s32 %v5454_v30, %v9415_v2 }
0x17d6   : > { %v6759_v29 = vpop.eup %6758  ;;  %v5971_v20 = vadd.f32 -1.0, %v6757_v17 }
0x17d7   : > { %v5972_v48 = vadd.f32 -1.0, %v6759_v29 }
0x17d8   : > { %v5356_v46 = vsel %vm5326_vm7, %v5314_v39, %v5971_v20 }
0x17d9   : > { %v6761_v34 = vpop.eup %6760  ;;  %v6676_v22 = vpack.c.bf16 %v5356_v46, %v5354_v6  ;;  %v5357_v31 = vsel %vm5327_vm5, %v5316_v1, %v5972_v48 }
0x17da   : > { %v6763_v43 = vpop.eup %6762  ;;  %v6674_v36 = vpack.c.bf16 %v5357_v31, %v5355_v35  ;;  %v5973_v3 = vadd.f32 -1.0, %v6761_v34 }
0x17db   : > { %v5974_v47 = vadd.f32 -1.0, %v6763_v43 }
0x17dc   : > { %6675 = vmatprep.subr.bf16.mxu0 %v6674_v36  ;;  %v5358_v9 = vsel %vm5328_vm1, %v5320_v55, %v5973_v3 }
0x17dd   : > { %6677 = vmatpush1.bf16.msra.mxu0 %v6676_v22  ;;  %v5359_v58 = vsel %vm5329_vm8, %v5322_v59, %v5974_v47 }
0x17de   : > { %5975 = vmatprep.subr.msk.mxu0 %vm9407_vm6, %v5359_v58 }
0x17e1   : > { %5976 = vmatpush1.msk.msra.mxu0 %vm9408_vm9, %v5358_v9 }
0x17e2   : > { %5977 = vmatmul.mubr.msk.f32.vlgmr.msra.gmra.mrb[120].mxu0 %vm5225_vm12, %v5360_v10 }
0x18b5   : > { %v5442_v15 = vpop.f32.mrb[120].mxu0 }
0x18b6   : > { %v5443_v26 = vadd.f32 %v5442_v15, %v5365_v25  ;;  %v5444_v12 = vpop.f32.mrb[121].mxu0 }
0x18b7   : > { %v5445_v50 = vadd.f32 %v5444_v12, %v5365_v25 }
0x18b8   : > { %v5447_v23 = vmul.f32 %v5443_v26, %v1903_v28 }
0x18b9   : > { %v5448_v42 = vmul.f32 %v5445_v50, %v1904_v21 }
0x18bb   : > { %v5451_v5 = vcombine.low %v5447_v23, %v5448_v42 }
0x18bd   : > { %v5458_v63 = vrot.slane %v5451_v5, %v5457_v56 }
0x18bf   : > { %v5465_v40 = vrot.slane %v5458_v63, %v5457_v56 }
0x18c1   : > { %5471 = vst.msk [vmem:[%s223_s11] sm:$0x3] %vm5469_vm2, %v5465_v40 }
0x18c2 PF: > { %s14_s15 = sadd.s32 1, %s6770_s15  }
0x18c3   : > { %p11_p4 = scmp.ge.s32.totalorder %s14_s15, 4  }
0x18c5   :  { %13 = sbr.rel (!%p11_p4) target bundleno = 1 (0x1), region = 72 }

</bundles_post_ra>
